<compile_context>
chip_gen: v7x
topology: tpu7x:2x2x1
jax: 0.10.0
libtpu: 0.0.40
codegen_flags: <defaults>
</compile_context>

<pallas_src>
import functools

import numpy as np
import jax
import jax.numpy as jnp
from jax.experimental import pallas as pl
from jax.experimental.pallas import tpu as pltpu

V_TH = 1.0
V_RESET = 0.0
MARGIN = 128          # left guard width inside the padded conv buffers (lane-aligned)


# ----------------------- host-side constant builders ------------------------
def _conv_mask(H, W, Qp):
    """(9, Qp) {0,1} f32 validity mask per 3x3 tap on the lane axis q = y*W + x
    (batch-independent); lanes q >= H*W (padding) are always 0."""
    q = np.arange(Qp)
    y = (q // W) % H
    x = q % W
    valid = q < H * W
    rows = []
    for dy in (-1, 0, 1):
        for dx in (-1, 0, 1):
            ok = valid & (y + dy >= 0) & (y + dy < H) & (x + dx >= 0) & (x + dx < W)
            rows.append(ok.astype(np.float32))
    return np.stack(rows, axis=0)


def _pool_matrix(H, W, Qp_in, Qp_out):
    """(Qp_in, Qp_out) {0,1} sum-pool matrix over 2x2 windows of one image
    (batch-independent; padded rows/cols are zero).  Max-pool of {0,1} spikes
    == sum-pool >= 0.5."""
    Ho, Wo = H // 2, W // 2
    p = np.arange(Qp_in)[:, None]
    q = np.arange(Qp_out)[None, :]
    m = ((p < H * W) & (q < Ho * Wo) &
         ((p // W) // 2 == q // Wo) & ((p % W) // 2 == q % Wo))
    return m.astype(np.float32)


# ------------------------------ fused kernel --------------------------------
def _snn_kernel(x_ref, w1_ref, w2_ref, wfc1_ref, wfc2_ref,
                m1_ref, m2_ref, pm1_ref, pm2_ref, o_ref,
                xpad1_ref, pat1_ref, xpad2_ref, pat2_ref,
                *, B, C1, C2, T, H, inv_tau, v_th, v_reset):
    f32 = jnp.float32
    W1 = H            # 28
    W2 = H // 2       # 14
    Q1 = pat1_ref.shape[1]   # 896
    Q2 = pat2_ref.shape[1]   # 256

    def build_patches(xpad_ref, pat_ref, mask_ref, rows_per_tap, W, Qp):
        # For tap k = (dy+1)*3 + (dx+1):
        #   pat[k*rows:(k+1)*rows, :] = xpad[:, MARGIN+s : MARGIN+s+Qp] * mask[k]
        # with s = dy*W + dx.  Writes are full-width and lane-aligned; shifted
        # reads stay inside one image (batch is on the sublane axis).
        k = 0
        for dy in (-1, 0, 1):
            for dx in (-1, 0, 1):
                s = dy * W + dx
                shifted = xpad_ref[:, MARGIN + s:MARGIN + s + Qp]
                pat_ref[k * rows_per_tap:(k + 1) * rows_per_tap, :] = (
                    shifted * mask_ref[k:k + 1, :])
                k += 1

    # -------- conv1 + IF (28x28, Cin=1).  IF from V=0 run once: spike = h>=v_th.
    xpad1_ref[:, 0:MARGIN] = jnp.zeros((B, MARGIN), f32)
    xpad1_ref[:, MARGIN + Q1:] = jnp.zeros(
        (B, xpad1_ref.shape[1] - MARGIN - Q1), f32)
    xpad1_ref[:, MARGIN:MARGIN + Q1] = x_ref[...]            # trailing lanes of x are 0
    build_patches(xpad1_ref, pat1_ref, m1_ref, B, W1, Q1)
    h1 = jnp.dot(w1_ref[...], pat1_ref[...], preferred_element_type=f32)  # (C1*B, Q1)
    s1 = (h1 >= v_th).astype(jnp.bfloat16)                   # bf16 only on MXU operand

    # -------- 2x2 max-pool of binary spikes: sum-pool matmul then >= 0.5.
    p1 = (jnp.dot(s1, pm1_ref[...], preferred_element_type=f32)
          >= 0.5).astype(f32)                                # (C1*B, Q2); pad lanes = 0

    # -------- conv2 + IF (14x14, Cin=10).
    xpad2_ref[:, 0:MARGIN] = jnp.zeros((C1 * B, MARGIN), f32)
    xpad2_ref[:, MARGIN + Q2:] = jnp.zeros(
        (C1 * B, xpad2_ref.shape[1] - MARGIN - Q2), f32)
    xpad2_ref[:, MARGIN:MARGIN + Q2] = p1
    build_patches(xpad2_ref, pat2_ref, m2_ref, C1 * B, W2, Q2)
    h2 = jnp.dot(w2_ref[...], pat2_ref[...], preferred_element_type=f32)  # (C2*B, Q2)
    s2 = (h2 >= v_th).astype(jnp.bfloat16)
    p2 = (jnp.dot(s2, pm2_ref[...], preferred_element_type=f32)
          >= 0.5).astype(f32)                                # (C2*B, 128); hw<49 valid

    # -------- FC1: NCHW flatten folded into the lane-padded weight.
    # fcin[b, c*128 + hw] = p2[c*B + b, hw]; 20 lane-aligned (B,128) blocks.
    fcin = jnp.concatenate([p2[c * B:(c + 1) * B, :] for c in range(C2)], axis=1)
    hfc1 = jnp.dot(fcin, wfc1_ref[...], preferred_element_type=f32)       # (B, 100)

    # -------- LIF layer 1 (decay_input=True, hard reset), unrolled over T.
    # Its input hfc1 is constant over time, so run the whole recurrence on the
    # VPU first and do FC2 as ONE matmul over all T steps afterwards.
    v1 = jnp.zeros_like(hfc1)
    sp1_steps = []
    for _ in range(T):
        v1 = v1 + (hfc1 - (v1 - v_reset)) * inv_tau
        sp = (v1 >= v_th).astype(f32)
        v1 = jnp.where(sp > 0.0, v_reset, v1)
        sp1_steps.append(sp)
    sp1_all = jnp.concatenate(sp1_steps, axis=0)                          # (T*B, 100)
    hf2_all = jnp.dot(sp1_all, wfc2_ref[...], preferred_element_type=f32)  # (T*B, 10)

    # -------- LIF layer 2 + spike counting (tiny (B,10) VPU recurrence).
    n_out = o_ref.shape[1]
    v2 = jnp.zeros((B, n_out), f32)
    cnt = jnp.zeros((B, n_out), f32)
    for t in range(T):
        h = hf2_all[t * B:(t + 1) * B, :]
        v2 = v2 + (h - (v2 - v_reset)) * inv_tau
        sp = (v2 >= v_th).astype(f32)
        v2 = jnp.where(sp > 0.0, v_reset, v2)
        cnt = cnt + sp

    # -------- softmax(cnt / T): fold 1/T into the exponent, EUP reciprocal.
    mx = jnp.max(cnt, axis=-1, keepdims=True)
    e = jnp.exp((cnt - mx) * (1.0 / T))
    denom = jnp.sum(e, axis=-1, keepdims=True)
    o_ref[...] = e * pl.reciprocal(denom, approx=True)


# --------------------------------- wrapper -----------------------------------
def model_forward(x, params, T, tau):
    w1, w2, wfc1, wfc2 = params        # (10,1,3,3) (20,10,3,3) (100,980) (10,100)
    B = x.shape[0]
    H = W = x.shape[-1]                # 28, fixed by Linear(20*7*7, 100)
    C1, C2 = w1.shape[0], w2.shape[0]
    n_hidden = wfc1.shape[0]           # 100
    n_out = wfc2.shape[0]              # 10
    hw3 = (H // 4) * (W // 4)          # 49

    Q1, Q2, Q3 = 896, 256, 128         # 784/196/49 lane-padded to multiples of 128

    # input: (B,1,28,28) -> (B, 896) with zero trailing lane pad (batch on sublanes)
    x_flat = jnp.pad(x.reshape(B, H * W), ((0, 0), (0, Q1 - H * W)))

    # conv weights as batch-block-diagonal matrices (tiny; constant-fold under jit)
    eye_b = jnp.eye(B, dtype=w1.dtype)
    w1k = w1.reshape(C1, 9)                                     # tap k = ky*3 + kx
    w2k = jnp.transpose(w2, (0, 2, 3, 1)).reshape(C2, 9 * C1)   # column k*C1 + ci
    w1_blk = jnp.kron(w1k, eye_b)                               # (C1*B, 9*B)
    w2_blk = jnp.kron(w2k, eye_b)                               # (C2*B, 9*C1*B)

    # FC1 weight with the NCHW flatten + lane padding folded in:
    #   wfc1_r[c*128 + hw, n] = wfc1[n, c*49 + hw]   (hw >= 49 rows are zero)
    wfc1_r = jnp.pad(wfc1.reshape(n_hidden, C2, hw3), ((0, 0), (0, 0), (0, Q3 - hw3)))
    wfc1_r = jnp.transpose(wfc1_r, (1, 2, 0)).reshape(C2 * Q3, n_hidden)
    wfc2_t = jnp.transpose(wfc2)                                # (100, 10)

    # batch-independent boundary masks & 2x2 sum-pool matrices (bf16 exact for 0/1)
    # TODO(synk): on v5e/v6e the pool matrices could use the int8 MXU path instead.
    m1 = jnp.asarray(_conv_mask(H, W, Q1))                                   # (9, 896)
    m2 = jnp.asarray(_conv_mask(H // 2, W // 2, Q2))                         # (9, 256)
    pm1 = jnp.asarray(_pool_matrix(H, W, Q1, Q2), dtype=jnp.bfloat16)        # (896, 256)
    pm2 = jnp.asarray(_pool_matrix(H // 2, W // 2, Q2, Q3), dtype=jnp.bfloat16)  # (256, 128)

    kernel = functools.partial(_snn_kernel, B=B, C1=C1, C2=C2, T=T, H=H,
                               inv_tau=1.0 / tau, v_th=V_TH, v_reset=V_RESET)
    # TODO(synk): on v7x the B images could be split across the two TensorCores
    # with grid=(B,) + dimension_semantics=("parallel",) now that all constants
    # are batch-independent; kept as a single invocation here (latency-bound at B=2).
    return pl.pallas_call(
        kernel,
        out_shape=jax.ShapeDtypeStruct((B, n_out), jnp.float32),
        scratch_shapes=[
            pltpu.VMEM((B, MARGIN + Q1 + 128), jnp.float32),        # padded conv1 input
            pltpu.VMEM((9 * B, Q1), jnp.float32),                   # conv1 im2col patches
            pltpu.VMEM((C1 * B, MARGIN + Q2 + 128), jnp.float32),   # padded conv2 input
            pltpu.VMEM((9 * C1 * B, Q2), jnp.float32),              # conv2 im2col patches
        ],
    )(x_flat, w1_blk, w2_blk, wfc1_r, wfc2_t, m1, m2, pm1, pm2)

# TODO(synk): surrogate.ATan only affects the backward pass; the forward uses the
# exact Heaviside spike, which is what is implemented here.


if __name__ == "__main__":
    T, tau = 4, 2.0
    key = jax.random.PRNGKey(0)
    k1, k2, k3, k4, kx = jax.random.split(key, 5)
    # Deterministic synthetic parameters (shapes dictated by the module).
    w1 = jax.random.normal(k1, (10, 1, 3, 3), jnp.float32) * 0.5
    w2 = jax.random.normal(k2, (20, 10, 3, 3), jnp.float32) * 0.15
    wfc1 = jax.random.normal(k3, (100, 20 * 7 * 7), jnp.float32) * 0.05
    wfc2 = jax.random.normal(k4, (10, 100), jnp.float32) * 0.3
    # 28x28 input is required by the fixed Linear(20*7*7, 100); batch = 2.
    x = jax.random.uniform(kx, (2, 1, 28, 28), dtype=jnp.float32)

    fwd = jax.jit(lambda xx: model_forward(xx, (w1, w2, wfc1, wfc2), T, tau))
    out = jax.block_until_ready(fwd(x))

    assert out.shape == (2, 10)
    assert bool(jnp.all(jnp.isfinite(out)))
    assert bool(jnp.all(out >= 0.0))
    # approx reciprocal in the softmax -> allow a small tolerance on the row sums
    assert bool(jnp.allclose(jnp.sum(out, axis=-1), 1.0, atol=1e-2))
    print("KERNEL_OK")
</pallas_src>

<mosaic_0001>
module attributes {stable_mosaic.version = 11 : i64} {
  func.func @_snn_kernel(%arg0: memref<2x896xf32, #tpu.memory_space<vmem>>, %arg1: memref<20x18xf32, #tpu.memory_space<vmem>>, %arg2: memref<40x180xf32, #tpu.memory_space<vmem>>, %arg3: memref<2560x100xf32, #tpu.memory_space<vmem>>, %arg4: memref<100x10xf32, #tpu.memory_space<vmem>>, %arg5: memref<9x896xf32, #tpu.memory_space<vmem>>, %arg6: memref<9x256xf32, #tpu.memory_space<vmem>>, %arg7: memref<896x256xbf16, #tpu.memory_space<vmem>>, %arg8: memref<256x128xbf16, #tpu.memory_space<vmem>>, %arg9: memref<2x10xf32, #tpu.memory_space<vmem>>, %arg10: memref<2x1152xf32, #tpu.memory_space<vmem>>, %arg11: memref<18x896xf32, #tpu.memory_space<vmem>>, %arg12: memref<20x512xf32, #tpu.memory_space<vmem>>, %arg13: memref<180x256xf32, #tpu.memory_space<vmem>>) attributes {dimension_semantics = [], scalar_prefetch = 0 : i64, scratch_operands = 4 : i64, tpu.core_type = #tpu.core_type<tc>} {
    %cst = arith.constant 0.000000e+00 : f32
    %0 = vector.broadcast %cst : f32 to vector<2x128xf32>
    %c0 = arith.constant 0 : index
    %c0_0 = arith.constant 0 : index
    %1 = vector.load %arg10[%c0, %c0_0] : memref<2x1152xf32, #tpu.memory_space<vmem>>, vector<2x128xf32>
    tpu.vector_store %arg10[%c0, %c0_0], %0 {strides = array<i32>} : memref<2x1152xf32, #tpu.memory_space<vmem>>, vector<2x128xf32>,
    %cst_1 = arith.constant 0.000000e+00 : f32
    %2 = vector.broadcast %cst_1 : f32 to vector<2x128xf32>
    %c0_2 = arith.constant 0 : index
    %c1024 = arith.constant 1024 : index
    %3 = vector.load %arg10[%c0_2, %c1024] : memref<2x1152xf32, #tpu.memory_space<vmem>>, vector<2x128xf32>
    tpu.vector_store %arg10[%c0_2, %c1024], %2 {strides = array<i32>} : memref<2x1152xf32, #tpu.memory_space<vmem>>, vector<2x128xf32>,
    %c0_3 = arith.constant 0 : index
    %c0_4 = arith.constant 0 : index
    %4 = vector.load %arg0[%c0_3, %c0_4] : memref<2x896xf32, #tpu.memory_space<vmem>>, vector<2x896xf32>
    %c0_5 = arith.constant 0 : index
    %c128 = arith.constant 128 : index
    %5 = vector.load %arg10[%c0_5, %c128] : memref<2x1152xf32, #tpu.memory_space<vmem>>, vector<2x896xf32>
    tpu.vector_store %arg10[%c0_5, %c128], %4 {strides = array<i32>} : memref<2x1152xf32, #tpu.memory_space<vmem>>, vector<2x896xf32>,
    %c0_6 = arith.constant 0 : index
    %c99 = arith.constant 99 : index
    %6 = vector.load %arg10[%c0_6, %c99] : memref<2x1152xf32, #tpu.memory_space<vmem>>, vector<2x896xf32>
    %c0_7 = arith.constant 0 : index
    %c0_8 = arith.constant 0 : index
    %7 = vector.load %arg5[%c0_7, %c0_8] : memref<9x896xf32, #tpu.memory_space<vmem>>, vector<1x896xf32>
    %8 = vector.broadcast %7 : vector<1x896xf32> to vector<2x896xf32>
    %9 = arith.mulf %6, %8 : vector<2x896xf32>
    %c0_9 = arith.constant 0 : index
    %c0_10 = arith.constant 0 : index
    %10 = vector.load %arg11[%c0_9, %c0_10] : memref<18x896xf32, #tpu.memory_space<vmem>>, vector<2x896xf32>
    tpu.vector_store %arg11[%c0_9, %c0_10], %9 {strides = array<i32>} : memref<18x896xf32, #tpu.memory_space<vmem>>, vector<2x896xf32>,
    %c0_11 = arith.constant 0 : index
    %c100 = arith.constant 100 : index
    %11 = vector.load %arg10[%c0_11, %c100] : memref<2x1152xf32, #tpu.memory_space<vmem>>, vector<2x896xf32>
    %c1 = arith.constant 1 : index
    %c0_12 = arith.constant 0 : index
    %12 = vector.load %arg5[%c1, %c0_12] : memref<9x896xf32, #tpu.memory_space<vmem>>, vector<1x896xf32>
    %13 = vector.broadcast %12 : vector<1x896xf32> to vector<2x896xf32>
    %14 = arith.mulf %11, %13 : vector<2x896xf32>
    %c2 = arith.constant 2 : index
    %c0_13 = arith.constant 0 : index
    %15 = vector.load %arg11[%c2, %c0_13] : memref<18x896xf32, #tpu.memory_space<vmem>>, vector<2x896xf32>
    tpu.vector_store %arg11[%c2, %c0_13], %14 {strides = array<i32>} : memref<18x896xf32, #tpu.memory_space<vmem>>, vector<2x896xf32>,
    %c0_14 = arith.constant 0 : index
    %c101 = arith.constant 101 : index
    %16 = vector.load %arg10[%c0_14, %c101] : memref<2x1152xf32, #tpu.memory_space<vmem>>, vector<2x896xf32>
    %c2_15 = arith.constant 2 : index
    %c0_16 = arith.constant 0 : index
    %17 = vector.load %arg5[%c2_15, %c0_16] : memref<9x896xf32, #tpu.memory_space<vmem>>, vector<1x896xf32>
    %18 = vector.broadcast %17 : vector<1x896xf32> to vector<2x896xf32>
    %19 = arith.mulf %16, %18 : vector<2x896xf32>
    %c4 = arith.constant 4 : index
    %c0_17 = arith.constant 0 : index
    %20 = vector.load %arg11[%c4, %c0_17] : memref<18x896xf32, #tpu.memory_space<vmem>>, vector<2x896xf32>
    tpu.vector_store %arg11[%c4, %c0_17], %19 {strides = array<i32>} : memref<18x896xf32, #tpu.memory_space<vmem>>, vector<2x896xf32>,
    %c0_18 = arith.constant 0 : index
    %c127 = arith.constant 127 : index
    %21 = vector.load %arg10[%c0_18, %c127] : memref<2x1152xf32, #tpu.memory_space<vmem>>, vector<2x896xf32>
    %c3 = arith.constant 3 : index
    %c0_19 = arith.constant 0 : index
    %22 = vector.load %arg5[%c3, %c0_19] : memref<9x896xf32, #tpu.memory_space<vmem>>, vector<1x896xf32>
    %23 = vector.broadcast %22 : vector<1x896xf32> to vector<2x896xf32>
    %24 = arith.mulf %21, %23 : vector<2x896xf32>
    %c6 = arith.constant 6 : index
    %c0_20 = arith.constant 0 : index
    %25 = vector.load %arg11[%c6, %c0_20] : memref<18x896xf32, #tpu.memory_space<vmem>>, vector<2x896xf32>
    tpu.vector_store %arg11[%c6, %c0_20], %24 {strides = array<i32>} : memref<18x896xf32, #tpu.memory_space<vmem>>, vector<2x896xf32>,
    %c0_21 = arith.constant 0 : index
    %c128_22 = arith.constant 128 : index
    %26 = vector.load %arg10[%c0_21, %c128_22] : memref<2x1152xf32, #tpu.memory_space<vmem>>, vector<2x896xf32>
    %c4_23 = arith.constant 4 : index
    %c0_24 = arith.constant 0 : index
    %27 = vector.load %arg5[%c4_23, %c0_24] : memref<9x896xf32, #tpu.memory_space<vmem>>, vector<1x896xf32>
    %28 = vector.broadcast %27 : vector<1x896xf32> to vector<2x896xf32>
    %29 = arith.mulf %26, %28 : vector<2x896xf32>
    %c8 = arith.constant 8 : index
    %c0_25 = arith.constant 0 : index
    %30 = vector.load %arg11[%c8, %c0_25] : memref<18x896xf32, #tpu.memory_space<vmem>>, vector<2x896xf32>
    tpu.vector_store %arg11[%c8, %c0_25], %29 {strides = array<i32>} : memref<18x896xf32, #tpu.memory_space<vmem>>, vector<2x896xf32>,
    %c0_26 = arith.constant 0 : index
    %c129 = arith.constant 129 : index
    %31 = vector.load %arg10[%c0_26, %c129] : memref<2x1152xf32, #tpu.memory_space<vmem>>, vector<2x896xf32>
    %c5 = arith.constant 5 : index
    %c0_27 = arith.constant 0 : index
    %32 = vector.load %arg5[%c5, %c0_27] : memref<9x896xf32, #tpu.memory_space<vmem>>, vector<1x896xf32>
    %33 = vector.broadcast %32 : vector<1x896xf32> to vector<2x896xf32>
    %34 = arith.mulf %31, %33 : vector<2x896xf32>
    %c10 = arith.constant 10 : index
    %c0_28 = arith.constant 0 : index
    %35 = vector.load %arg11[%c10, %c0_28] : memref<18x896xf32, #tpu.memory_space<vmem>>, vector<2x896xf32>
    tpu.vector_store %arg11[%c10, %c0_28], %34 {strides = array<i32>} : memref<18x896xf32, #tpu.memory_space<vmem>>, vector<2x896xf32>,
    %c0_29 = arith.constant 0 : index
    %c155 = arith.constant 155 : index
    %36 = vector.load %arg10[%c0_29, %c155] : memref<2x1152xf32, #tpu.memory_space<vmem>>, vector<2x896xf32>
    %c6_30 = arith.constant 6 : index
    %c0_31 = arith.constant 0 : index
    %37 = vector.load %arg5[%c6_30, %c0_31] : memref<9x896xf32, #tpu.memory_space<vmem>>, vector<1x896xf32>
    %38 = vector.broadcast %37 : vector<1x896xf32> to vector<2x896xf32>
    %39 = arith.mulf %36, %38 : vector<2x896xf32>
    %c12 = arith.constant 12 : index
    %c0_32 = arith.constant 0 : index
    %40 = vector.load %arg11[%c12, %c0_32] : memref<18x896xf32, #tpu.memory_space<vmem>>, vector<2x896xf32>
    tpu.vector_store %arg11[%c12, %c0_32], %39 {strides = array<i32>} : memref<18x896xf32, #tpu.memory_space<vmem>>, vector<2x896xf32>,
    %c0_33 = arith.constant 0 : index
    %c156 = arith.constant 156 : index
    %41 = vector.load %arg10[%c0_33, %c156] : memref<2x1152xf32, #tpu.memory_space<vmem>>, vector<2x896xf32>
    %c7 = arith.constant 7 : index
    %c0_34 = arith.constant 0 : index
    %42 = vector.load %arg5[%c7, %c0_34] : memref<9x896xf32, #tpu.memory_space<vmem>>, vector<1x896xf32>
    %43 = vector.broadcast %42 : vector<1x896xf32> to vector<2x896xf32>
    %44 = arith.mulf %41, %43 : vector<2x896xf32>
    %c14 = arith.constant 14 : index
    %c0_35 = arith.constant 0 : index
    %45 = vector.load %arg11[%c14, %c0_35] : memref<18x896xf32, #tpu.memory_space<vmem>>, vector<2x896xf32>
    tpu.vector_store %arg11[%c14, %c0_35], %44 {strides = array<i32>} : memref<18x896xf32, #tpu.memory_space<vmem>>, vector<2x896xf32>,
    %c0_36 = arith.constant 0 : index
    %c157 = arith.constant 157 : index
    %46 = vector.load %arg10[%c0_36, %c157] : memref<2x1152xf32, #tpu.memory_space<vmem>>, vector<2x896xf32>
    %c8_37 = arith.constant 8 : index
    %c0_38 = arith.constant 0 : index
    %47 = vector.load %arg5[%c8_37, %c0_38] : memref<9x896xf32, #tpu.memory_space<vmem>>, vector<1x896xf32>
    %48 = vector.broadcast %47 : vector<1x896xf32> to vector<2x896xf32>
    %49 = arith.mulf %46, %48 : vector<2x896xf32>
    %c16 = arith.constant 16 : index
    %c0_39 = arith.constant 0 : index
    %50 = vector.load %arg11[%c16, %c0_39] : memref<18x896xf32, #tpu.memory_space<vmem>>, vector<2x896xf32>
    tpu.vector_store %arg11[%c16, %c0_39], %49 {strides = array<i32>} : memref<18x896xf32, #tpu.memory_space<vmem>>, vector<2x896xf32>,
    %c0_40 = arith.constant 0 : index
    %c0_41 = arith.constant 0 : index
    %51 = vector.load %arg1[%c0_40, %c0_41] : memref<20x18xf32, #tpu.memory_space<vmem>>, vector<20x18xf32>
    %c0_42 = arith.constant 0 : index
    %c0_43 = arith.constant 0 : index
    %52 = vector.load %arg11[%c0_42, %c0_43] : memref<18x896xf32, #tpu.memory_space<vmem>>, vector<18x896xf32>
    %cst_44 = arith.constant dense<0.000000e+00> : vector<20x896xf32>
    %53 = tpu.matmul %51, %52, %cst_44 {dimension_numbers = #tpu.dot_dimension_numbers<[1], [0], [0], [1], [0, 0, 1, 1], [], []>} : vector<20x18xf32>, vector<18x896xf32>, vector<20x896xf32> -> vector<20x896xf32>
    %cst_45 = arith.constant 1.000000e+00 : f32
    %54 = vector.broadcast %cst_45 : f32 to vector<20x896xf32>
    %55 = arith.cmpf oge, %53, %54 : vector<20x896xf32>
    %56 = arith.extui %55 : vector<20x896xi1> to vector<20x896xi32>
    %57 = arith.sitofp %56 : vector<20x896xi32> to vector<20x896xf32>
    %58 = arith.truncf %57 : vector<20x896xf32> to vector<20x896xbf16>
    %c0_46 = arith.constant 0 : index
    %c0_47 = arith.constant 0 : index
    %59 = vector.load %arg7[%c0_46, %c0_47] : memref<896x256xbf16, #tpu.memory_space<vmem>>, vector<896x256xbf16>
    %cst_48 = arith.constant dense<0.000000e+00> : vector<20x256xf32>
    %60 = tpu.matmul %58, %59, %cst_48 {dimension_numbers = #tpu.dot_dimension_numbers<[1], [0], [0], [1], [0, 0, 1, 1], [], []>} : vector<20x896xbf16>, vector<896x256xbf16>, vector<20x256xf32> -> vector<20x256xf32>
    %cst_49 = arith.constant 5.000000e-01 : f32
    %61 = vector.broadcast %cst_49 : f32 to vector<20x256xf32>
    %62 = arith.cmpf oge, %60, %61 : vector<20x256xf32>
    %63 = arith.extui %62 : vector<20x256xi1> to vector<20x256xi32>
    %64 = arith.sitofp %63 : vector<20x256xi32> to vector<20x256xf32>
    %cst_50 = arith.constant 0.000000e+00 : f32
    %65 = vector.broadcast %cst_50 : f32 to vector<20x128xf32>
    %c0_51 = arith.constant 0 : index
    %c0_52 = arith.constant 0 : index
    %66 = vector.load %arg12[%c0_51, %c0_52] : memref<20x512xf32, #tpu.memory_space<vmem>>, vector<20x128xf32>
    tpu.vector_store %arg12[%c0_51, %c0_52], %65 {strides = array<i32>} : memref<20x512xf32, #tpu.memory_space<vmem>>, vector<20x128xf32>,
    %cst_53 = arith.constant 0.000000e+00 : f32
    %67 = vector.broadcast %cst_53 : f32 to vector<20x128xf32>
    %c0_54 = arith.constant 0 : index
    %c384 = arith.constant 384 : index
    %68 = vector.load %arg12[%c0_54, %c384] : memref<20x512xf32, #tpu.memory_space<vmem>>, vector<20x128xf32>
    tpu.vector_store %arg12[%c0_54, %c384], %67 {strides = array<i32>} : memref<20x512xf32, #tpu.memory_space<vmem>>, vector<20x128xf32>,
    %c0_55 = arith.constant 0 : index
    %c128_56 = arith.constant 128 : index
    %69 = vector.load %arg12[%c0_55, %c128_56] : memref<20x512xf32, #tpu.memory_space<vmem>>, vector<20x256xf32>
    tpu.vector_store %arg12[%c0_55, %c128_56], %64 {strides = array<i32>} : memref<20x512xf32, #tpu.memory_space<vmem>>, vector<20x256xf32>,
    %c0_57 = arith.constant 0 : index
    %c113 = arith.constant 113 : index
    %70 = vector.load %arg12[%c0_57, %c113] : memref<20x512xf32, #tpu.memory_space<vmem>>, vector<20x256xf32>
    %c0_58 = arith.constant 0 : index
    %c0_59 = arith.constant 0 : index
    %71 = vector.load %arg6[%c0_58, %c0_59] : memref<9x256xf32, #tpu.memory_space<vmem>>, vector<1x256xf32>
    %72 = vector.broadcast %71 : vector<1x256xf32> to vector<20x256xf32>
    %73 = arith.mulf %70, %72 : vector<20x256xf32>
    %c0_60 = arith.constant 0 : index
    %c0_61 = arith.constant 0 : index
    %74 = vector.load %arg13[%c0_60, %c0_61] : memref<180x256xf32, #tpu.memory_space<vmem>>, vector<20x256xf32>
    tpu.vector_store %arg13[%c0_60, %c0_61], %73 {strides = array<i32>} : memref<180x256xf32, #tpu.memory_space<vmem>>, vector<20x256xf32>,
    %c0_62 = arith.constant 0 : index
    %c114 = arith.constant 114 : index
    %75 = vector.load %arg12[%c0_62, %c114] : memref<20x512xf32, #tpu.memory_space<vmem>>, vector<20x256xf32>
    %c1_63 = arith.constant 1 : index
    %c0_64 = arith.constant 0 : index
    %76 = vector.load %arg6[%c1_63, %c0_64] : memref<9x256xf32, #tpu.memory_space<vmem>>, vector<1x256xf32>
    %77 = vector.broadcast %76 : vector<1x256xf32> to vector<20x256xf32>
    %78 = arith.mulf %75, %77 : vector<20x256xf32>
    %c20 = arith.constant 20 : index
    %c0_65 = arith.constant 0 : index
    %79 = vector.load %arg13[%c20, %c0_65] : memref<180x256xf32, #tpu.memory_space<vmem>>, vector<20x256xf32>
    tpu.vector_store %arg13[%c20, %c0_65], %78 {strides = array<i32>} : memref<180x256xf32, #tpu.memory_space<vmem>>, vector<20x256xf32>,
    %c0_66 = arith.constant 0 : index
    %c115 = arith.constant 115 : index
    %80 = vector.load %arg12[%c0_66, %c115] : memref<20x512xf32, #tpu.memory_space<vmem>>, vector<20x256xf32>
    %c2_67 = arith.constant 2 : index
    %c0_68 = arith.constant 0 : index
    %81 = vector.load %arg6[%c2_67, %c0_68] : memref<9x256xf32, #tpu.memory_space<vmem>>, vector<1x256xf32>
    %82 = vector.broadcast %81 : vector<1x256xf32> to vector<20x256xf32>
    %83 = arith.mulf %80, %82 : vector<20x256xf32>
    %c40 = arith.constant 40 : index
    %c0_69 = arith.constant 0 : index
    %84 = vector.load %arg13[%c40, %c0_69] : memref<180x256xf32, #tpu.memory_space<vmem>>, vector<20x256xf32>
    tpu.vector_store %arg13[%c40, %c0_69], %83 {strides = array<i32>} : memref<180x256xf32, #tpu.memory_space<vmem>>, vector<20x256xf32>,
    %c0_70 = arith.constant 0 : index
    %c127_71 = arith.constant 127 : index
    %85 = vector.load %arg12[%c0_70, %c127_71] : memref<20x512xf32, #tpu.memory_space<vmem>>, vector<20x256xf32>
    %c3_72 = arith.constant 3 : index
    %c0_73 = arith.constant 0 : index
    %86 = vector.load %arg6[%c3_72, %c0_73] : memref<9x256xf32, #tpu.memory_space<vmem>>, vector<1x256xf32>
    %87 = vector.broadcast %86 : vector<1x256xf32> to vector<20x256xf32>
    %88 = arith.mulf %85, %87 : vector<20x256xf32>
    %c60 = arith.constant 60 : index
    %c0_74 = arith.constant 0 : index
    %89 = vector.load %arg13[%c60, %c0_74] : memref<180x256xf32, #tpu.memory_space<vmem>>, vector<20x256xf32>
    tpu.vector_store %arg13[%c60, %c0_74], %88 {strides = array<i32>} : memref<180x256xf32, #tpu.memory_space<vmem>>, vector<20x256xf32>,
    %c0_75 = arith.constant 0 : index
    %c128_76 = arith.constant 128 : index
    %90 = vector.load %arg12[%c0_75, %c128_76] : memref<20x512xf32, #tpu.memory_space<vmem>>, vector<20x256xf32>
    %c4_77 = arith.constant 4 : index
    %c0_78 = arith.constant 0 : index
    %91 = vector.load %arg6[%c4_77, %c0_78] : memref<9x256xf32, #tpu.memory_space<vmem>>, vector<1x256xf32>
    %92 = vector.broadcast %91 : vector<1x256xf32> to vector<20x256xf32>
    %93 = arith.mulf %90, %92 : vector<20x256xf32>
    %c80 = arith.constant 80 : index
    %c0_79 = arith.constant 0 : index
    %94 = vector.load %arg13[%c80, %c0_79] : memref<180x256xf32, #tpu.memory_space<vmem>>, vector<20x256xf32>
    tpu.vector_store %arg13[%c80, %c0_79], %93 {strides = array<i32>} : memref<180x256xf32, #tpu.memory_space<vmem>>, vector<20x256xf32>,
    %c0_80 = arith.constant 0 : index
    %c129_81 = arith.constant 129 : index
    %95 = vector.load %arg12[%c0_80, %c129_81] : memref<20x512xf32, #tpu.memory_space<vmem>>, vector<20x256xf32>
    %c5_82 = arith.constant 5 : index
    %c0_83 = arith.constant 0 : index
    %96 = vector.load %arg6[%c5_82, %c0_83] : memref<9x256xf32, #tpu.memory_space<vmem>>, vector<1x256xf32>
    %97 = vector.broadcast %96 : vector<1x256xf32> to vector<20x256xf32>
    %98 = arith.mulf %95, %97 : vector<20x256xf32>
    %c100_84 = arith.constant 100 : index
    %c0_85 = arith.constant 0 : index
    %99 = vector.load %arg13[%c100_84, %c0_85] : memref<180x256xf32, #tpu.memory_space<vmem>>, vector<20x256xf32>
    tpu.vector_store %arg13[%c100_84, %c0_85], %98 {strides = array<i32>} : memref<180x256xf32, #tpu.memory_space<vmem>>, vector<20x256xf32>,
    %c0_86 = arith.constant 0 : index
    %c141 = arith.constant 141 : index
    %100 = vector.load %arg12[%c0_86, %c141] : memref<20x512xf32, #tpu.memory_space<vmem>>, vector<20x256xf32>
    %c6_87 = arith.constant 6 : index
    %c0_88 = arith.constant 0 : index
    %101 = vector.load %arg6[%c6_87, %c0_88] : memref<9x256xf32, #tpu.memory_space<vmem>>, vector<1x256xf32>
    %102 = vector.broadcast %101 : vector<1x256xf32> to vector<20x256xf32>
    %103 = arith.mulf %100, %102 : vector<20x256xf32>
    %c120 = arith.constant 120 : index
    %c0_89 = arith.constant 0 : index
    %104 = vector.load %arg13[%c120, %c0_89] : memref<180x256xf32, #tpu.memory_space<vmem>>, vector<20x256xf32>
    tpu.vector_store %arg13[%c120, %c0_89], %103 {strides = array<i32>} : memref<180x256xf32, #tpu.memory_space<vmem>>, vector<20x256xf32>,
    %c0_90 = arith.constant 0 : index
    %c142 = arith.constant 142 : index
    %105 = vector.load %arg12[%c0_90, %c142] : memref<20x512xf32, #tpu.memory_space<vmem>>, vector<20x256xf32>
    %c7_91 = arith.constant 7 : index
    %c0_92 = arith.constant 0 : index
    %106 = vector.load %arg6[%c7_91, %c0_92] : memref<9x256xf32, #tpu.memory_space<vmem>>, vector<1x256xf32>
    %107 = vector.broadcast %106 : vector<1x256xf32> to vector<20x256xf32>
    %108 = arith.mulf %105, %107 : vector<20x256xf32>
    %c140 = arith.constant 140 : index
    %c0_93 = arith.constant 0 : index
    %109 = vector.load %arg13[%c140, %c0_93] : memref<180x256xf32, #tpu.memory_space<vmem>>, vector<20x256xf32>
    tpu.vector_store %arg13[%c140, %c0_93], %108 {strides = array<i32>} : memref<180x256xf32, #tpu.memory_space<vmem>>, vector<20x256xf32>,
    %c0_94 = arith.constant 0 : index
    %c143 = arith.constant 143 : index
    %110 = vector.load %arg12[%c0_94, %c143] : memref<20x512xf32, #tpu.memory_space<vmem>>, vector<20x256xf32>
    %c8_95 = arith.constant 8 : index
    %c0_96 = arith.constant 0 : index
    %111 = vector.load %arg6[%c8_95, %c0_96] : memref<9x256xf32, #tpu.memory_space<vmem>>, vector<1x256xf32>
    %112 = vector.broadcast %111 : vector<1x256xf32> to vector<20x256xf32>
    %113 = arith.mulf %110, %112 : vector<20x256xf32>
    %c160 = arith.constant 160 : index
    %c0_97 = arith.constant 0 : index
    %114 = vector.load %arg13[%c160, %c0_97] : memref<180x256xf32, #tpu.memory_space<vmem>>, vector<20x256xf32>
    tpu.vector_store %arg13[%c160, %c0_97], %113 {strides = array<i32>} : memref<180x256xf32, #tpu.memory_space<vmem>>, vector<20x256xf32>,
    %c0_98 = arith.constant 0 : index
    %c0_99 = arith.constant 0 : index
    %115 = vector.load %arg2[%c0_98, %c0_99] : memref<40x180xf32, #tpu.memory_space<vmem>>, vector<40x180xf32>
    %c0_100 = arith.constant 0 : index
    %c0_101 = arith.constant 0 : index
    %116 = vector.load %arg13[%c0_100, %c0_101] : memref<180x256xf32, #tpu.memory_space<vmem>>, vector<180x256xf32>
    %cst_102 = arith.constant dense<0.000000e+00> : vector<40x256xf32>
    %117 = tpu.matmul %115, %116, %cst_102 {dimension_numbers = #tpu.dot_dimension_numbers<[1], [0], [0], [1], [0, 0, 1, 1], [], []>} : vector<40x180xf32>, vector<180x256xf32>, vector<40x256xf32> -> vector<40x256xf32>
    %cst_103 = arith.constant 1.000000e+00 : f32
    %118 = vector.broadcast %cst_103 : f32 to vector<40x256xf32>
    %119 = arith.cmpf oge, %117, %118 : vector<40x256xf32>
    %120 = arith.extui %119 : vector<40x256xi1> to vector<40x256xi32>
    %121 = arith.sitofp %120 : vector<40x256xi32> to vector<40x256xf32>
    %122 = arith.truncf %121 : vector<40x256xf32> to vector<40x256xbf16>
    %c0_104 = arith.constant 0 : index
    %c0_105 = arith.constant 0 : index
    %123 = vector.load %arg8[%c0_104, %c0_105] : memref<256x128xbf16, #tpu.memory_space<vmem>>, vector<256x128xbf16>
    %cst_106 = arith.constant dense<0.000000e+00> : vector<40x128xf32>
    %124 = tpu.matmul %122, %123, %cst_106 {dimension_numbers = #tpu.dot_dimension_numbers<[1], [0], [0], [1], [0, 0, 1, 1], [], []>} : vector<40x256xbf16>, vector<256x128xbf16>, vector<40x128xf32> -> vector<40x128xf32>
    %cst_107 = arith.constant 5.000000e-01 : f32
    %125 = vector.broadcast %cst_107 : f32 to vector<40x128xf32>
    %126 = arith.cmpf oge, %124, %125 : vector<40x128xf32>
    %127 = arith.extui %126 : vector<40x128xi1> to vector<40x128xi32>
    %128 = arith.sitofp %127 : vector<40x128xi32> to vector<40x128xf32>
    %129 = vector.extract_strided_slice %128 {offsets = [0, 0], sizes = [2, 128], strides = [1, 1]} : vector<40x128xf32> to vector<2x128xf32>
    %130 = vector.extract_strided_slice %128 {offsets = [2, 0], sizes = [2, 128], strides = [1, 1]} : vector<40x128xf32> to vector<2x128xf32>
    %131 = vector.extract_strided_slice %128 {offsets = [4, 0], sizes = [2, 128], strides = [1, 1]} : vector<40x128xf32> to vector<2x128xf32>
    %132 = vector.extract_strided_slice %128 {offsets = [6, 0], sizes = [2, 128], strides = [1, 1]} : vector<40x128xf32> to vector<2x128xf32>
    %133 = vector.extract_strided_slice %128 {offsets = [8, 0], sizes = [2, 128], strides = [1, 1]} : vector<40x128xf32> to vector<2x128xf32>
    %134 = vector.extract_strided_slice %128 {offsets = [10, 0], sizes = [2, 128], strides = [1, 1]} : vector<40x128xf32> to vector<2x128xf32>
    %135 = vector.extract_strided_slice %128 {offsets = [12, 0], sizes = [2, 128], strides = [1, 1]} : vector<40x128xf32> to vector<2x128xf32>
    %136 = vector.extract_strided_slice %128 {offsets = [14, 0], sizes = [2, 128], strides = [1, 1]} : vector<40x128xf32> to vector<2x128xf32>
    %137 = vector.extract_strided_slice %128 {offsets = [16, 0], sizes = [2, 128], strides = [1, 1]} : vector<40x128xf32> to vector<2x128xf32>
    %138 = vector.extract_strided_slice %128 {offsets = [18, 0], sizes = [2, 128], strides = [1, 1]} : vector<40x128xf32> to vector<2x128xf32>
    %139 = vector.extract_strided_slice %128 {offsets = [20, 0], sizes = [2, 128], strides = [1, 1]} : vector<40x128xf32> to vector<2x128xf32>
    %140 = vector.extract_strided_slice %128 {offsets = [22, 0], sizes = [2, 128], strides = [1, 1]} : vector<40x128xf32> to vector<2x128xf32>
    %141 = vector.extract_strided_slice %128 {offsets = [24, 0], sizes = [2, 128], strides = [1, 1]} : vector<40x128xf32> to vector<2x128xf32>
    %142 = vector.extract_strided_slice %128 {offsets = [26, 0], sizes = [2, 128], strides = [1, 1]} : vector<40x128xf32> to vector<2x128xf32>
    %143 = vector.extract_strided_slice %128 {offsets = [28, 0], sizes = [2, 128], strides = [1, 1]} : vector<40x128xf32> to vector<2x128xf32>
    %144 = vector.extract_strided_slice %128 {offsets = [30, 0], sizes = [2, 128], strides = [1, 1]} : vector<40x128xf32> to vector<2x128xf32>
    %145 = vector.extract_strided_slice %128 {offsets = [32, 0], sizes = [2, 128], strides = [1, 1]} : vector<40x128xf32> to vector<2x128xf32>
    %146 = vector.extract_strided_slice %128 {offsets = [34, 0], sizes = [2, 128], strides = [1, 1]} : vector<40x128xf32> to vector<2x128xf32>
    %147 = vector.extract_strided_slice %128 {offsets = [36, 0], sizes = [2, 128], strides = [1, 1]} : vector<40x128xf32> to vector<2x128xf32>
    %148 = vector.extract_strided_slice %128 {offsets = [38, 0], sizes = [2, 128], strides = [1, 1]} : vector<40x128xf32> to vector<2x128xf32>
    %149 = tpu.concatenate %129, %130, %131, %132, %133, %134, %135, %136, %137, %138, %139, %140, %141, %142, %143, %144 in 1 : vector<2x128xf32>, vector<2x128xf32>, vector<2x128xf32>, vector<2x128xf32>, vector<2x128xf32>, vector<2x128xf32>, vector<2x128xf32>, vector<2x128xf32>, vector<2x128xf32>, vector<2x128xf32>, vector<2x128xf32>, vector<2x128xf32>, vector<2x128xf32>, vector<2x128xf32>, vector<2x128xf32>, vector<2x128xf32> -> vector<2x2048xf32>
    %150 = tpu.concatenate %145, %146, %147, %148 in 1 : vector<2x128xf32>, vector<2x128xf32>, vector<2x128xf32>, vector<2x128xf32> -> vector<2x512xf32>
    %151 = tpu.concatenate %149, %150 in 1 : vector<2x2048xf32>, vector<2x512xf32> -> vector<2x2560xf32>
    %c0_108 = arith.constant 0 : index
    %c0_109 = arith.constant 0 : index
    %152 = vector.load %arg3[%c0_108, %c0_109] : memref<2560x100xf32, #tpu.memory_space<vmem>>, vector<2560x100xf32>
    %cst_110 = arith.constant dense<0.000000e+00> : vector<2x100xf32>
    %153 = tpu.matmul %151, %152, %cst_110 {dimension_numbers = #tpu.dot_dimension_numbers<[1], [0], [0], [1], [0, 0, 1, 1], [], []>} : vector<2x2560xf32>, vector<2560x100xf32>, vector<2x100xf32> -> vector<2x100xf32>
    %cst_111 = arith.constant 0.000000e+00 : f32
    %154 = vector.broadcast %cst_111 : f32 to vector<2x100xf32>
    %cst_112 = arith.constant 0.000000e+00 : f32
    %155 = vector.broadcast %cst_112 : f32 to vector<2x100xf32>
    %156 = arith.subf %154, %155 : vector<2x100xf32>
    %157 = arith.subf %153, %156 : vector<2x100xf32>
    %cst_113 = arith.constant 5.000000e-01 : f32
    %158 = vector.broadcast %cst_113 : f32 to vector<2x100xf32>
    %159 = arith.mulf %157, %158 : vector<2x100xf32>
    %160 = arith.addf %154, %159 : vector<2x100xf32>
    %cst_114 = arith.constant 1.000000e+00 : f32
    %161 = vector.broadcast %cst_114 : f32 to vector<2x100xf32>
    %162 = arith.cmpf oge, %160, %161 : vector<2x100xf32>
    %163 = arith.extui %162 : vector<2x100xi1> to vector<2x100xi32>
    %164 = arith.sitofp %163 : vector<2x100xi32> to vector<2x100xf32>
    %cst_115 = arith.constant 0.000000e+00 : f32
    %165 = vector.broadcast %cst_115 : f32 to vector<2x100xf32>
    %166 = arith.cmpf ogt, %164, %165 : vector<2x100xf32>
    %cst_116 = arith.constant 0.000000e+00 : f32
    %167 = vector.broadcast %cst_116 : f32 to vector<2x100xf32>
    %168 = arith.select %166, %167, %160 : vector<2x100xi1>, vector<2x100xf32>
    %cst_117 = arith.constant 0.000000e+00 : f32
    %169 = vector.broadcast %cst_117 : f32 to vector<2x100xf32>
    %170 = arith.subf %168, %169 : vector<2x100xf32>
    %171 = arith.subf %153, %170 : vector<2x100xf32>
    %cst_118 = arith.constant 5.000000e-01 : f32
    %172 = vector.broadcast %cst_118 : f32 to vector<2x100xf32>
    %173 = arith.mulf %171, %172 : vector<2x100xf32>
    %174 = arith.addf %168, %173 : vector<2x100xf32>
    %cst_119 = arith.constant 1.000000e+00 : f32
    %175 = vector.broadcast %cst_119 : f32 to vector<2x100xf32>
    %176 = arith.cmpf oge, %174, %175 : vector<2x100xf32>
    %177 = arith.extui %176 : vector<2x100xi1> to vector<2x100xi32>
    %178 = arith.sitofp %177 : vector<2x100xi32> to vector<2x100xf32>
    %cst_120 = arith.constant 0.000000e+00 : f32
    %179 = vector.broadcast %cst_120 : f32 to vector<2x100xf32>
    %180 = arith.cmpf ogt, %178, %179 : vector<2x100xf32>
    %cst_121 = arith.constant 0.000000e+00 : f32
    %181 = vector.broadcast %cst_121 : f32 to vector<2x100xf32>
    %182 = arith.select %180, %181, %174 : vector<2x100xi1>, vector<2x100xf32>
    %cst_122 = arith.constant 0.000000e+00 : f32
    %183 = vector.broadcast %cst_122 : f32 to vector<2x100xf32>
    %184 = arith.subf %182, %183 : vector<2x100xf32>
    %185 = arith.subf %153, %184 : vector<2x100xf32>
    %cst_123 = arith.constant 5.000000e-01 : f32
    %186 = vector.broadcast %cst_123 : f32 to vector<2x100xf32>
    %187 = arith.mulf %185, %186 : vector<2x100xf32>
    %188 = arith.addf %182, %187 : vector<2x100xf32>
    %cst_124 = arith.constant 1.000000e+00 : f32
    %189 = vector.broadcast %cst_124 : f32 to vector<2x100xf32>
    %190 = arith.cmpf oge, %188, %189 : vector<2x100xf32>
    %191 = arith.extui %190 : vector<2x100xi1> to vector<2x100xi32>
    %192 = arith.sitofp %191 : vector<2x100xi32> to vector<2x100xf32>
    %cst_125 = arith.constant 0.000000e+00 : f32
    %193 = vector.broadcast %cst_125 : f32 to vector<2x100xf32>
    %194 = arith.cmpf ogt, %192, %193 : vector<2x100xf32>
    %cst_126 = arith.constant 0.000000e+00 : f32
    %195 = vector.broadcast %cst_126 : f32 to vector<2x100xf32>
    %196 = arith.select %194, %195, %188 : vector<2x100xi1>, vector<2x100xf32>
    %cst_127 = arith.constant 0.000000e+00 : f32
    %197 = vector.broadcast %cst_127 : f32 to vector<2x100xf32>
    %198 = arith.subf %196, %197 : vector<2x100xf32>
    %199 = arith.subf %153, %198 : vector<2x100xf32>
    %cst_128 = arith.constant 5.000000e-01 : f32
    %200 = vector.broadcast %cst_128 : f32 to vector<2x100xf32>
    %201 = arith.mulf %199, %200 : vector<2x100xf32>
    %202 = arith.addf %196, %201 : vector<2x100xf32>
    %cst_129 = arith.constant 1.000000e+00 : f32
    %203 = vector.broadcast %cst_129 : f32 to vector<2x100xf32>
    %204 = arith.cmpf oge, %202, %203 : vector<2x100xf32>
    %205 = arith.extui %204 : vector<2x100xi1> to vector<2x100xi32>
    %206 = arith.sitofp %205 : vector<2x100xi32> to vector<2x100xf32>
    %207 = tpu.concatenate %164, %178, %192, %206 in 0 : vector<2x100xf32>, vector<2x100xf32>, vector<2x100xf32>, vector<2x100xf32> -> vector<8x100xf32>
    %c0_130 = arith.constant 0 : index
    %c0_131 = arith.constant 0 : index
    %208 = vector.load %arg4[%c0_130, %c0_131] : memref<100x10xf32, #tpu.memory_space<vmem>>, vector<100x10xf32>
    %cst_132 = arith.constant dense<0.000000e+00> : vector<8x10xf32>
    %209 = tpu.matmul %207, %208, %cst_132 {dimension_numbers = #tpu.dot_dimension_numbers<[1], [0], [0], [1], [0, 0, 1, 1], [], []>} : vector<8x100xf32>, vector<100x10xf32>, vector<8x10xf32> -> vector<8x10xf32>
    %cst_133 = arith.constant 0.000000e+00 : f32
    %210 = vector.broadcast %cst_133 : f32 to vector<2x10xf32>
    %cst_134 = arith.constant 0.000000e+00 : f32
    %211 = vector.broadcast %cst_134 : f32 to vector<2x10xf32>
    %212 = vector.extract_strided_slice %209 {offsets = [0, 0], sizes = [2, 10], strides = [1, 1]} : vector<8x10xf32> to vector<2x10xf32>
    %cst_135 = arith.constant 0.000000e+00 : f32
    %213 = vector.broadcast %cst_135 : f32 to vector<2x10xf32>
    %214 = arith.subf %210, %213 : vector<2x10xf32>
    %215 = arith.subf %212, %214 : vector<2x10xf32>
    %cst_136 = arith.constant 5.000000e-01 : f32
    %216 = vector.broadcast %cst_136 : f32 to vector<2x10xf32>
    %217 = arith.mulf %215, %216 : vector<2x10xf32>
    %218 = arith.addf %210, %217 : vector<2x10xf32>
    %cst_137 = arith.constant 1.000000e+00 : f32
    %219 = vector.broadcast %cst_137 : f32 to vector<2x10xf32>
    %220 = arith.cmpf oge, %218, %219 : vector<2x10xf32>
    %221 = arith.extui %220 : vector<2x10xi1> to vector<2x10xi32>
    %222 = arith.sitofp %221 : vector<2x10xi32> to vector<2x10xf32>
    %cst_138 = arith.constant 0.000000e+00 : f32
    %223 = vector.broadcast %cst_138 : f32 to vector<2x10xf32>
    %224 = arith.cmpf ogt, %222, %223 : vector<2x10xf32>
    %cst_139 = arith.constant 0.000000e+00 : f32
    %225 = vector.broadcast %cst_139 : f32 to vector<2x10xf32>
    %226 = arith.select %224, %225, %218 : vector<2x10xi1>, vector<2x10xf32>
    %227 = arith.addf %211, %222 : vector<2x10xf32>
    %228 = vector.extract_strided_slice %209 {offsets = [2, 0], sizes = [2, 10], strides = [1, 1]} : vector<8x10xf32> to vector<2x10xf32>
    %cst_140 = arith.constant 0.000000e+00 : f32
    %229 = vector.broadcast %cst_140 : f32 to vector<2x10xf32>
    %230 = arith.subf %226, %229 : vector<2x10xf32>
    %231 = arith.subf %228, %230 : vector<2x10xf32>
    %cst_141 = arith.constant 5.000000e-01 : f32
    %232 = vector.broadcast %cst_141 : f32 to vector<2x10xf32>
    %233 = arith.mulf %231, %232 : vector<2x10xf32>
    %234 = arith.addf %226, %233 : vector<2x10xf32>
    %cst_142 = arith.constant 1.000000e+00 : f32
    %235 = vector.broadcast %cst_142 : f32 to vector<2x10xf32>
    %236 = arith.cmpf oge, %234, %235 : vector<2x10xf32>
    %237 = arith.extui %236 : vector<2x10xi1> to vector<2x10xi32>
    %238 = arith.sitofp %237 : vector<2x10xi32> to vector<2x10xf32>
    %cst_143 = arith.constant 0.000000e+00 : f32
    %239 = vector.broadcast %cst_143 : f32 to vector<2x10xf32>
    %240 = arith.cmpf ogt, %238, %239 : vector<2x10xf32>
    %cst_144 = arith.constant 0.000000e+00 : f32
    %241 = vector.broadcast %cst_144 : f32 to vector<2x10xf32>
    %242 = arith.select %240, %241, %234 : vector<2x10xi1>, vector<2x10xf32>
    %243 = arith.addf %227, %238 : vector<2x10xf32>
    %244 = vector.extract_strided_slice %209 {offsets = [4, 0], sizes = [2, 10], strides = [1, 1]} : vector<8x10xf32> to vector<2x10xf32>
    %cst_145 = arith.constant 0.000000e+00 : f32
    %245 = vector.broadcast %cst_145 : f32 to vector<2x10xf32>
    %246 = arith.subf %242, %245 : vector<2x10xf32>
    %247 = arith.subf %244, %246 : vector<2x10xf32>
    %cst_146 = arith.constant 5.000000e-01 : f32
    %248 = vector.broadcast %cst_146 : f32 to vector<2x10xf32>
    %249 = arith.mulf %247, %248 : vector<2x10xf32>
    %250 = arith.addf %242, %249 : vector<2x10xf32>
    %cst_147 = arith.constant 1.000000e+00 : f32
    %251 = vector.broadcast %cst_147 : f32 to vector<2x10xf32>
    %252 = arith.cmpf oge, %250, %251 : vector<2x10xf32>
    %253 = arith.extui %252 : vector<2x10xi1> to vector<2x10xi32>
    %254 = arith.sitofp %253 : vector<2x10xi32> to vector<2x10xf32>
    %cst_148 = arith.constant 0.000000e+00 : f32
    %255 = vector.broadcast %cst_148 : f32 to vector<2x10xf32>
    %256 = arith.cmpf ogt, %254, %255 : vector<2x10xf32>
    %cst_149 = arith.constant 0.000000e+00 : f32
    %257 = vector.broadcast %cst_149 : f32 to vector<2x10xf32>
    %258 = arith.select %256, %257, %250 : vector<2x10xi1>, vector<2x10xf32>
    %259 = arith.addf %243, %254 : vector<2x10xf32>
    %260 = vector.extract_strided_slice %209 {offsets = [6, 0], sizes = [2, 10], strides = [1, 1]} : vector<8x10xf32> to vector<2x10xf32>
    %cst_150 = arith.constant 0.000000e+00 : f32
    %261 = vector.broadcast %cst_150 : f32 to vector<2x10xf32>
    %262 = arith.subf %258, %261 : vector<2x10xf32>
    %263 = arith.subf %260, %262 : vector<2x10xf32>
    %cst_151 = arith.constant 5.000000e-01 : f32
    %264 = vector.broadcast %cst_151 : f32 to vector<2x10xf32>
    %265 = arith.mulf %263, %264 : vector<2x10xf32>
    %266 = arith.addf %258, %265 : vector<2x10xf32>
    %cst_152 = arith.constant 1.000000e+00 : f32
    %267 = vector.broadcast %cst_152 : f32 to vector<2x10xf32>
    %268 = arith.cmpf oge, %266, %267 : vector<2x10xf32>
    %269 = arith.extui %268 : vector<2x10xi1> to vector<2x10xi32>
    %270 = arith.sitofp %269 : vector<2x10xi32> to vector<2x10xf32>
    %271 = arith.addf %259, %270 : vector<2x10xf32>
    %cst_153 = arith.constant dense<0xFF800000> : vector<2xf32>
    %272 = vector.multi_reduction <maximumf>, %271, %cst_153 [1] : vector<2x10xf32> to vector<2xf32>
    %273 = vector.shape_cast %272 : vector<2xf32> to vector<2x1xf32>
    %274 = vector.broadcast %273 : vector<2x1xf32> to vector<2x10xf32>
    %275 = arith.subf %271, %274 : vector<2x10xf32>
    %cst_154 = arith.constant 2.500000e-01 : f32
    %276 = vector.broadcast %cst_154 : f32 to vector<2x10xf32>
    %277 = arith.mulf %275, %276 : vector<2x10xf32>
    %278 = math.exp %277 : vector<2x10xf32>
    %cst_155 = arith.constant dense<0.000000e+00> : vector<2xf32>
    %279 = vector.multi_reduction <add>, %278, %cst_155 [1] : vector<2x10xf32> to vector<2xf32>
    %280 = vector.shape_cast %279 : vector<2xf32> to vector<2x1xf32>
    %281 = tpu.reciprocal %280 {approx = true} : vector<2x1xf32> -> vector<2x1xf32>
    %282 = vector.broadcast %281 : vector<2x1xf32> to vector<2x10xf32>
    %283 = arith.mulf %278, %282 : vector<2x10xf32>
    %c0_156 = arith.constant 0 : index
    %c0_157 = arith.constant 0 : index
    %284 = vector.load %arg9[%c0_156, %c0_157] : memref<2x10xf32, #tpu.memory_space<vmem>>, vector<2x10xf32>
    tpu.vector_store %arg9[%c0_156, %c0_157], %283 {strides = array<i32>} : memref<2x10xf32, #tpu.memory_space<vmem>>, vector<2x10xf32>,
    return
  }
}

</mosaic_0001>

<bundles_post_ra>
// kernel: _lambda_.1
= control target key start
LH: loop header
LB: loop body
LE: loop exit
PB: predicated region body
PF: predicated region fallthrough
CT: control target
= control target key end

     0   :  { %v46_v0 = vlaneseq  ;;  %v6584_v2 = vmov 1983009808   ;;  %s6585_s22 = smov 1   ;;  %s6586_s23 = smov 100   ;;  %s9590_s0 = inlined_call_operand.vmem [shape: f32[2,896], index: 0, kind: input, shape index: {}]   ;;  %s9591_s1 = inlined_call_operand.vmem [shape: f32[20,18], index: 1, kind: input, shape index: {}]   ;;  %s9592_s2 = inlined_call_operand.vmem [shape: f32[40,180], index: 2, kind: input, shape index: {}]   ;;  %s9593_s3 = inlined_call_operand.vmem [shape: f32[2560,100], index: 3, kind: input, shape index: {}]   ;;  %s9594_s4 = inlined_call_operand.vmem [shape: f32[100,10], index: 4, kind: input, shape index: {}]   ;;  %s9595_s5 = inlined_call_operand.vmem [shape: f32[9,896], index: 5, kind: input, shape index: {}]   ;;  %s9596_s6 = inlined_call_operand.vmem [shape: f32[9,256], index: 6, kind: input, shape index: {}]   ;;  %s9597_s7 = inlined_call_operand.vmem [shape: bf16[896,256], index: 7, kind: input, shape index: {}]   ;;  %s9598_s8 = inlined_call_operand.vmem [shape: bf16[256,128], index: 8, kind: input, shape index: {}]   ;;  %s9599_s9 = inlined_call_operand.hbm [shape: f32[2,10], index: 9, kind: output, shape index: {}]  }
   0x1   :  { %v5206_v1 = vld [vmem:[%s9595_s5 + $0x5] ss:$8 sm:$0xf]  ;;  %v77_v3 = vunpack.c.l.s4 %v6584_v2  ;;  %v5194_v5 = vld [vmem:[%s9595_s5 + $0x1] ss:$8 sm:$0xf] }
   0x2   :  { %v5207_v4 = vld [vmem:[%s9595_s5 + $0x5] ss:$8 sm:$0xf0]  ;;  %v6665_v6 = vshrl.u32 %v46_v0, 7  ;;  %s6587_s26 = smov 27   ;;  %s6589_s27 = smov 28  }
   0x3   :  { %v6667_v7 = vor.u32 %v5207_v4, %v5206_v1  ;;  %v5195_v8 = vld [vmem:[%s9595_s5 + $0x1] ss:$8 sm:$0xf0]  ;;  %v78_v9 = vunpack.c.0.s8 %v77_v3  ;;  %v5208_v11 = vld [vmem:[%s9595_s5 + $0x6] ss:$8 sm:$0xf] }
   0x4   :  { %v6672_v10 = vor.u32 %v5195_v8, %v5194_v5  ;;  %v5209_v12 = vld [vmem:[%s9595_s5 + $0x6] ss:$8 sm:$0xf0]  ;;  %v6681_v13 = vsub.s32 0, %v6665_v6  ;;  %v6684_v14 = vsub.s32 1, %v6665_v6  ;;  %v6687_v15 = vsub.s32 2, %v6665_v6 }
   0x5   :  { %v6690_v16 = vsub.s32 3, %v6665_v6  ;;  %v6693_v17 = vsub.s32 %v78_v9, %v6665_v6  ;;  %v6695_v18 = vor.u32 %v5209_v12, %v5208_v11  ;;  %v5196_v23 = vld [vmem:[%s9595_s5 + $0x2] ss:$8 sm:$0xf]  ;;  %s6590_s28 = smov 127   ;;  %s6591_s29 = smov 29  }
   0x6   :  { %v795_v19 = vrot.slane %v6667_v7, %v6681_v13  ;;  %v799_v20 = vrot.slane %v6667_v7, %v6684_v14  ;;  %v803_v21 = vrot.slane %v6667_v7, %v6687_v15  ;;  %v206_v24 = vrot.slane %v6672_v10, %v6681_v13  ;;  %v5197_v28 = vld [vmem:[%s9595_s5 + $0x2] ss:$8 sm:$0xf0]  ;;  %v5210_v29 = vld [vmem:[%s9595_s5 + $0x7] ss:$8 sm:$0xf] }
   0x7   :  { %v807_v22 = vrot.slane %v6667_v7, %v6690_v16  ;;  %v210_v25 = vrot.slane %v6672_v10, %v6684_v14  ;;  %v214_v26 = vrot.slane %v6672_v10, %v6687_v15  ;;  %v218_v27 = vrot.slane %v6672_v10, %v6690_v16  ;;  %v5211_v34 = vld [vmem:[%s9595_s5 + $0x7] ss:$8 sm:$0xf0]  ;;  %v5198_v44 = vld [vmem:[%s9595_s5 + $0x3] ss:$8 sm:$0xf] }
   0x8   :  { %v820_v30 = vcombine.low %v795_v19, %v799_v20  ;;  %v949_v32 = vrot.slane %v6695_v18, %v6681_v13  ;;  %v953_v33 = vrot.slane %v6695_v18, %v6684_v14  ;;  %v6732_v35 = vld [vmem:[%s9590_s0] sm:$0xff]  ;;  %v957_v38 = vrot.slane %v6695_v18, %v6687_v15  ;;  %v37_v19 = vld [vmem:[%s9590_s0 + $0x8] sm:$0x3f]  ;;  %s6588_s0 = smov 101   ;;  %s6592_s30 = smov 99  }
   0x9   :  { %v821_v31 = vcombine.low %v803_v21, %v807_v22  ;;  %v231_v36 = vcombine.low %v206_v24, %v210_v25  ;;  %v232_v37 = vcombine.low %v214_v26, %v218_v27  ;;  %v961_v39 = vrot.slane %v6695_v18, %v6690_v16  ;;  %38 = vst [vmem:[#allocation2 + $0x2] sm:$0xff] %v6732_v35  ;;  %v5199_v45 = vld [vmem:[%s9595_s5 + $0x3] ss:$8 sm:$0xf0] }
   0xa   :  { %v828_v40 = vrot.slane %v820_v30, %v6693_v17  ;;  %v974_v42 = vcombine.low %v949_v32, %v953_v33  ;;  %v6741_v43 = vor.u32 %v5197_v28, %v5196_v23  ;;  %v6751_v49 = vor.u32 %v5211_v34, %v5210_v29  ;;  %v5212_v50 = vld [vmem:[%s9595_s5 + $0x38] ss:$8 sm:$0xf]  ;;  %39 = vst [vmem:[#allocation2 + $0xa] sm:$0x3f] %v37_v19 }
   0xb   :  { %v835_v41 = vrot.slane %v821_v31, %v6693_v17  ;;  %v239_v46 = vrot.slane %v231_v36, %v6693_v17  ;;  %v246_v47 = vrot.slane %v232_v37, %v6693_v17  ;;  %v975_v48 = vcombine.low %v957_v38, %v961_v39  ;;  %v5213_v51 = vld [vmem:[%s9595_s5 + $0x38] ss:$8 sm:$0xf0] }
   0xc   :  { %v42_v52 = vld [vmem:[%s9595_s5] ss:$8 sm:$0xf]  ;;  %v982_v55 = vrot.slane %v974_v42, %v6693_v17  ;;  %v362_v56 = vrot.slane %v6741_v43, %v6681_v13  ;;  %v366_v57 = vrot.slane %v6741_v43, %v6684_v14  ;;  %v370_v60 = vrot.slane %v6741_v43, %v6687_v15 }
   0xd   :  { %v43_v53 = vld [vmem:[%s9595_s5] ss:$8 sm:$0xf0]  ;;  %v836_v54 = vcombine.low %v828_v40, %v835_v41  ;;  %v247_v58 = vcombine.low %v239_v46, %v246_v47  ;;  %v989_v59 = vrot.slane %v975_v48, %v6693_v17  ;;  %v374_v61 = vrot.slane %v6741_v43, %v6690_v16 }
   0xe   :  { %v387_v62 = vcombine.low %v362_v56, %v366_v57  ;;  %v1103_v63 = vrot.slane %v6751_v49, %v6681_v13  ;;  %v1107_v0 = vrot.slane %v6751_v49, %v6684_v14  ;;  %v1111_v1 = vrot.slane %v6751_v49, %v6687_v15 }
   0xf   :  { %853 = vrot.lane.b32.xlu1 %v836_v54, %s6585_s22  ;;  %264 = vrot.lane.b32.xlu0 %v247_v58, %s6586_s23  ;;  %v990_v2 = vcombine.low %v982_v55, %v989_v59  ;;  %v388_v3 = vcombine.low %v370_v60, %v374_v61  ;;  %v1115_v4 = vrot.slane %v6751_v49, %v6690_v16  ;;  %v6829_v48 = vsub.s32 4, %v6665_v6 }
  0x10   :  { %v6785_v5 = vor.u32 %v5199_v45, %v5198_v44  ;;  %v395_v8 = vrot.slane %v387_v62, %v6693_v17  ;;  %v1128_v9 = vcombine.low %v1103_v63, %v1107_v0  ;;  %v6788_v11 = vor.u32 %v5213_v51, %v5212_v50 }
  0x11   :  { %v6790_v12 = vor.u32 %v43_v53, %v42_v52  ;;  %v402_v20 = vrot.slane %v388_v3, %v6693_v17  ;;  %v1129_v21 = vcombine.low %v1111_v1, %v1115_v4  ;;  %v6832_v50 = vsub.s32 5, %v6665_v6 }
  0x12   :  { %v518_v22 = vrot.slane %v6785_v5, %v6681_v13  ;;  %v522_v23 = vrot.slane %v6785_v5, %v6684_v14  ;;  %v1136_v24 = vrot.slane %v1128_v9, %v6693_v17  ;;  %v526_v25 = vrot.slane %v6785_v5, %v6687_v15 }
  0x13   :  { %1007 = vrot.lane.b32.xlu1 %v990_v2, %s6587_s26  ;;  %v530_v26 = vrot.slane %v6785_v5, %v6690_v16  ;;  %v1257_v27 = vrot.slane %v6788_v11, %v6681_v13  ;;  %v403_v28 = vcombine.low %v395_v8, %v402_v20  ;;  %v1143_v29 = vrot.slane %v1129_v21, %v6693_v17 }
  0x14   :  { %v543_v30 = vcombine.low %v518_v22, %v522_v23  ;;  %v1261_v31 = vrot.slane %v6788_v11, %v6684_v14  ;;  %v1265_v33 = vrot.slane %v6788_v11, %v6687_v15  ;;  %v1269_v34 = vrot.slane %v6788_v11, %v6690_v16 }
  0x15   :  { %v544_v32 = vcombine.low %v526_v25, %v530_v26  ;;  %v49_v36 = vrot.slane %v6790_v12, %v6681_v13  ;;  %420 = vrot.lane.b32.xlu0 %v403_v28, %s6588_s0  ;;  %v1144_v37 = vcombine.low %v1136_v24, %v1143_v29  ;;  %v53_v40 = vrot.slane %v6790_v12, %v6684_v14 }
  0x16   :  { %v551_v38 = vrot.slane %v543_v30, %v6693_v17  ;;  %v1282_v39 = vcombine.low %v1257_v27, %v1261_v31  ;;  %v1283_v42 = vcombine.low %v1265_v33, %v1269_v34  ;;  %v57_v44 = vrot.slane %v6790_v12, %v6687_v15 }
  0x17   :  { %v558_v41 = vrot.slane %v544_v32, %v6693_v17  ;;  %v61_v45 = vrot.slane %v6790_v12, %v6690_v16  ;;  %1161 = vrot.lane.b32.xlu1 %v1144_v37, %s6589_s27  ;;  %v74_v47 = vcombine.low %v49_v36, %v53_v40  ;;  %v6836_v54 = vsub.s32 6, %v6665_v6 }
  0x18   :  { %v1290_v46 = vrot.slane %v1282_v39, %v6693_v17  ;;  %v1297_v52 = vrot.slane %v1283_v42, %v6693_v17  ;;  %v1119_v56 = vrot.slane %v6751_v49, %v6829_v48  ;;  %v1123_v57 = vrot.slane %v6751_v49, %v6832_v50 }
  0x19   :  { %v559_v51 = vcombine.low %v551_v38, %v558_v41  ;;  %v75_v53 = vcombine.low %v57_v44, %v61_v45  ;;  %v82_v55 = vrot.slane %v74_v47, %v6693_v17  ;;  %v534_v58 = vrot.slane %v6785_v5, %v6829_v48 }
  0x1a   :  { %v1298_v59 = vcombine.low %v1290_v46, %v1297_v52  ;;  %v1127_v6 = vrot.slane %v6751_v49, %v6836_v54  ;;  %v538_v61 = vrot.slane %v6785_v5, %v6832_v50  ;;  %v1145_v62 = vcombine.low %v1119_v56, %v1123_v57 }
  0x1b   :  { %576 = vrot.lane.b32.xlu0 %v559_v51, %s6590_s28  ;;  %v89_v60 = vrot.slane %v75_v53, %v6693_v17  ;;  %v542_v63 = vrot.slane %v6785_v5, %v6836_v54  ;;  %v378_v0 = vrot.slane %v6741_v43, %v6829_v48  ;;  %v382_v1 = vrot.slane %v6741_v43, %v6832_v50 }
  0x1c   :  { %1315 = vrot.lane.b32.xlu1 %v1298_v59, %s6591_s29  ;;  %v1159_v3 = vrot.slane %v1127_v6, %v6693_v17  ;;  %v560_v49 = vcombine.low %v534_v58, %v538_v61  ;;  %v386_v4 = vrot.slane %v6741_v43, %v6836_v54  ;;  %v1152_v8 = vrot.slane %v1145_v62, %v6693_v17 }
  0x1d   :  { %v90_v2 = vcombine.low %v82_v55, %v89_v60  ;;  %v574_v5 = vrot.slane %v542_v63, %v6693_v17  ;;  %v404_v9 = vcombine.low %v378_v0, %v382_v1  ;;  %v222_v19 = vrot.slane %v6672_v10, %v6829_v48 }
  0x1e   :  { %v567_v20 = vrot.slane %v560_v49, %v6693_v17  ;;  %v418_v21 = vrot.slane %v386_v4, %v6693_v17  ;;  %v226_v22 = vrot.slane %v6672_v10, %v6832_v50  ;;  %v230_v43 = vrot.slane %v6672_v10, %v6836_v54 }
  0x1f   :  { %107 = vrot.lane.b32.xlu0 %v90_v2, %s6592_s30  ;;  %v1160_v23 = vcombine.low %v1152_v8, %v1159_v3  ;;  %v411_v24 = vrot.slane %v404_v9, %v6693_v17  ;;  %v965_v25 = vrot.slane %v6695_v18, %v6829_v48  ;;  %v969_v26 = vrot.slane %v6695_v18, %v6832_v50 }
  0x20   :  { %v575_v27 = vcombine.low %v567_v20, %v574_v5  ;;  %v248_v28 = vcombine.low %v222_v19, %v226_v22  ;;  %v262_v29 = vrot.slane %v230_v43, %v6693_v17  ;;  %v973_v30 = vrot.slane %v6695_v18, %v6836_v54 }
  0x21   :  { %1163 = vrot.lane.b32.xlu1 %v1160_v23, %s6589_s27  ;;  %v419_v31 = vcombine.low %v411_v24, %v418_v21  ;;  %v991_v10 = vcombine.low %v965_v25, %v969_v26  ;;  %v811_v32 = vrot.slane %v6667_v7, %v6829_v48  ;;  %v815_v33 = vrot.slane %v6667_v7, %v6832_v50 }
  0x22   :  { %v255_v34 = vrot.slane %v248_v28, %v6693_v17  ;;  %v1005_v36 = vrot.slane %v973_v30, %v6693_v17  ;;  %v819_v37 = vrot.slane %v6667_v7, %v6836_v54  ;;  %v65_v18 = vrot.slane %v6790_v12, %v6829_v48 }
  0x23   :  { %578 = vrot.lane.b32.xlu0 %v575_v27, %s6590_s28  ;;  %v998_v38 = vrot.slane %v991_v10, %v6693_v17  ;;  %v837_v39 = vcombine.low %v811_v32, %v815_v33  ;;  %v69_v40 = vrot.slane %v6790_v12, %v6832_v50  ;;  %v73_v41 = vrot.slane %v6790_v12, %v6836_v54 }
  0x24   :  { %v263_v42 = vcombine.low %v255_v34, %v262_v29  ;;  %v851_v44 = vrot.slane %v819_v37, %v6693_v17  ;;  %v6593_v53 = vmov 0.0  }
  0x25   :  { %422 = vrot.lane.b32.xlu1 %v419_v31, %s6588_s0  ;;  %v1006_v45 = vcombine.low %v998_v38, %v1005_v36  ;;  %v844_v7 = vrot.slane %v837_v39, %v6693_v17  ;;  %v91_v46 = vcombine.low %v65_v18, %v69_v40  ;;  %v105_v47 = vrot.slane %v73_v41, %v6693_v17 }
  0x26   :  { %34 = vst [vmem:[#allocation2] sm:$0x3] %v6593_v53  ;;  %35 = vst [vmem:[#allocation2 + $0x10] sm:$0x3] %v6593_v53  ;;  %1520 = vmatprep.mubr.f32.mxu0 %v6593_v53  ;;  %1609 = vmatprep.mubr.f32.mxu1 %v6593_v53 }
  0x27   :  { %266 = vrot.lane.b32.xlu0 %v263_v42, %s6586_s23  ;;  %v852_v51 = vcombine.low %v844_v7, %v851_v44  ;;  %v98_v52 = vrot.slane %v91_v46, %v6693_v17  ;;  %2756 = vst [vmem:[#allocation4] sm:$0xff] %v6593_v53  ;;  %2758 = vst [vmem:[#allocation4 + $0x40] sm:$0xf] %v6593_v53 }
  0x28   :  { %2761 = vst [vmem:[#allocation4 + $0x58] sm:$0xf] %v6593_v53 }
  0x29   :  { %1009 = vrot.lane.b32.xlu1 %v1006_v45, %s6587_s26  ;;  %v106_v12 = vcombine.low %v98_v52, %v105_v47 }
  0x2b   :  { %855 = vrot.lane.b32.xlu0 %v852_v51, %s6585_s22 }
  0x2d   :  { %109 = vrot.lane.b32.xlu1 %v106_v12, %s6592_s30 }
  0x2e   :  { %14 = vsyncpa [#allocation7], 0  ;;  %vm270_vm0 = vcmask 818176   ;;  %v196_v57 = vld [vmem:[#allocation2] sm:$0xff]  ;;  %vm642_vm1 = vcmask 7168   ;;  %vm426_vm2 = vcmask 826368  }
  0x2f   :  { %vm486_vm3 = vcmask 220160   ;;  %vm582_vm4 = vcmask 1039360   ;;  %vm113_vm5 = vcmask 809984   ;;  %vm330_vm6 = vcmask 228352   ;;  %s6597_s20 = smov 113   ;;  %s6598_s24 = smov 114  }
  0x30   :  { %v5200_v39 = vld [vmem:[%s9595_s5 + $0x4] ss:$8 sm:$0xf]  ;;  %vm174_vm7 = vcmask 236544   ;;  %vm115_vm8 = vcmask 1041408   ;;  %vm1425_vm9 = vcmask 146432  }
  0x31   :  { %v5201_v40 = vld [vmem:[%s9595_s5 + $0x4] ss:$8 sm:$0xf0]  ;;  %vm6595_vm10 = vmmov 0   ;;  %s6600_s16 = smov 13   ;;  %s6601_s25 = smov 14  }
  0x32   :  { %v7021_v46 = vor.u32 %v5201_v40, %v5200_v39  ;;  %s6602_s10 = smov 15  }
  0x34   :  { %v674_v47 = vrot.slane %v7021_v46, %v6681_v13  ;;  %v678_v12 = vrot.slane %v7021_v46, %v6684_v14 }
  0x81   :  { %v6913_v55 = vpop.permute.xlu1 %853  ;;  %v6915_v56 = vpop.permute.xlu0 %264 }
  0x82   :  { %v268_v58 = vrot.slane %v6915_v56, 6  ;;  %v857_v59 = vrot.slane %v6913_v55, 6 }
  0x84   :  { %v271_v60 = vsel %vm270_vm0, %v268_v58, %v6915_v56  ;;  %v859_v0 = vsel %vm642_vm1, %v857_v59, %v6913_v55 }
  0x85   :  { %v276_v6 = vmul.f32 %v271_v60, %v196_v57  ;;  %v6923_v61 = vpop.permute.xlu1 %1007  ;;  %v6943_v49 = vmul.f32 %v859_v0, %v6732_v35  ;;  %v686_v0 = vrot.slane %v7021_v46, %v6690_v16 }
  0x86   :  { %v1011_v1 = vrot.slane %v6923_v61, 6 }
  0x87   :  { %v6925_v62 = vpop.permute.xlu0 %420  ;;  %v6928_v63 = vrot.slane %v276_v6, %v6693_v17  ;;  %v6965_v21 = vrot.slane %v6943_v49, %v6693_v17  ;;  %v280_v44 = vcombine.low %v276_v6, %v276_v6 }
  0x88   :  { %v424_v2 = vrot.slane %v6925_v62, 6  ;;  %v1013_v8 = vsel %vm486_vm3, %v1011_v1, %v6923_v61 }
  0x89   :  { %318 = vrot.lane.b32.xlu0 %v6928_v63, %s6589_s27  ;;  %v6959_v20 = vmul.f32 %v1013_v8, %v6732_v35  ;;  %v6967_v22 = vpop.permute.xlu1 %1161  ;;  %v287_v52 = vrot.slane %v280_v44, %v6693_v17 }
  0x8a   :  { %v427_v3 = vsel %vm426_vm2, %v424_v2, %v6925_v62  ;;  %v1165_v23 = vrot.slane %v6967_v22, 6 }
  0x8b   :  { %v6945_v4 = vmul.f32 %v427_v3, %v196_v57  ;;  %v1029_v27 = vrot.slane %v6959_v20, %v6693_v17  ;;  %v699_v3 = vcombine.low %v674_v47, %v678_v12  ;;  %v1273_v12 = vrot.slane %v6788_v11, %v6829_v48 }
  0x8c   :  { %v1167_v30 = vsel %vm330_vm6, %v1165_v23, %v6967_v22 }
  0x8d   :  { %v6951_v5 = vpop.permute.xlu0 %576  ;;  %v6956_v19 = vrot.slane %v6945_v4, %v6693_v17  ;;  %v1172_v10 = vmul.f32 %v1167_v30, %v6732_v35 }
  0x8e   :  { %v580_v9 = vrot.slane %v6951_v5, 6  ;;  %v7013_v41 = vpop.permute.xlu1 %1315 }
  0x8f   :  { %472 = vrot.lane.b32.xlu0 %v6956_v19, %s6587_s26  ;;  %v7004_v37 = vrot.slane %v1172_v10, %v6693_v17  ;;  %v1176_v7 = vcombine.low %v1172_v10, %v1172_v10  ;;  %v1319_v51 = vrot.slane %v7013_v41, 6  ;;  %v451_v16 = vcombine.low %v6956_v19, %v6956_v19 }
  0x90   :  { %v583_v24 = vsel %vm582_vm4, %v580_v9, %v6951_v5 }
  0x91   :  { %v6969_v43 = vpop.permute.xlu0 %107  ;;  %v588_v28 = vmul.f32 %v583_v24, %v196_v57  ;;  %v1192_v42 = vcombine.low %v7004_v37, %v7004_v37  ;;  %v1183_v6 = vrot.slane %v1176_v7, %v6693_v17  ;;  %v436_v24 = vcombine.high %v6945_v4, %v6945_v4 }
  0x92   :  { %v111_v25 = vrot.slane %v6969_v43, 6 }
  0x93   :  { %906 = vrot.lane.b32.xlu0 %v6965_v21, %s6590_s28  ;;  %v6995_v33 = vrot.slane %v588_v28, %v6693_v17  ;;  %v592_v38 = vcombine.low %v588_v28, %v588_v28  ;;  %v7034_v60 = vpop.permute.xlu1 %1163  ;;  %v707_v28 = vrot.slane %v699_v3, %v6693_v17 }
  0x94   :  { %v114_v26 = vsel %vm113_vm5, %v111_v25, %v6969_v43 }
  0x95   :  { %v120_v29 = vmul.f32 %v196_v57, %v114_v26  ;;  %v608_v36 = vcombine.low %v6995_v33, %v6995_v33  ;;  %v7019_v45 = vrot.slane %v592_v38, %v6693_v17  ;;  %v682_v57 = vrot.slane %v7021_v46, %v6687_v15  ;;  %v7069_v40 = vpop.permute.xlu0 %578 }
  0x96   :  { %v1321_v15 = vsel %vm174_vm7, %v1319_v51, %v7013_v41  ;;  %v1037_v26 = vcombine.low %v1029_v27, %v1029_v27  ;;  %v1022_v38 = vcombine.high %v6959_v20, %v6959_v20  ;;  %v1277_v20 = vrot.slane %v6788_v11, %v6832_v50  ;;  %v7264_v41 = vld [vmem:[%s9591_s1] sm:$0xff] }
  0x97   :  { %v124_v31 = vcombine.high %v120_v29, %v120_v29  ;;  %1058 = vrot.lane.b32.xlu0 %v1029_v27, %s6588_s0  ;;  %v131_v34 = vrot.slane %v120_v29, %v6693_v17  ;;  %v700_v8 = vcombine.low %v682_v57, %v686_v0  ;;  %v868_v29 = vcombine.low %v6943_v49, %v6943_v49 }
  0x98   :  { %v1326_v4 = vmul.f32 %v1321_v15, %v6732_v35  ;;  %v450_v27 = vrot.slane %v436_v24, %v6693_v17  ;;  %v1299_v3 = vcombine.low %v1273_v12, %v1277_v20  ;;  %v1281_v15 = vrot.slane %v6788_v11, %v6836_v54 }
  0x99   :  { %v6992_v32 = vrot.slane %v124_v31, %v6693_v17  ;;  %v139_v18 = vcombine.high %v131_v34, %v131_v34  ;;  %v714_v30 = vrot.slane %v700_v8, %v6693_v17  ;;  %v423_v31 = vpop.permute.xlu1 %422  ;;  %v267_v57 = vpop.permute.xlu0 %266 }
  0x9a   :  { %v1337_v49 = vrot.slane %v1326_v4, %v6693_v17  ;;  %v452_v39 = vcombine.low %v450_v27, %v450_v27  ;;  %v269_v8 = vrot.slane %v267_v57, 6 }
  0x9b   :  { %162 = vrot.lane.b32.xlu1 %v6992_v32, %s6591_s29  ;;  %158 = vrot.lane.b32.xlu0 %v131_v34, %s6591_s29  ;;  %v715_v10 = vcombine.low %v707_v28, %v714_v30  ;;  %v295_v34 = vcombine.high %v287_v52, %v287_v52  ;;  %v1330_v28 = vcombine.high %v1326_v4, %v1326_v4  ;;  %v425_v30 = vrot.slane %v423_v31, 6 }
  0x9c   :  { %v1345_v7 = vcombine.high %v1337_v49, %v1337_v49 }
  0x9d   :  { %v7059_v19 = vmul.f32 %v715_v10, %v6732_v35  ;;  %v1191_v35 = vcombine.low %v1183_v6, %v1183_v6  ;;  %v272_v10 = vsel %vm115_vm8, %v268_v58, %v269_v8  ;;  %v856_v4 = vpop.permute.xlu0 %855  ;;  %v428_v56 = vsel %vm115_vm8, %v424_v2, %v425_v30 }
  0x9e   :  { %v858_v58 = vrot.slane %v856_v4, 6  ;;  %v690_v30 = vrot.slane %v7021_v46, %v6829_v48 }
  0x9f   :  { %630 = vrot.lane.b32.xlu1 %v608_v36, %s6585_s22  ;;  %160 = vrot.lane.b32.xlu0 %v139_v18, %s6591_s29  ;;  %v875_v36 = vrot.slane %v868_v29, %v6693_v17  ;;  %v745_v18 = vrot.slane %v7059_v19, %v6693_v17  ;;  %5202 = vst.sshfl [vmem:[#allocation3 + $0x38] sm:$0x3 pattern:$0x76325410] %v7059_v19 }
  0xa0   :  { %v1306_v29 = vrot.slane %v1299_v3, %v6693_v17  ;;  %v860_v62 = vsel %vm115_vm8, %v857_v59, %v858_v58  ;;  %v884_v59 = vcombine.high %v6965_v21, %v6965_v21  ;;  %v665_v58 = vld [vmem:[#allocation2 + $0xa] sm:$0x3f] }
  0xa1   :  { %v753_v44 = vcombine.high %v745_v18, %v745_v18  ;;  %v883_v47 = vcombine.high %v875_v36, %v875_v36  ;;  %v861_v55 = vsel %vm642_vm1, %v860_v62, %v856_v4 }
  0xa3   :  { %1214 = vrot.lane.b32.xlu1 %v1192_v42, %s6586_s23  ;;  %628 = vrot.lane.b32.xlu0 %v7019_v45, %s6585_s22  ;;  %v7071_v42 = vpop.permute.xlu1 %1009  ;;  %779 = vst [vmem:[#allocation3 + $0x40] sm:$0x3] %v753_v44 }
  0xa7   :  { %314 = vrot.lane.b32.xlu1 %v287_v52, %s6589_s27  ;;  %1212 = vrot.lane.b32.xlu0 %v1183_v6, %s6586_s23  ;;  %v1036_v52 = vrot.slane %v1022_v38, %v6693_v17  ;;  %v110_v6 = vpop.permute.xlu1 %109  ;;  %v581_v38 = vrot.slane %v7069_v40, 6 }
  0xa8   :  { %v112_v24 = vrot.slane %v110_v6, 6 }
  0xa9   :  { %v1038_v0 = vcombine.low %v1036_v52, %v1036_v52 }
  0xaa   :  { %v116_v11 = vsel %vm115_vm8, %v111_v25, %v112_v24  ;;  %v509_v25 = vld [vmem:[#allocation2 + $0x8] sm:$0xff] }
  0xab   :  { %1056 = vrot.lane.b32.xlu1 %v1037_v26, %s6588_s0  ;;  %470 = vrot.lane.b32.xlu0 %v451_v16, %s6587_s26  ;;  %v607_v26 = vcombine.low %v7019_v45, %v7019_v45  ;;  %v296_v16 = vcombine.high %v6928_v63, %v6928_v63  ;;  %v1313_v45 = vrot.slane %v1281_v15, %v6693_v17 }
  0xac   :  { %v1344_v63 = vrot.slane %v1330_v28, %v6693_v17 }
  0xad   :  { %v1314_v43 = vcombine.low %v1306_v29, %v1313_v45 }
  0xae   :  { %v1346_v15 = vcombine.high %v1344_v63, %v1344_v63 }
  0xaf   :  { %316 = vrot.lane.b32.xlu1 %v295_v34, %s6589_s27  ;;  %902 = vrot.lane.b32.xlu0 %v875_v36, %s6590_s28  ;;  %v273_v34 = vsel %vm270_vm0, %v272_v10, %v267_v57  ;;  %v117_v36 = vsel %vm113_vm5, %v116_v11, %v110_v6  ;;  %v694_v10 = vrot.slane %v7021_v46, %v6832_v50 }
  0xb0   :  { %v7110_v18 = vmul.f32 %v509_v25, %v117_v36  ;;  %v698_v11 = vrot.slane %v7021_v46, %v6836_v54 }
  0xb1   :  { %v716_v45 = vcombine.low %v690_v30, %v694_v10 }
  0xb3   :  { %474 = vrot.lane.b32.xlu1 %v452_v39, %s6587_s26  ;;  %1210 = vrot.lane.b32.xlu0 %v1191_v35, %s6586_s23  ;;  %v429_v39 = vsel %vm426_vm2, %v428_v56, %v423_v31  ;;  %v1012_v35 = vrot.slane %v7071_v42, 6  ;;  %v584_v31 = vsel %vm115_vm8, %v580_v9, %v581_v38 }
  0xb4   :  { %v7121_v2 = vmul.f32 %v509_v25, %v429_v39  ;;  %v585_v5 = vsel %vm582_vm4, %v584_v31, %v7069_v40 }
  0xb5   :  { %v7155_v20 = vmul.f32 %v585_v5, %v509_v25 }
  0xb6   :  { %v460_v12 = vrot.slane %v7121_v2, %v6693_v17 }
  0xb7   :  { %904 = vrot.lane.b32.xlu1 %v883_v47, %s6590_s28  ;;  %1366 = vrot.lane.b32.xlu0 %v1345_v7, %s6592_s30  ;;  %v1166_v7 = vrot.slane %v7034_v60, 6  ;;  %v7138_v47 = vld [vmem:[#allocation2 + $0xa] sm:$0xff] }
  0xb8   :  { %v7144_v9 = vmul.f32 %v7138_v47, %v861_v55  ;;  %v468_v57 = vcombine.low %v460_v12, %v460_v12 }
  0xba   :  { %v885_v6 = vcombine.low %v7144_v9, %v7144_v9 }
  0xbb   :  { %1060 = vrot.lane.b32.xlu1 %v1038_v0, %s6588_s0  ;;  %1364 = vrot.lane.b32.xlu0 %v1337_v49, %s6592_s30  ;;  %v7108_v49 = vmul.f32 %v509_v25, %v273_v34  ;;  %v609_v0 = vcombine.low %v7155_v20, %v7155_v20  ;;  %v730_v34 = vrot.slane %v698_v11, %v6693_v17 }
  0xbc   :  { %v892_v3 = vrot.slane %v885_v6, %v6693_v17 }
  0xbd   :  { %v297_v44 = vcombine.low %v7108_v49, %v7108_v49  ;;  %v616_v8 = vrot.slane %v609_v0, %v6693_v17 }
  0xbe   :  { %v900_v56 = vcombine.high %v892_v3, %v892_v3 }
  0xbf   :  { %626 = vrot.lane.b32.xlu1 %v607_v26, %s6585_s22  ;;  %320 = vrot.lane.b32.xlu0 %v296_v16, %s6589_s27  ;;  %v304_v21 = vrot.slane %v297_v44, %v6693_v17  ;;  %v624_v28 = vcombine.low %v616_v8, %v616_v8 }
  0xc1   :  { %v312_v4 = vcombine.high %v304_v21, %v304_v21 }
  0xc3   :  { %1368 = vrot.lane.b32.xlu1 %v1344_v63, %s6592_s30  ;;  %476 = vrot.lane.b32.xlu0 %v450_v27, %s6587_s26  ;;  %v148_v27 = vrot.slane %v7110_v18, %v6693_v17  ;;  %v723_v63 = vrot.slane %v716_v45, %v6693_v17 }
  0xc5   :  { %v156_v29 = vcombine.high %v148_v27, %v148_v27  ;;  %v731_v36 = vcombine.low %v723_v63, %v730_v34 }
  0xc7   :  { %1317 = vrot.lane.b32.xlu1 %v1314_v43, %s6591_s29  ;;  %632 = vrot.lane.b32.xlu0 %v6995_v33, %s6585_s22  ;;  %v1014_v33 = vsel %vm115_vm8, %v1011_v1, %v1012_v35  ;;  %v1168_v1 = vsel %vm115_vm8, %v1165_v23, %v1166_v7  ;;  %v140_v23 = vcombine.high %v6992_v32, %v6992_v32 }
  0xc8   :  { %v1015_v61 = vsel %vm486_vm3, %v1014_v33, %v7071_v42  ;;  %v738_v42 = vcombine.high %v7059_v19, %v7059_v19  ;;  %v1169_v22 = vsel %vm330_vm6, %v1168_v1, %v7034_v60  ;;  %v7204_v48 = vmul.f32 %v731_v36, %v665_v58 }
  0xc9   :  { %v7159_v40 = vmul.f32 %v7138_v47, %v1015_v61 }
  0xca   :  { %5203 = vst.sshfl [vmem:[#allocation3 + $0x48] sm:$0x3 pattern:$0x76325410] %v738_v42  ;;  %v752_v24 = vrot.slane %v738_v42, %v6693_v17 }
  0xcb   :  { %166 = vrot.lane.b32.xlu1 %v148_v27, %s6591_s29  ;;  %908 = vrot.lane.b32.xlu0 %v884_v59, %s6590_s28  ;;  %v1046_v19 = vrot.slane %v7159_v40, %v6693_v17  ;;  %5204 = vst.sshfl [vmem:[#allocation3 + $0x58] sm:$0x3 pattern:$0x76325410] %v7204_v48 }
  0xcc   :  { %v754_v26 = vcombine.high %v752_v24, %v752_v24 }
  0xcd   :  { %v1054_v60 = vcombine.low %v1046_v19, %v1046_v19 }
  0xce   :  { %781 = vst [vmem:[#allocation3 + $0x50] sm:$0x3] %v754_v26 }
  0xcf   :  { %322 = vrot.lane.b32.xlu1 %v304_v21, %s6589_s27  ;;  %1062 = vrot.lane.b32.xlu0 %v1036_v52, %s6588_s0  ;;  %v7172_v52 = vmul.f32 %v1169_v22, %v7138_v47 }
  0xd1   :  { %v1193_v32 = vcombine.low %v7172_v52, %v7172_v52 }
  0xd3   :  { %478 = vrot.lane.b32.xlu1 %v468_v57, %s6587_s26  ;;  %164 = vrot.lane.b32.xlu0 %v140_v23, %s6591_s29  ;;  %v1200_v16 = vrot.slane %v1193_v32, %v6693_v17 }
  0xd7   :  { %910 = vrot.lane.b32.xlu1 %v892_v3, %s6590_s28  ;;  %1216 = vrot.lane.b32.xlu0 %v7004_v37, %s6586_s23  ;;  %v1208_v37 = vcombine.low %v1200_v16, %v1200_v16 }
  0xdb   :  { %1064 = vrot.lane.b32.xlu1 %v1054_v60, %s6588_s0  ;;  %1370 = vrot.lane.b32.xlu0 %v1346_v15, %s6592_s30 }
  0xdf   :  { %634 = vrot.lane.b32.xlu1 %v624_v28, %s6585_s22  ;;  %168 = vrot.lane.b32.xlu0 %v156_v29, %s6591_s29 }
  0xe3   :  { %1218 = vrot.lane.b32.xlu1 %v1208_v37, %s6586_s23  ;;  %480 = vrot.lane.b32.xlu0 %v460_v12, %s6587_s26 }
  0xe7   :  { %636 = vrot.lane.b32.xlu0 %v616_v8, %s6585_s22 }
  0xeb   :  { %1066 = vrot.lane.b32.xlu0 %v1046_v19, %s6588_s0 }
  0xef   :  { %324 = vrot.lane.b32.xlu0 %v312_v4, %s6589_s27 }
  0xf3   :  { %912 = vrot.lane.b32.xlu0 %v900_v56, %s6590_s28 }
  0xf7   :  { %1220 = vrot.lane.b32.xlu0 %v1200_v16, %s6586_s23 }
  0xfb   :  { %v319_v50 = vpop.permute.xlu0 %318 }
 0x101   :  { %v473_v54 = vpop.permute.xlu0 %472 }
 0x105   :  { %v7209_v46 = vpop.permute.xlu0 %906 }
 0x109   :  { %v1059_v43 = vpop.permute.xlu0 %1058 }
 0x10d   :  { %v7211_v25 = vpop.permute.xlu1 %162  ;;  %v159_v38 = vpop.permute.xlu0 %158 }
 0x111   :  { %v7213_v39 = vpop.permute.xlu1 %630  ;;  %v161_v35 = vpop.permute.xlu0 %160 }
 0x112   :  { %v175_v62 = vsel %vm174_vm7, %v159_v38, %v161_v35  ;;  %v176_v27 = vsel %vm174_vm7, %v161_v35, %v7211_v25 }
 0x113   :  { %189 = vst [vmem:[#allocation3] sm:$0x3] %v175_v62  ;;  %190 = vst [vmem:[#allocation3 + $0x8] sm:$0x3] %v176_v27 }
 0x115   :  { %v7218_v44 = vpop.permute.xlu1 %1214  ;;  %v629_v31 = vpop.permute.xlu0 %628 }
 0x116   :  { %v644_v55 = vsel %vm642_vm1, %v629_v31, %v7213_v39 }
 0x117   :  { %658 = vst [vmem:[#allocation3 + $0x8] sm:$0xc0] %v644_v55 }
 0x119   :  { %v315_v59 = vpop.permute.xlu1 %314  ;;  %v1213_v7 = vpop.permute.xlu0 %1212 }
 0x11a   :  { %v1227_v33 = vsel %vm270_vm0, %v1213_v7, %v7218_v44 }
 0x11b   :  { %1241 = vst [vmem:[#allocation3 + $0x40] sm:$0xc0] %v1227_v33  ;;  %v141_v33 = vcombine.high %v7110_v18, %v7110_v18 }
 0x11d   :  { %v1057_v5 = vpop.permute.xlu1 %1056  ;;  %v471_v12 = vpop.permute.xlu0 %470 }
 0x11e   :  { %v1072_v21 = vsel %vm426_vm2, %v1057_v5, %v1059_v43  ;;  %v487_v61 = vsel %vm486_vm3, %v471_v12, %v473_v54  ;;  %v155_v12 = vrot.slane %v141_v33, %v6693_v17 }
 0x11f   :  { %1086 = vst [vmem:[#allocation3 + $0x38] sm:$0x30] %v1072_v21  ;;  %501 = vst [vmem:[#allocation3] sm:$0x30] %v487_v61 }
 0x121   :  { %v317_v1 = vpop.permute.xlu1 %316  ;;  %v903_v42 = vpop.permute.xlu0 %902 }
 0x122   :  { %v331_v57 = vsel %vm330_vm6, %v315_v59, %v317_v1  ;;  %v332_v6 = vsel %vm330_vm6, %v317_v1, %v319_v50  ;;  %v7282_v1 = vld [vmem:[%s9591_s1 + $0x8] sm:$0xff] }
 0x123   :  { %345 = vst [vmem:[#allocation3] sm:$0xc] %v331_v57  ;;  %346 = vst [vmem:[#allocation3 + $0x8] sm:$0xc] %v332_v6 }
 0x125   :  { %v475_v22 = vpop.permute.xlu1 %474  ;;  %v1211_v0 = vpop.permute.xlu0 %1210 }
 0x126   :  { %v488_v23 = vsel %vm486_vm3, %v473_v54, %v475_v22  ;;  %v1226_v3 = vsel %vm270_vm0, %v1211_v0, %v1213_v7 }
 0x127   :  { %502 = vst [vmem:[#allocation3 + $0x8] sm:$0x30] %v488_v23  ;;  %1240 = vst [vmem:[#allocation3 + $0x38] sm:$0xc0] %v1226_v3  ;;  %v453_v23 = vcombine.high %v7121_v2, %v7121_v2  ;;  %v7304_v2 = vrot.slane %v7108_v49, %v6693_v17 }
 0x129   :  { %v905_v19 = vpop.permute.xlu1 %904  ;;  %v1367_v8 = vpop.permute.xlu0 %1366 }
 0x12a   :  { %v918_v32 = vsel %vm582_vm4, %v903_v42, %v905_v19  ;;  %v919_v60 = vsel %vm582_vm4, %v905_v19, %v7209_v46  ;;  %v7299_v19 = vld [vmem:[%s9591_s1 + $0x10] sm:$0xf] }
 0x12b   :  { %932 = vst [vmem:[#allocation3 + $0x38] sm:$0xc] %v918_v32  ;;  %933 = vst [vmem:[#allocation3 + $0x40] sm:$0xc] %v919_v60 }
 0x12d   :  { %v1061_v24 = vpop.permute.xlu1 %1060  ;;  %v1365_v26 = vpop.permute.xlu0 %1364 }
 0x12e   :  { %v1073_v15 = vsel %vm426_vm2, %v1059_v43, %v1061_v24  ;;  %v1380_v28 = vsel %vm113_vm5, %v1365_v26, %v1367_v8  ;;  %v1405_v4 = vld [vmem:[#allocation3 + $0x8] sm:$0xff] }
 0x12f   :  { %1087 = vst [vmem:[#allocation3 + $0x40] sm:$0x30] %v1073_v15  ;;  %1394 = vst [vmem:[#allocation3 + $0x70] sm:$0x3] %v1380_v28  ;;  %v899_v15 = vrot.slane %v7144_v9, %v6693_v17 }
 0x131   :  { %v627_v16 = vpop.permute.xlu1 %626  ;;  %v321_v37 = vpop.permute.xlu0 %320 }
 0x132   :  { %v643_v29 = vsel %vm642_vm1, %v627_v16, %v629_v31  ;;  %v333_v30 = vsel %vm330_vm6, %v319_v50, %v321_v37  ;;  %v1411_v43 = vld [vmem:[#allocation3 + $0x38] sm:$0xff]  ;;  %v901_v16 = vcombine.high %v899_v15, %v899_v15 }
 0x133   :  { %657 = vst [vmem:[#allocation3] sm:$0xc0] %v643_v29  ;;  %347 = vst [vmem:[#allocation3 + $0x10] sm:$0xc] %v333_v30 }
 0x135   :  { %v7237_v10 = vpop.permute.xlu1 %1368  ;;  %v477_v45 = vpop.permute.xlu0 %476 }
 0x136   :  { %v1381_v11 = vsel %vm113_vm5, %v1367_v8, %v7237_v10  ;;  %v1412_v63 = vld [vmem:[#allocation3 + $0x40] sm:$0xff]  ;;  %v489_v34 = vsel %vm486_vm3, %v475_v22, %v477_v45  ;;  %v157_v22 = vcombine.high %v155_v12, %v155_v12 }
 0x137   :  { %1395 = vst [vmem:[#allocation3 + $0x78] sm:$0x3] %v1381_v11  ;;  %v5921_v36 = vpack.c.bf16 %v1412_v63, %v1405_v4  ;;  %503 = vst [vmem:[#allocation3 + $0x10] sm:$0x30] %v489_v34  ;;  %v1207_v11 = vrot.slane %v7172_v52, %v6693_v17  ;;  %v762_v52 = vrot.slane %v7204_v48, %v6693_v17 }
 0x139   :  { %5922 = vmatprep.subr.bf16.mxu0 %v5921_v36  ;;  %v1318_v56 = vpop.permute.xlu1 %1317  ;;  %v7242_v54 = vpop.permute.xlu0 %632 }
 0x13a   :  { %v1320_v58 = vrot.slane %v1318_v56, 6  ;;  %v1404_v50 = vld [vmem:[#allocation3] sm:$0xff]  ;;  %v645_v38 = vsel %vm642_vm1, %v7213_v39, %v7242_v54 }
 0x13b   :  { %v5923_v35 = vpack.c.bf16 %v1411_v43, %v1404_v50  ;;  %659 = vst [vmem:[#allocation3 + $0x10] sm:$0xc0] %v645_v38  ;;  %v1209_v43 = vcombine.low %v1207_v11, %v1207_v11 }
 0x13c   :  { %v1322_v62 = vsel %vm115_vm8, %v1319_v51, %v1320_v58  ;;  %v1418_v51 = vld [vmem:[#allocation3 + $0x70] sm:$0x3]  ;;  %v770_v58 = vcombine.high %v762_v52, %v762_v52 }
 0x13d   :  { %v1323_v27 = vsel %vm174_vm7, %v1322_v62, %v1318_v56  ;;  %5924 = vmatpush1.bf16.msra.mxu0 %v5923_v35  ;;  %v7251_v31 = vpop.permute.xlu1 %166  ;;  %v909_v59 = vpop.permute.xlu0 %908 }
 0x13e   :  { %v7254_v55 = vmul.f32 %v1323_v27, %v7138_v47  ;;  %v1419_v7 = vld [vmem:[#allocation3 + $0x78] sm:$0x3]  ;;  %v920_v39 = vsel %vm582_vm4, %v7209_v46, %v909_v59  ;;  %783 = vst [vmem:[#allocation3 + $0x60] sm:$0x3] %v770_v58 }
 0x13f   :  { %5214 = vmatprep.subr.msk.mxu0 %vm115_vm8, %v1419_v7  ;;  %934 = vst [vmem:[#allocation3 + $0x48] sm:$0xc] %v920_v39 }
 0x140   :  { %v1354_v47 = vrot.slane %v7254_v55, %v6693_v17  ;;  %v1347_v38 = vcombine.high %v7254_v55, %v7254_v55 }
 0x141   :  { %5215 = vmatpush1.msk.msra.mxu0 %vm115_vm8, %v1418_v51  ;;  %v7269_v5 = vpop.permute.xlu1 %322  ;;  %v1063_v46 = vpop.permute.xlu0 %1062 }
 0x142   :  { %v334_v18 = vsel %vm330_vm6, %v321_v37, %v7269_v5  ;;  %1372 = vrot.lane.b32.xlu1 %v1354_v47, %s6592_s30  ;;  %v1362_v21 = vcombine.high %v1354_v47, %v1354_v47  ;;  %5216 = vmatmul.mubr.msk.f32.vlgmr.msra.gmra.mrb[0].mxu0 %vm1425_vm9, %v7264_v41  ;;  %v1074_v61 = vsel %vm426_vm2, %v1061_v24, %v1063_v46 }
 0x143   :  { %348 = vst [vmem:[#allocation3 + $0x18] sm:$0xc] %v334_v18  ;;  %1526 = vmatprep.mubr.f32.mxu0 %v6593_v53  ;;  %1088 = vst [vmem:[#allocation3 + $0x48] sm:$0x30] %v1074_v61  ;;  %v467_v24 = vrot.slane %v453_v23, %v6693_v17  ;;  %v1361_v39 = vrot.slane %v1347_v38, %v6693_v17  ;;  %v313_v18 = vcombine.high %v7304_v2, %v7304_v2 }
 0x144   :  { %1374 = vrot.lane.b32.xlu0 %v1362_v21, %s6592_s30 }
 0x145   :  { %v479_v57 = vpop.permute.xlu1 %478  ;;  %v165_v42 = vpop.permute.xlu0 %164  ;;  %v1363_v61 = vcombine.high %v1361_v39, %v1361_v39 }
 0x146   :  { %v490_v6 = vsel %vm486_vm3, %v477_v45, %v479_v57  ;;  %170 = vrot.lane.b32.xlu1 %v155_v12, %s6591_s29  ;;  %5217 = vmatmul.mubr.msk.f32.gmra.mrb[2].mxu0 %vm1425_vm9, %v7282_v1  ;;  %v177_v0 = vsel %vm174_vm7, %v7211_v25, %v165_v42  ;;  %v178_v3 = vsel %vm174_vm7, %v165_v42, %v7251_v31 }
 0x147   :  { %504 = vst [vmem:[#allocation3 + $0x18] sm:$0x30] %v490_v6  ;;  %1532 = vmatprep.mubr.f32.mxu0 %v6593_v53  ;;  %191 = vst [vmem:[#allocation3 + $0x10] sm:$0x3] %v177_v0  ;;  %v7308_v25 = vrot.slane %v7155_v20, %v6693_v17 }
 0x148   :  { %192 = vst [vmem:[#allocation3 + $0x18] sm:$0x3] %v178_v3  ;;  %172 = vrot.lane.b32.xlu0 %v157_v22, %s6591_s29 }
 0x149   :  { %v7310_v32 = vpop.permute.xlu1 %910  ;;  %v1217_v8 = vpop.permute.xlu0 %1216  ;;  %v625_v20 = vcombine.low %v7308_v25, %v7308_v25 }
 0x14a   :  { %v921_v60 = vsel %vm582_vm4, %v909_v59, %v7310_v32  ;;  %326 = vrot.lane.b32.xlu1 %v7304_v2, %s6589_s27  ;;  %5218 = vmatmul.mubr.msk.f32.gmra.mrb[4].mxu0 %vm1425_vm9, %v7299_v19  ;;  %v1228_v49 = vsel %vm270_vm0, %v7218_v44, %v1217_v8 }
 0x14b   :  { %935 = vst [vmem:[#allocation3 + $0x50] sm:$0xc] %v921_v60  ;;  %1603 = vmatprep.mubr.f32.mxu0 %v6593_v53  ;;  %1242 = vst [vmem:[#allocation3 + $0x48] sm:$0xc0] %v1228_v49  ;;  %v1039_v53 = vcombine.high %v7159_v40, %v7159_v40  ;;  %v469_v40 = vcombine.low %v467_v24, %v467_v24  ;;  %v9600_v49 = vmov 0.0|0.0  }
 0x14c   :  { %484 = vrot.lane.b32.xlu0 %v467_v24, %s6587_s26 }
 0x14d   :  { %v1065_v26 = vpop.permute.xlu1 %1064  ;;  %v7329_v9 = vpop.permute.xlu0 %1370  ;;  %v1053_v45 = vrot.slane %v1039_v53, %v6693_v17  ;;  %v755_v17 = vcombine.high %v7204_v48, %v7204_v48 }
 0x14e   :  { %v1075_v28 = vsel %vm426_vm2, %v1063_v46, %v1065_v26  ;;  %638 = vrot.lane.b32.xlu1 %v625_v20, %s6585_s22  ;;  %v1382_v44 = vsel %vm113_vm5, %v7237_v10, %v7329_v9  ;;  %v1406_v33 = vld [vmem:[#allocation3 + $0x10] sm:$0xff]  ;;  %v7403_v20 = vld [vmem:[#allocation4] sm:$0xff] }
 0x14f   :  { %1089 = vst [vmem:[#allocation3 + $0x50] sm:$0x30] %v1075_v28  ;;  %1396 = vst [vmem:[#allocation3 + $0x80] sm:$0x3] %v1382_v44  ;;  %v1055_v56 = vcombine.low %v1053_v45, %v1053_v45 }
 0x150   :  { %916 = vrot.lane.b32.xlu0 %v901_v16, %s6590_s28  ;;  %5205 = vst.sshfl [vmem:[#allocation3 + $0x68] sm:$0x3 pattern:$0x76325410] %v755_v17  ;;  %v6379_v17 = vld [vmem:[%s9597_s7 + $0x34] ss:$8 sps:$4 sm:$0xff]  }
 0x151   :  { %v635_v29 = vpop.permute.xlu1 %634  ;;  %v7340_v30 = vpop.permute.xlu0 %168 }
 0x152   :  { %v646_v37 = vsel %vm642_vm1, %v7242_v54, %v635_v29  ;;  %914 = vrot.lane.b32.xlu1 %v899_v15, %s6590_s28  ;;  %v179_v10 = vsel %vm174_vm7, %v7251_v31, %v7340_v30  ;;  %v1413_v35 = vld [vmem:[#allocation3 + $0x48] sm:$0xff] }
 0x153   :  { %660 = vst [vmem:[#allocation3 + $0x18] sm:$0xc0] %v646_v37  ;;  %193 = vst [vmem:[#allocation3 + $0x20] sm:$0x3] %v179_v10  ;;  %v5927_v51 = vpack.c.bf16 %v1413_v35, %v1406_v33  ;;  %v6373_v33 = vld [vmem:[%s9597_s7 + $0x14] ss:$8 sps:$4 sm:$0xff]  }
 0x154   :  { %1224 = vrot.lane.b32.xlu0 %v1207_v11, %s6586_s23 }
 0x155   :  { %v1219_v4 = vpop.permute.xlu1 %1218  ;;  %v7351_v34 = vpop.permute.xlu0 %480 }
 0x156   :  { %v1229_v63 = vsel %vm270_vm0, %v1217_v8, %v1219_v4  ;;  %482 = vrot.lane.b32.xlu1 %v469_v40, %s6587_s26  ;;  %v491_v36 = vsel %vm486_vm3, %v479_v57, %v7351_v34  ;;  %v1420_v8 = vld [vmem:[#allocation3 + $0x80] sm:$0x3] }
 0x157   :  { %1243 = vst [vmem:[#allocation3 + $0x50] sm:$0xc0] %v1229_v63  ;;  %505 = vst [vmem:[#allocation3 + $0x20] sm:$0x30] %v491_v36 }
 0x159   :  { %v7358_v54 = vpop.permute.xlu0 %636 }
 0x15a   :  { %1068 = vrot.lane.b32.xlu1 %v1055_v56, %s6588_s0  ;;  %v647_v50 = vsel %vm642_vm1, %v635_v29, %v7358_v54  ;;  %v1407_v27 = vld [vmem:[#allocation3 + $0x18] sm:$0xff] }
 0x15b   :  { %661 = vst [vmem:[#allocation3 + $0x20] sm:$0xc0] %v647_v50 }
 0x15d   :  { %v7365_v62 = vpop.permute.xlu0 %1066 }
 0x15e   :  { %1222 = vrot.lane.b32.xlu1 %v1209_v43, %s6586_s23  ;;  %v1414_v31 = vld [vmem:[#allocation3 + $0x50] sm:$0xff]  ;;  %v1076_v59 = vsel %vm426_vm2, %v1065_v26, %v7365_v62 }
 0x15f   :  { %v5925_v7 = vpack.c.bf16 %v1414_v31, %v1407_v27  ;;  %1090 = vst [vmem:[#allocation3 + $0x58] sm:$0x30] %v1076_v59  ;;  %v6370_v27 = vld [vmem:[%s9597_s7 + $0x4] ss:$8 sps:$4 sm:$0xff]   ;;  %v6368_v31 = vld [vmem:[%s9597_s7] ss:$8 sps:$4 sm:$0xff]  }
 0x161   :  { %5926 = vmatprep.subr.bf16.mxu0 %v5925_v7  ;;  %6318 = vmatprep.subr.bf16.mxu1 %v5925_v7  ;;  %v325_v55 = vpop.permute.xlu0 %324 }
 0x162   :  { %1376 = vrot.lane.b32.xlu1 %v1361_v39, %s6592_s30  ;;  %5928 = vmatpush1.bf16.msra.mxu0 %v5927_v51  ;;  %v335_v47 = vsel %vm330_vm6, %v7269_v5, %v325_v55 }
 0x163   :  { %6320 = vmatpush1.bf16.msra.mxu1 %v5927_v51  ;;  %349 = vst [vmem:[#allocation3 + $0x20] sm:$0xc] %v335_v47  ;;  %v6371_v51 = vld [vmem:[%s9597_s7 + $0x10] ss:$8 sps:$4 sm:$0xff]   ;;  %v6376_v47 = vld [vmem:[%s9597_s7 + $0x24] ss:$8 sps:$4 sm:$0xff]  }
 0x165   :  { %v913_v46 = vpop.permute.xlu0 %912 }
 0x166   :  { %328 = vrot.lane.b32.xlu1 %v313_v18, %s6589_s27  ;;  %v922_v21 = vsel %vm582_vm4, %v7310_v32, %v913_v46 }
 0x167   :  { %936 = vst [vmem:[#allocation3 + $0x58] sm:$0xc] %v922_v21 }
 0x169   :  { %v1221_v12 = vpop.permute.xlu0 %1220 }
 0x16a   :  { %640 = vrot.lane.b32.xlu1 %v7308_v25, %s6585_s22  ;;  %v1230_v5 = vsel %vm270_vm0, %v1219_v4, %v1221_v12  ;;  %v1408_v50 = vld [vmem:[#allocation3 + $0x20] sm:$0xff] }
 0x16b   :  { %1244 = vst [vmem:[#allocation3 + $0x58] sm:$0xc0] %v1230_v5 }
 0x16e   :  { %1070 = vrot.lane.b32.xlu1 %v1053_v45, %s6588_s0  ;;  %s6599_s0 = smov 115  }
 0x172   :  { %1378 = vrot.lane.b32.xlu1 %v1363_v61, %s6592_s30  ;;  %v1415_v52 = vld [vmem:[#allocation3 + $0x58] sm:$0xff] }
 0x173   :  { %v5931_v43 = vpack.c.bf16 %v1415_v52, %v1408_v50  ;;  %v6377_v61 = vld [vmem:[%s9597_s7 + $0x30] ss:$8 sps:$4 sm:$0xff]   ;;  %v6416_v52 = vld [vmem:[%s9597_s7 + $0x100] ss:$8 sps:$4 sm:$0xff]   ;;  %v6427_v50 = vld [vmem:[%s9597_s7 + $0x134] ss:$8 sps:$4 sm:$0xff]  }
 0x1b4   :  { %v1373_v57 = vpop.permute.xlu1 %1372 }
 0x1b5   :  { %v1383_v48 = vsel %vm113_vm5, %v7329_v9, %v1373_v57 }
 0x1b6   :  { %1397 = vst [vmem:[#allocation3 + $0x88] sm:$0x3] %v1383_v48  ;;  %v1375_v6 = vpop.permute.xlu0 %1374 }
 0x1b7   :  { %v1384_v42 = vsel %vm113_vm5, %v1373_v57, %v1375_v6  ;;  %v6382_v57 = vld [vmem:[%s9597_s7 + $0x44] ss:$8 sps:$4 sm:$0xff]  }
 0x1b8   :  { %1398 = vst [vmem:[#allocation3 + $0x90] sm:$0x3] %v1384_v42  ;;  %v171_v22 = vpop.permute.xlu1 %170  ;;  %v6385_v42 = vld [vmem:[%s9597_s7 + $0x54] ss:$8 sps:$4 sm:$0xff]  }
 0x1b9   :  { %v180_v23 = vsel %vm174_vm7, %v7340_v30, %v171_v22 }
 0x1ba   :  { %194 = vst [vmem:[#allocation3 + $0x28] sm:$0x3] %v180_v23  ;;  %v173_v0 = vpop.permute.xlu0 %172  ;;  %v6388_v23 = vld [vmem:[%s9597_s7 + $0x64] ss:$8 sps:$4 sm:$0xff]  }
 0x1bb   :  { %v181_v3 = vsel %vm174_vm7, %v171_v22, %v173_v0  ;;  %v6383_v22 = vld [vmem:[%s9597_s7 + $0x50] ss:$8 sps:$4 sm:$0xff]   ;;  %v6391_v0 = vld [vmem:[%s9597_s7 + $0x74] ss:$8 sps:$4 sm:$0xff]  }
 0x1bc   :  { %195 = vst [vmem:[#allocation3 + $0x30] sm:$0x3] %v181_v3  ;;  %v327_v2 = vpop.permute.xlu1 %326  ;;  %v6394_v3 = vld [vmem:[%s9597_s7 + $0x84] ss:$8 sps:$4 sm:$0xff]  }
 0x1bd   :  { %v336_v25 = vsel %vm330_vm6, %v325_v55, %v327_v2  ;;  %v1421_v32 = vld [vmem:[#allocation3 + $0x88] sm:$0x3] }
 0x1be   :  { %350 = vst [vmem:[#allocation3 + $0x28] sm:$0xc] %v336_v25  ;;  %5219 = vmatprep.subr.msk.mxu0 %vm115_vm8, %v1421_v32  ;;  %6319 = vmatprep.subr.msk.mxu1 %vm115_vm8, %v1421_v32  ;;  %v485_v60 = vpop.permute.xlu0 %484  ;;  %v6395_v25 = vld [vmem:[%s9597_s7 + $0x90] ss:$8 sps:$4 sm:$0xff]   ;;  %v6400_v32 = vld [vmem:[%s9597_s7 + $0xa4] ss:$8 sps:$4 sm:$0xff]  }
 0x1bf   :  { %5220 = vmatpush1.msk.msra.mxu0 %vm115_vm8, %v1420_v8  ;;  %6321 = vmatpush1.msk.msra.mxu1 %vm115_vm8, %v1420_v8  ;;  %v1422_v7 = vld [vmem:[#allocation3 + $0x90] sm:$0x3]  ;;  %v6403_v8 = vld [vmem:[%s9597_s7 + $0xb4] ss:$8 sps:$4 sm:$0xff]  }
 0x1c0   :  { %v639_v24 = vpop.permute.xlu1 %638  ;;  %5221 = vmatmul.mubr.msk.f32.vlgmr.msra.gmra.mrb[6].mxu0 %vm1425_vm9, %v7264_v41  ;;  %5222 = vmatmul.mubr.msk.f32.vlgmr.msra.gmra.mrb[0].mxu1 %vm1425_vm9, %v7282_v1 }
 0x1c1   :  { %v648_v15 = vsel %vm642_vm1, %v7358_v54, %v639_v24  ;;  %5933 = vmatprep.subr.bf16.mxu1 %v9600_v49  ;;  %1615 = vmatprep.mubr.f32.mxu1 %v7403_v20 }
 0x1c2   :  { %662 = vst [vmem:[#allocation3 + $0x28] sm:$0xc0] %v648_v15  ;;  %1686 = vmatprep.mubr.f32.mxu0 %v7403_v20  ;;  %v917_v26 = vpop.permute.xlu0 %916  ;;  %v6406_v15 = vld [vmem:[%s9597_s7 + $0xc4] ss:$8 sps:$4 sm:$0xff]  }
 0x1c4   :  { %v915_v28 = vpop.permute.xlu1 %914  ;;  %5223 = vmatmul.mubr.msk.f32.gmra.mrb[2].mxu1 %vm1425_vm9, %v7299_v19 }
 0x1c5   :  { %v923_v9 = vsel %vm582_vm4, %v913_v46, %v915_v28  ;;  %v924_v16 = vsel %vm582_vm4, %v915_v28, %v917_v26  ;;  %5883 = vmatprep.mubr.msk.f32.mxu1 %vm6595_vm10, %v7403_v20  ;;  %v6374_v46 = vld [vmem:[%s9597_s7 + $0x20] ss:$8 sps:$4 sm:$0xff]   ;;  %v6409_v28 = vld [vmem:[%s9597_s7 + $0xd4] ss:$8 sps:$4 sm:$0xff]  }
 0x1c6   :  { %937 = vst [vmem:[#allocation3 + $0x60] sm:$0xc] %v923_v9  ;;  %938 = vst [vmem:[#allocation3 + $0x68] sm:$0xc] %v924_v16  ;;  %v1225_v11 = vpop.permute.xlu0 %1224  ;;  %v6404_v26 = vld [vmem:[%s9597_s7 + $0xc0] ss:$8 sps:$4 sm:$0xff]  }
 0x1c7   :  { %v6407_v9 = vld [vmem:[%s9597_s7 + $0xd0] ss:$8 sps:$4 sm:$0xff]   ;;  %v6412_v16 = vld [vmem:[%s9597_s7 + $0xe4] ss:$8 sps:$4 sm:$0xff]  }
 0x1c8   :  { %v483_v44 = vpop.permute.xlu1 %482 }
 0x1c9   :  { %v492_v53 = vsel %vm486_vm3, %v7351_v34, %v483_v44  ;;  %v493_v29 = vsel %vm486_vm3, %v483_v44, %v485_v60  ;;  %v6398_v60 = vld [vmem:[%s9597_s7 + $0xa0] ss:$8 sps:$4 sm:$0xff]  }
 0x1ca   :  { %506 = vst [vmem:[#allocation3 + $0x28] sm:$0x30] %v492_v53  ;;  %507 = vst [vmem:[#allocation3 + $0x30] sm:$0x30] %v493_v29  ;;  %v6410_v29 = vld [vmem:[%s9597_s7 + $0xe0] ss:$8 sps:$4 sm:$0xff]  }
 0x1cc   :  { %v1069_v37 = vpop.permute.xlu1 %1068 }
 0x1cd   :  { %v1077_v30 = vsel %vm426_vm2, %v7365_v62, %v1069_v37 }
 0x1ce   :  { %1091 = vst [vmem:[#allocation3 + $0x60] sm:$0x30] %v1077_v30 }
 0x1d0   :  { %v1223_v10 = vpop.permute.xlu1 %1222 }
 0x1d1   :  { %v1231_v40 = vsel %vm270_vm0, %v1221_v12, %v1223_v10  ;;  %v1232_v45 = vsel %vm270_vm0, %v1223_v10, %v1225_v11  ;;  %v1409_v56 = vld [vmem:[#allocation3 + $0x28] sm:$0xff] }
 0x1d2   :  { %1245 = vst [vmem:[#allocation3 + $0x60] sm:$0xc0] %v1231_v40  ;;  %1246 = vst [vmem:[#allocation3 + $0x68] sm:$0xc0] %v1232_v45  ;;  %v6413_v40 = vld [vmem:[%s9597_s7 + $0xf0] ss:$8 sps:$4 sm:$0xff]  }
 0x1d3   :  { %v6418_v45 = vld [vmem:[%s9597_s7 + $0x104] ss:$8 sps:$4 sm:$0xff]  }
 0x1d4   :  { %v1377_v4 = vpop.permute.xlu1 %1376 }
 0x1d5   :  { %v1385_v63 = vsel %vm113_vm5, %v1375_v6, %v1377_v4  ;;  %v6380_v6 = vld [vmem:[%s9597_s7 + $0x40] ss:$8 sps:$4 sm:$0xff]  }
 0x1d6   :  { %1399 = vst [vmem:[#allocation3 + $0x98] sm:$0x3] %v1385_v63 }
 0x1d8   :  { %v329_v34 = vpop.permute.xlu1 %328 }
 0x1d9   :  { %v337_v36 = vsel %vm330_vm6, %v327_v2, %v329_v34  ;;  %v1416_v58 = vld [vmem:[#allocation3 + $0x60] sm:$0xff]  ;;  %v6392_v2 = vld [vmem:[%s9597_s7 + $0x80] ss:$8 sps:$4 sm:$0xff]  }
 0x1da   :  { %351 = vst [vmem:[#allocation3 + $0x30] sm:$0xc] %v337_v36  ;;  %v5929_v54 = vpack.c.bf16 %v1416_v58, %v1409_v56  ;;  %v6421_v36 = vld [vmem:[%s9597_s7 + $0x114] ss:$8 sps:$4 sm:$0xff]   ;;  %v6419_v56 = vld [vmem:[%s9597_s7 + $0x110] ss:$8 sps:$4 sm:$0xff]  }
 0x1db   :  { %v6424_v58 = vld [vmem:[%s9597_s7 + $0x124] ss:$8 sps:$4 sm:$0xff]  }
 0x1dc   :  { %v641_v38 = vpop.permute.xlu1 %640  ;;  %5930 = vmatprep.subr.bf16.mxu0 %v5929_v54  ;;  %v6422_v54 = vld [vmem:[%s9597_s7 + $0x120] ss:$8 sps:$4 sm:$0xff]  }
 0x1dd   :  { %v649_v35 = vsel %vm642_vm1, %v639_v24, %v641_v38  ;;  %5932 = vmatpush1.bf16.msra.mxu0 %v5931_v43  ;;  %v1423_v62 = vld [vmem:[#allocation3 + $0x98] sm:$0x3]  ;;  %v6401_v24 = vld [vmem:[%s9597_s7 + $0xb0] ss:$8 sps:$4 sm:$0xff]   ;;  %v6430_v38 = vld [vmem:[%s9597_s7 + $0x144] ss:$8 sps:$4 sm:$0xff]  }
 0x1de   :  { %663 = vst [vmem:[#allocation3 + $0x30] sm:$0xc0] %v649_v35  ;;  %5224 = vmatprep.subr.msk.mxu0 %vm115_vm8, %v1423_v62  ;;  %v6425_v43 = vld [vmem:[%s9597_s7 + $0x130] ss:$8 sps:$4 sm:$0xff]   ;;  %v6428_v35 = vld [vmem:[%s9597_s7 + $0x140] ss:$8 sps:$4 sm:$0xff]  }
 0x1df   :  { %v6433_v62 = vld [vmem:[%s9597_s7 + $0x154] ss:$8 sps:$4 sm:$0xff]  }
 0x1e0   :  { %v1071_v59 = vpop.permute.xlu1 %1070 }
 0x1e1   :  { %v1078_v39 = vsel %vm426_vm2, %v1069_v37, %v1071_v59  ;;  %5225 = vmatpush1.msk.msra.mxu0 %vm115_vm8, %v1422_v7  ;;  %v6415_v37 = vld [vmem:[%s9597_s7 + $0xf4] ss:$8 sps:$4 sm:$0xff]   ;;  %v6434_v59 = vld [vmem:[%s9597_s7 + $0x160] ss:$8 sps:$4 sm:$0xff]  }
 0x1e2   :  { %1092 = vst [vmem:[#allocation3 + $0x68] sm:$0x30] %v1078_v39  ;;  %5226 = vmatmul.mubr.msk.f32.vlgmr.msra.gmra.mrb[8].mxu0 %vm1425_vm9, %v7264_v41  ;;  %2534 = vmatprep.subr.bf16.mxu0 %v6370_v27  ;;  %v6431_v27 = vld [vmem:[%s9597_s7 + $0x150] ss:$8 sps:$4 sm:$0xff]   ;;  %v6439_v7 = vld [vmem:[%s9597_s7 + $0x174] ss:$8 sps:$4 sm:$0xff]  }
 0x1e3   :  { %1692 = vmatprep.mubr.f32.mxu0 %v7403_v20  ;;  %2535 = vmatpush1.bf16.msra.mxu0 %v6368_v31  ;;  %v6436_v31 = vld [vmem:[%s9597_s7 + $0x164] ss:$8 sps:$4 sm:$0xff]  }
 0x1e4   :  { %v1379_v55 = vpop.permute.xlu1 %1378  ;;  %2536 = vmatprep.subr.bf16.mxu0 %v6373_v33  ;;  %v6437_v33 = vld [vmem:[%s9597_s7 + $0x170] ss:$8 sps:$4 sm:$0xff]   ;;  %v6442_v39 = vld [vmem:[%s9597_s7 + $0x184] ss:$8 sps:$4 sm:$0xff]  }
 0x1e5   :  { %v1386_v18 = vsel %vm113_vm5, %v1377_v4, %v1379_v55  ;;  %v1410_v21 = vld [vmem:[#allocation3 + $0x30] sm:$0xff]  ;;  %v9602_v4 = vmov 1.0|1.0   ;;  %v6445_v55 = vld [vmem:[%s9597_s7 + $0x194] ss:$8 sps:$4 sm:$0xff]  }
 0x1e6   :  { %1400 = vst [vmem:[#allocation3 + $0xa0] sm:$0x3] %v1386_v18  ;;  %5227 = vmatmul.mubr.msk.f32.gmra.mrb[10].mxu0 %vm1425_vm9, %v7282_v1  ;;  %v6448_v18 = vld [vmem:[%s9597_s7 + $0x1a4] ss:$8 sps:$4 sm:$0xff]  }
 0x1e7   :  { %1698 = vmatprep.mubr.f32.mxu0 %v7403_v20  ;;  %2537 = vmatpush1.bf16.msra.mxu0 %v6371_v51  ;;  %v6440_v51 = vld [vmem:[%s9597_s7 + $0x180] ss:$8 sps:$4 sm:$0xff]  }
 0x1e8   :  { %2538 = vmatprep.subr.bf16.mxu0 %v6376_v47  ;;  %v6443_v47 = vld [vmem:[%s9597_s7 + $0x190] ss:$8 sps:$4 sm:$0xff]  }
 0x1e9   :  { %v1417_v12 = vld [vmem:[#allocation3 + $0x68] sm:$0xff] }
 0x1ea   :  { %v5934_v5 = vpack.c.bf16 %v1417_v12, %v1410_v21  ;;  %5228 = vmatmul.mubr.msk.f32.gmra.mrb[12].mxu0 %vm1425_vm9, %v7299_v19  ;;  %v6449_v21 = vld [vmem:[%s9597_s7 + $0x1b0] ss:$8 sps:$4 sm:$0xff]   ;;  %v6454_v12 = vld [vmem:[%s9597_s7 + $0x1c4] ss:$8 sps:$4 sm:$0xff]  }
 0x1eb   :  { %2539 = vmatpush1.bf16.msra.mxu0 %v6374_v46  ;;  %v6446_v46 = vld [vmem:[%s9597_s7 + $0x1a0] ss:$8 sps:$4 sm:$0xff]  }
 0x1ec   :  { %5935 = vmatpush3.bf16.msra.mxu1 %v5934_v5  ;;  %2540 = vmatprep.subr.bf16.mxu0 %v6379_v17  ;;  %v6451_v17 = vld [vmem:[%s9597_s7 + $0x1b4] ss:$8 sps:$4 sm:$0xff]   ;;  %v6452_v5 = vld [vmem:[%s9597_s7 + $0x1c0] ss:$8 sps:$4 sm:$0xff]  }
 0x1ed   :  { %5881 = vmatprep.subr.mxu1 %v7403_v20  ;;  %v1424_v48 = vld [vmem:[#allocation3 + $0xa0] sm:$0x3] }
 0x1ef   :  { %2541 = vmatpush1.bf16.msra.mxu0 %v6377_v61  ;;  %v6457_v61 = vld [vmem:[%s9597_s7 + $0x1d4] ss:$8 sps:$4 sm:$0xff]  }
 0x1f0   :  { %5882 = vmatpush3.msk.msra.mxu1 %vm115_vm8, %v1424_v48  ;;  %2542 = vmatprep.subr.bf16.mxu0 %v6382_v57  ;;  %v6455_v57 = vld [vmem:[%s9597_s7 + $0x1d0] ss:$8 sps:$4 sm:$0xff]   ;;  %v6460_v48 = vld [vmem:[%s9597_s7 + $0x1e4] ss:$8 sps:$4 sm:$0xff]  }
 0x1f1   :  { %5884 = vmatmul.mubr.msk.f32.vlgmr.msra.gmra.mrb[4].mxu1 %vm1425_vm9, %v7264_v41  ;;  %v6386_v41 = vld [vmem:[%s9597_s7 + $0x60] ss:$8 sps:$4 sm:$0xff]  }
 0x1f2   :  { %5886 = vmatprep.mubr.msk.f32.mxu1 %vm6595_vm10, %v7403_v20 }
 0x1f3   :  { %2543 = vmatpush1.bf16.msra.mxu0 %v6380_v6  ;;  %v6458_v6 = vld [vmem:[%s9597_s7 + $0x1e0] ss:$8 sps:$4 sm:$0xff]  }
 0x1f4   :  { %2544 = vmatprep.subr.bf16.mxu0 %v6385_v42  ;;  %v6463_v42 = vld [vmem:[%s9597_s7 + $0x1f4] ss:$8 sps:$4 sm:$0xff]  }
 0x1f5   :  { %5887 = vmatmul.mubr.msk.f32.gmra.mrb[6].mxu1 %vm1425_vm9, %v7282_v1  ;;  %v6389_v1 = vld [vmem:[%s9597_s7 + $0x70] ss:$8 sps:$4 sm:$0xff]  }
 0x1f6   :  { %5889 = vmatprep.mubr.msk.f32.mxu1 %vm6595_vm10, %v7403_v20 }
 0x1f7   :  { %2545 = vmatpush1.bf16.msra.mxu0 %v6383_v22  ;;  %v6461_v22 = vld [vmem:[%s9597_s7 + $0x1f0] ss:$8 sps:$4 sm:$0xff]  }
 0x1f8   :  { %2546 = vmatprep.subr.bf16.mxu0 %v6388_v23  ;;  %v6466_v23 = vld [vmem:[%s9597_s7 + $0x204] ss:$8 sps:$4 sm:$0xff]  }
 0x1f9   :  { %5890 = vmatmul.mubr.msk.f32.gmra.mrb[8].mxu1 %vm1425_vm9, %v7299_v19  ;;  %v6397_v19 = vld [vmem:[%s9597_s7 + $0x94] ss:$8 sps:$4 sm:$0xff]  }
 0x1fb   :  { %2547 = vmatpush1.bf16.msra.mxu0 %v6386_v41  ;;  %v2777_v41 = vld [vmem:[%s9596_s6] ss:$8 sm:$0x3] }
 0x1fc   :  { %2548 = vmatprep.subr.bf16.mxu0 %v6391_v0  ;;  %v2782_v0 = vrot.slane %v2777_v41, %v6681_v13 }
 0x1fe   :  { %2787 = vrot.lane.b32.xlu0 %v2782_v0, %s6597_s20  ;;  %v6502_v0 = vld [vmem:[%s9597_s7 + $0x2c4] ss:$8 sps:$4 sm:$0xff]  }
 0x1ff   :  { %2549 = vmatpush1.bf16.msra.mxu0 %v6389_v1  ;;  %v5400_v1 = vld [vmem:[%s9596_s6 + $0x1] ss:$8 sm:$0x3] }
 0x200   :  { %2550 = vmatprep.subr.bf16.mxu0 %v6394_v3  ;;  %v2786_v3 = vrot.slane %v2777_v41, %v6684_v14  ;;  %v6497_v41 = vld [vmem:[%s9597_s7 + $0x2b0] ss:$8 sps:$4 sm:$0xff]  }
 0x202   :  { %2789 = vrot.lane.b32.xlu1 %v2786_v3, %s6597_s20  ;;  %v6500_v3 = vld [vmem:[%s9597_s7 + $0x2c0] ss:$8 sps:$4 sm:$0xff]  }
 0x203   :  { %2551 = vmatpush1.bf16.msra.mxu0 %v6392_v2  ;;  %v2866_v2 = vrot.slane %v5400_v1, %v6681_v13 }
 0x204   :  { %2552 = vmatprep.subr.bf16.mxu0 %v6397_v19  ;;  %v2870_v19 = vrot.slane %v5400_v1, %v6684_v14 }
 0x205   :  { %2871 = vrot.lane.b32.xlu0 %v2866_v2, %s6598_s24 }
 0x206   :  { %2873 = vrot.lane.b32.xlu1 %v2870_v19, %s6598_s24  ;;  %v6505_v19 = vld [vmem:[%s9597_s7 + $0x2d4] ss:$8 sps:$4 sm:$0xff]  }
 0x207   :  { %2553 = vmatpush1.bf16.msra.mxu0 %v6395_v25  ;;  %v5401_v25 = vld [vmem:[%s9596_s6 + $0x2] ss:$8 sm:$0x3] }
 0x208   :  { %2554 = vmatprep.subr.bf16.mxu0 %v6400_v32  ;;  %v2966_v32 = vrot.slane %v5401_v25, %v6681_v13 }
 0x20a   :  { %2971 = vrot.lane.b32.xlu0 %v2966_v32, %s6599_s0  ;;  %v6503_v32 = vld [vmem:[%s9597_s7 + $0x2d0] ss:$8 sps:$4 sm:$0xff]  }
 0x20b   :  { %2555 = vmatpush1.bf16.msra.mxu0 %v6398_v60  ;;  %v2970_v60 = vrot.slane %v5401_v25, %v6684_v14 }
 0x20c   :  { %2556 = vmatprep.subr.bf16.mxu0 %v6403_v8  ;;  %v5402_v8 = vld [vmem:[%s9596_s6 + $0x3] ss:$8 sm:$0x3] }
 0x20d   :  { %2973 = vrot.lane.b32.xlu1 %v2970_v60, %s6599_s0 }
 0x20f   :  { %2557 = vmatpush1.bf16.msra.mxu0 %v6401_v24  ;;  %v3050_v24 = vrot.slane %v5402_v8, %v6681_v13 }
 0x210   :  { %2558 = vmatprep.subr.bf16.mxu0 %v6406_v15  ;;  %v3054_v15 = vrot.slane %v5402_v8, %v6684_v14  ;;  %v6508_v8 = vld [vmem:[%s9597_s7 + $0x2e4] ss:$8 sps:$4 sm:$0xff]  }
 0x211   :  { %3055 = vrot.lane.b32.xlu0 %v3050_v24, %s6590_s28 }
 0x212   :  { %3057 = vrot.lane.b32.xlu1 %v3054_v15, %s6590_s28 }
 0x213   :  { %2559 = vmatpush1.bf16.msra.mxu0 %v6404_v26  ;;  %v5404_v26 = vld [vmem:[%s9596_s6 + $0x5] ss:$8 sm:$0x3] }
 0x214   :  { %2560 = vmatprep.subr.bf16.mxu0 %v6409_v28  ;;  %v3182_v28 = vrot.slane %v5404_v26, %v6684_v14 }
 0x215   :  { %v1522_v44 = vpop.f32.mrb[0].mxu0 }
 0x216   :  { %v1524_v53 = vpop.f32.mrb[1].mxu0  ;;  %vm1785_vm11 = vcmp.ge.f32.partialorder %v1522_v44, 1.0  ;;  %3185 = vrot.lane.b32.xlu1 %v3182_v28, %s6585_s22 }
 0x217   :  { %2561 = vmatpush1.bf16.msra.mxu0 %v6407_v9  ;;  %vm1786_vm12 = vcmp.ge.f32.partialorder %v1524_v53, 1.0  ;;  %v3178_v9 = vrot.slane %v5404_v26, %v6681_v13  ;;  %v6506_v26 = vld [vmem:[%s9597_s7 + $0x2e0] ss:$8 sps:$4 sm:$0xff]  }
 0x218   :  { %2562 = vmatprep.subr.bf16.mxu0 %v6412_v16  ;;  %v5405_v16 = vld [vmem:[%s9596_s6 + $0x6] ss:$8 sm:$0x3] }
 0x219   :  { %v1528_v30 = vpop.f32.mrb[2].mxu0  ;;  %3183 = vrot.lane.b32.xlu0 %v3178_v9, %s6585_s22  ;;  %v3275_v10 = vrot.slane %v5405_v16, %v6681_v13  ;;  %v6511_v9 = vld [vmem:[%s9597_s7 + $0x2f4] ss:$8 sps:$4 sm:$0xff]  }
 0x21a   :  { %vm1792_vm13 = vcmp.ge.f32.partialorder %v1528_v30, 1.0  ;;  %v1530_v11 = vpop.f32.mrb[3].mxu0 }
 0x21b   :  { %2563 = vmatpush1.bf16.msra.mxu0 %v6410_v29  ;;  %vm7540_vm14 = vmpackc.low %vm1792_vm13, %vm1785_vm11  ;;  %vm1793_vm15 = vcmp.ge.f32.partialorder %v1530_v11, 1.0  ;;  %v3279_v29 = vrot.slane %v5405_v16, %v6684_v14  ;;  %v6509_v16 = vld [vmem:[%s9597_s7 + $0x2f0] ss:$8 sps:$4 sm:$0xff]  }
 0x21c   :  { %vm5366_vm2 = vmpackc.low %vm1793_vm15, %vm1786_vm12  ;;  %2564 = vmatprep.subr.bf16.mxu0 %v6415_v37  ;;  %v5406_v37 = vld [vmem:[%s9596_s6 + $0x7] ss:$8 sm:$0x3] }
 0x21d   :  { %5367 = vmatprep.mubr.msk.bf16.mxu0 %vm5366_vm2, %v9602_v4  ;;  %v1534_v63 = vpop.f32.mrb[4].mxu0  ;;  %3282 = vrot.lane.b32.xlu1 %v3279_v29, %s6600_s16  ;;  %v6517_v29 = vld [vmem:[%s9597_s7 + $0x314] ss:$8 sps:$4 sm:$0xff]  }
 0x21e   :  { %v1536_v34 = vpop.f32.mrb[5].mxu0  ;;  %vm1799_vm6 = vcmp.ge.f32.partialorder %v1534_v63, 1.0  ;;  %3280 = vrot.lane.b32.xlu0 %v3275_v10, %s6600_s16  ;;  %v6523_v10 = vld [vmem:[%s9597_s7 + $0x334] ss:$8 sps:$4 sm:$0xff]  }
 0x21f   :  { %2565 = vmatpush1.bf16.msra.mxu0 %v6413_v40  ;;  %vm1800_vm3 = vcmp.ge.f32.partialorder %v1536_v34, 1.0  ;;  %vm5372_vm7 = vmpackc.low %vm1799_vm6, %vm1799_vm6  ;;  %v6464_v40 = vld [vmem:[%s9597_s7 + $0x200] ss:$8 sps:$4 sm:$0xff]   ;;  %v3361_v34 = vrot.slane %v5406_v37, %v6684_v14 }
 0x220   :  { %2585 = vmatprep.subr.bf16.mxu0 %v6418_v45  ;;  %vm5370_vm5 = vmpackc.low %vm1800_vm3, %vm1800_vm3  ;;  %v6469_v45 = vld [vmem:[%s9597_s7 + $0x214] ss:$8 sps:$4 sm:$0xff]  }
 0x221   :  { %3364 = vrot.lane.b32.xlu1 %v3361_v34, %s6601_s25  ;;  %v6524_v34 = vld [vmem:[%s9597_s7 + $0x340] ss:$8 sps:$4 sm:$0xff]  }
 0x222   :  { %5369 = vmatmul.mubr.msk.bf16.vlgmr.msra.gmra.mrb[16].mxu0 %vm7540_vm14, %v9602_v4 }
 0x223   :  { %2586 = vmatpush1.bf16.msra.mxu0 %v6416_v52  ;;  %5371 = vmatprep.mubr.msk.bf16.mxu0 %vm5370_vm5, %v9602_v4 }
 0x224   :  { %2587 = vmatprep.subr.bf16.mxu0 %v6421_v36  ;;  %v3357_v36 = vrot.slane %v5406_v37, %v6681_v13  ;;  %v6515_v37 = vld [vmem:[%s9597_s7 + $0x310] ss:$8 sps:$4 sm:$0xff]  }
 0x226   :  { %3362 = vrot.lane.b32.xlu0 %v3357_v36, %s6601_s25  ;;  %v6527_v36 = vld [vmem:[%s9597_s7 + $0x350] ss:$8 sps:$4 sm:$0xff]  }
 0x227   :  { %2588 = vmatpush1.bf16.msra.mxu0 %v6419_v56  ;;  %v5407_v56 = vld [vmem:[%s9596_s6 + $0x10] ss:$8 sm:$0x3] }
 0x228   :  { %2589 = vmatprep.subr.bf16.mxu0 %v6424_v58  ;;  %v6467_v58 = vld [vmem:[%s9597_s7 + $0x210] ss:$8 sps:$4 sm:$0xff]  }
 0x22a   :  { %5373 = vmatmul.mubr.msk.bf16.gmra.mrb[20].mxu0 %vm5372_vm7, %v9602_v4 }
 0x22b   :  { %2590 = vmatpush1.bf16.msra.mxu0 %v6422_v54  ;;  %v6472_v54 = vld [vmem:[%s9597_s7 + $0x224] ss:$8 sps:$4 sm:$0xff]  }
 0x22c   :  { %2591 = vmatprep.subr.bf16.mxu0 %v6427_v50  ;;  %v3458_v50 = vrot.slane %v5407_v56, %v6684_v14 }
 0x22e   :  { %3461 = vrot.lane.b32.xlu1 %v3458_v50, %s6602_s10  ;;  %v6533_v50 = vld [vmem:[%s9597_s7 + $0x370] ss:$8 sps:$4 sm:$0xff]  }
 0x22f   :  { %2592 = vmatpush1.bf16.msra.mxu0 %v6425_v43  ;;  %v3454_v43 = vrot.slane %v5407_v56, %v6681_v13  ;;  %v6532_v56 = vld [vmem:[%s9597_s7 + $0x364] ss:$8 sps:$4 sm:$0xff]  }
 0x230   :  { %2593 = vmatprep.subr.bf16.mxu0 %v6430_v38  ;;  %v6470_v38 = vld [vmem:[%s9597_s7 + $0x220] ss:$8 sps:$4 sm:$0xff]  }
 0x231   :  { %3459 = vrot.lane.b32.xlu0 %v3454_v43, %s6602_s10 }
 0x233   :  { %2594 = vmatpush1.bf16.msra.mxu0 %v6428_v35  ;;  %v6475_v35 = vld [vmem:[%s9597_s7 + $0x234] ss:$8 sps:$4 sm:$0xff]  }
 0x234   :  { %2595 = vmatprep.subr.bf16.mxu0 %v6433_v62  ;;  %v6473_v62 = vld [vmem:[%s9597_s7 + $0x230] ss:$8 sps:$4 sm:$0xff]  }
 0x237   :  { %2596 = vmatpush1.bf16.msra.mxu0 %v6431_v27  ;;  %v6478_v27 = vld [vmem:[%s9597_s7 + $0x244] ss:$8 sps:$4 sm:$0xff]  }
 0x238   :  { %2597 = vmatprep.subr.bf16.mxu0 %v6436_v31  ;;  %v6476_v31 = vld [vmem:[%s9597_s7 + $0x240] ss:$8 sps:$4 sm:$0xff]  }
 0x23b   :  { %2598 = vmatpush1.bf16.msra.mxu0 %v6434_v59  ;;  %v6481_v59 = vld [vmem:[%s9597_s7 + $0x254] ss:$8 sps:$4 sm:$0xff]  }
 0x23c   :  { %2599 = vmatprep.subr.bf16.mxu0 %v6439_v7  ;;  %v6479_v7 = vld [vmem:[%s9597_s7 + $0x250] ss:$8 sps:$4 sm:$0xff]  }
 0x23f   :  { %2600 = vmatpush1.bf16.msra.mxu0 %v6437_v33  ;;  %v6484_v33 = vld [vmem:[%s9597_s7 + $0x264] ss:$8 sps:$4 sm:$0xff]  }
 0x240   :  { %2601 = vmatprep.subr.bf16.mxu0 %v6442_v39  ;;  %v6482_v39 = vld [vmem:[%s9597_s7 + $0x260] ss:$8 sps:$4 sm:$0xff]  }
 0x243   :  { %2602 = vmatpush1.bf16.msra.mxu0 %v6440_v51  ;;  %v6487_v51 = vld [vmem:[%s9597_s7 + $0x274] ss:$8 sps:$4 sm:$0xff]  }
 0x244   :  { %2603 = vmatprep.subr.bf16.mxu0 %v6445_v55  ;;  %v6485_v55 = vld [vmem:[%s9597_s7 + $0x270] ss:$8 sps:$4 sm:$0xff]  }
 0x247   :  { %2604 = vmatpush1.bf16.msra.mxu0 %v6443_v47  ;;  %v6490_v47 = vld [vmem:[%s9597_s7 + $0x284] ss:$8 sps:$4 sm:$0xff]  }
 0x248   :  { %2605 = vmatprep.subr.bf16.mxu0 %v6448_v18  ;;  %v6488_v18 = vld [vmem:[%s9597_s7 + $0x280] ss:$8 sps:$4 sm:$0xff]  }
 0x24b   :  { %2606 = vmatpush1.bf16.msra.mxu0 %v6446_v46 }
 0x24c   :  { %2607 = vmatprep.subr.bf16.mxu0 %v6451_v17  ;;  %v6493_v17 = vld [vmem:[%s9597_s7 + $0x294] ss:$8 sps:$4 sm:$0xff]  }
 0x24f   :  { %2608 = vmatpush1.bf16.msra.mxu0 %v6449_v21 }
 0x250   :  { %2609 = vmatprep.subr.bf16.mxu0 %v6454_v12  ;;  %v6491_v12 = vld [vmem:[%s9597_s7 + $0x290] ss:$8 sps:$4 sm:$0xff]  }
 0x253   :  { %2610 = vmatpush1.bf16.msra.mxu0 %v6452_v5 }
 0x254   :  { %2611 = vmatprep.subr.bf16.mxu0 %v6457_v61  ;;  %v6496_v61 = vld [vmem:[%s9597_s7 + $0x2a4] ss:$8 sps:$4 sm:$0xff]  }
 0x257   :  { %2612 = vmatpush1.bf16.msra.mxu0 %v6455_v57 }
 0x258   :  { %2613 = vmatprep.subr.bf16.mxu0 %v6460_v48 }
 0x25b   :  { %2614 = vmatpush1.bf16.msra.mxu0 %v6458_v6  ;;  %v6494_v6 = vld [vmem:[%s9597_s7 + $0x2a0] ss:$8 sps:$4 sm:$0xff]  }
 0x25c   :  { %2615 = vmatprep.subr.bf16.mxu0 %v6463_v42 }
 0x25f   :  { %2616 = vmatpush1.bf16.msra.mxu0 %v6461_v22  ;;  %v6499_v22 = vld [vmem:[%s9597_s7 + $0x2b4] ss:$8 sps:$4 sm:$0xff]  }
 0x260   :  { %2636 = vmatprep.subr.bf16.mxu0 %v6466_v23 }
 0x270   :  { %v7869_v43 = vpop.permute.xlu0 %2787 }
 0x293   :  { %v1605_v44 = vpop.f32.mrb[6].mxu0  ;;  %v1611_v53 = vpop.f32.mrb[0].mxu1 }
 0x294   :  { %vm1787_vm9 = vcmp.ge.f32.partialorder %v1605_v44, 1.0  ;;  %vm1794_vm11 = vcmp.ge.f32.partialorder %v1611_v53, 1.0  ;;  %v1607_v30 = vpop.f32.mrb[7].mxu0  ;;  %v1613_v11 = vpop.f32.mrb[1].mxu1  ;;  %v6514_v44 = vld [vmem:[%s9597_s7 + $0x304] ss:$8 sps:$4 sm:$0xff]  }
 0x295   :  { %vm5376_vm12 = vmpackc.low %vm1794_vm11, %vm1787_vm9  ;;  %vm1788_vm13 = vcmp.ge.f32.partialorder %v1607_v30, 1.0  ;;  %vm1795_vm14 = vcmp.ge.f32.partialorder %v1613_v11, 1.0  ;;  %v6512_v53 = vld [vmem:[%s9597_s7 + $0x300] ss:$8 sps:$4 sm:$0xff]   ;;  %v6520_v30 = vld [vmem:[%s9597_s7 + $0x324] ss:$8 sps:$4 sm:$0xff]  }
 0x296   :  { %vm5374_vm15 = vmpackc.low %vm1795_vm14, %vm1788_vm13  ;;  %v6518_v11 = vld [vmem:[%s9597_s7 + $0x320] ss:$8 sps:$4 sm:$0xff]  }
 0x297   :  { %5375 = vmatprep.mubr.msk.bf16.mxu0 %vm5374_vm15, %v9602_v4  ;;  %v1617_v63 = vpop.f32.mrb[2].mxu1 }
 0x298   :  { %5377 = vmatmul.mubr.msk.bf16.vlgmr.msra.gmra.mrb[16].mxu0 %vm5376_vm12, %v9602_v4  ;;  %v1619_v52 = vpop.f32.mrb[3].mxu1  ;;  %vm1801_vm3 = vcmp.ge.f32.partialorder %v1617_v63, 1.0  ;;  %v6526_v63 = vld [vmem:[%s9597_s7 + $0x344] ss:$8 sps:$4 sm:$0xff]  }
 0x299   :  { %2637 = vmatpush1.bf16.msra.mxu0 %v6464_v40  ;;  %vm1802_vm2 = vcmp.ge.f32.partialorder %v1619_v52, 1.0  ;;  %vm5380_vm6 = vmpackc.low %vm1801_vm3, %vm1801_vm3  ;;  %v6521_v40 = vld [vmem:[%s9597_s7 + $0x330] ss:$8 sps:$4 sm:$0xff]   ;;  %v6529_v52 = vld [vmem:[%s9597_s7 + $0x354] ss:$8 sps:$4 sm:$0xff]  }
 0x29a   :  { %2638 = vmatprep.subr.bf16.mxu0 %v6469_v45  ;;  %vm5378_vm5 = vmpackc.low %vm1802_vm2, %vm1802_vm2  ;;  %v6603_v45 = vmov 0  }
 0x29b   :  { %5379 = vmatprep.mubr.msk.bf16.mxu0 %vm5378_vm5, %v9602_v4 }
 0x29d   :  { %2639 = vmatpush1.bf16.msra.mxu0 %v6467_v58  ;;  %v6530_v58 = vld [vmem:[%s9597_s7 + $0x360] ss:$8 sps:$4 sm:$0xff]  }
 0x29e   :  { %2640 = vmatprep.subr.bf16.mxu0 %v6472_v54  ;;  %v6535_v54 = vld [vmem:[%s9597_s7 + $0x374] ss:$8 sps:$4 sm:$0xff]  }
 0x2a0   :  { %5381 = vmatmul.mubr.msk.bf16.gmra.mrb[20].mxu0 %vm5380_vm6, %v9602_v4 }
 0x2a1   :  { %2641 = vmatpush1.bf16.msra.mxu0 %v6470_v38  ;;  %v7871_v38 = vpop.permute.xlu1 %2789 }
 0x2a2   :  { %2642 = vmatprep.subr.bf16.mxu0 %v6475_v35  ;;  %v2774_v35 = vld [vmem:[#allocation4 + $0x40] sm:$0xf] }
 0x2a5   :  { %2643 = vmatpush1.bf16.msra.mxu0 %v6473_v62  ;;  %v2799_v62 = vmul.f32 %v7403_v20, %v7869_v43 }
 0x2a6   :  { %2644 = vmatprep.subr.bf16.mxu0 %v6478_v27  ;;  %v2857_v27 = vld [vmem:[#allocation4 + $0x40] sm:$0xf] }
 0x2a7   :  { %2820 = vrot.lane.b32.xlu1 %v2799_v62, %s6602_s10  ;;  %2814 = vrot.lane.b32.xlu0 %v2799_v62, %s6602_s10 }
 0x2a9   :  { %2645 = vmatpush1.bf16.msra.mxu0 %v6476_v31  ;;  %v2802_v31 = vmul.f32 %v7869_v43, %v2774_v35  ;;  %v7979_v35 = vld [vmem:[#allocation4] sm:$0xff] }
 0x2aa   :  { %2646 = vmatprep.subr.bf16.mxu0 %v6481_v59  ;;  %v7880_v59 = vpop.permute.xlu0 %2871 }
 0x2ab   :  { %2826 = vrot.lane.b32.xlu0 %v2802_v31, %s6602_s10 }
 0x2ad   :  { %2647 = vmatpush1.bf16.msra.mxu0 %v6479_v7  ;;  %v7882_v7 = vpop.permute.xlu1 %2873 }
 0x2ae   :  { %2648 = vmatprep.subr.bf16.mxu0 %v6484_v33  ;;  %v2880_v33 = vmul.f32 %v7403_v20, %v7880_v59 }
 0x2b1   :  { %2649 = vmatpush1.bf16.msra.mxu0 %v6482_v39  ;;  %v2886_v39 = vmul.f32 %v7880_v59, %v2857_v27 }
 0x2b2   :  { %2650 = vmatprep.subr.bf16.mxu0 %v6487_v51  ;;  %v2899_v51 = vrot.slane %v2880_v33, 4 }
 0x2b4   :  { %2914 = vrot.lane.b32.xlu1 %v2899_v51, %s6601_s25  ;;  %2920 = vrot.lane.b32.xlu0 %v2899_v51, %s6601_s25 }
 0x2b5   :  { %2651 = vmatpush1.bf16.msra.mxu0 %v6485_v55  ;;  %v1688_v46 = vpop.f32.mrb[8].mxu0  ;;  %v2908_v55 = vrot.slane %v2886_v39, 4 }
 0x2b6   :  { %2652 = vmatprep.subr.bf16.mxu0 %v6490_v47  ;;  %v1690_v21 = vpop.f32.mrb[9].mxu0  ;;  %vm1789_vm7 = vcmp.ge.f32.partialorder %v1688_v46, 1.0  ;;  %v7889_v47 = vpop.permute.xlu0 %2971 }
 0x2b7   :  { %vm1790_vm9 = vcmp.ge.f32.partialorder %v1690_v21, 1.0 }
 0x2b9   :  { %2653 = vmatpush1.bf16.msra.mxu0 %v6488_v18  ;;  %v1694_v5 = vpop.f32.mrb[10].mxu0  ;;  %v7891_v18 = vpop.permute.xlu1 %2973 }
 0x2ba   :  { %2654 = vmatprep.subr.bf16.mxu0 %v6493_v17  ;;  %vm1796_vm11 = vcmp.ge.f32.partialorder %v1694_v5, 1.0  ;;  %v1696_v57 = vpop.f32.mrb[11].mxu0  ;;  %v3041_v17 = vld [vmem:[#allocation4 + $0x40] sm:$0xf]  ;;  %v7897_v21 = vpop.permute.xlu0 %3055 }
 0x2bb   :  { %vm7772_vm12 = vmpackc.low %vm1796_vm11, %vm1789_vm7  ;;  %vm1797_vm13 = vcmp.ge.f32.partialorder %v1696_v57, 1.0  ;;  %v2957_v5 = vld [vmem:[#allocation4 + $0x40] sm:$0xf]  ;;  %v3063_v57 = vmul.f32 %v7403_v20, %v7897_v21  ;;  %v3069_v48 = vmul.f32 %v7897_v21, %v3041_v17 }
 0x2bc   :  { %vm5382_vm14 = vmpackc.low %vm1797_vm13, %vm1790_vm9 }
 0x2bd   :  { %2655 = vmatpush1.bf16.msra.mxu0 %v6491_v12  ;;  %5383 = vmatprep.mubr.msk.bf16.mxu0 %vm5382_vm14, %v9602_v4  ;;  %v1700_v42 = vpop.f32.mrb[12].mxu0  ;;  %v7899_v12 = vpop.permute.xlu1 %3057  ;;  %vm2791_vm14 = vcmask 924672  }
 0x2be   :  { %2656 = vmatprep.subr.bf16.mxu0 %v6496_v61  ;;  %v1702_v23 = vpop.f32.mrb[13].mxu0  ;;  %vm1803_vm7 = vcmp.ge.f32.partialorder %v1700_v42, 1.0  ;;  %v2980_v61 = vmul.f32 %v7403_v20, %v7889_v47  ;;  %v3081_v42 = vrot.slane %v3063_v57, 4  ;;  %v8009_v39 = vsel %vm582_vm4, %v7897_v21, %v7899_v12 }
 0x2bf   :  { %vm1804_vm5 = vcmp.ge.f32.partialorder %v1702_v23, 1.0  ;;  %vm5388_vm9 = vmpackc.low %vm1803_vm7, %vm1803_vm7 }
 0x2c0   :  { %vm5386_vm6 = vmpackc.low %vm1804_vm5, %vm1804_vm5  ;;  %2998 = vrot.lane.b32.xlu0 %v2980_v61, %s6600_s16  ;;  %vm2932_vm5 = vcmask 113664  }
 0x2c1   :  { %2657 = vmatpush1.bf16.msra.mxu0 %v6494_v6  ;;  %v2986_v6 = vmul.f32 %v7889_v47, %v2957_v5  ;;  %v7911_v23 = vpop.permute.xlu1 %3185 }
 0x2c2   :  { %2658 = vmatprep.subr.bf16.mxu0 %v6499_v22  ;;  %v3090_v22 = vrot.slane %v3069_v48, 4 }
 0x2c4   :  { %v1771_v1 = vpop.f32.mrb[4].mxu1  ;;  %3010 = vrot.lane.b32.xlu0 %v2986_v6, %s6600_s16 }
 0x2c5   :  { %2659 = vmatpush1.bf16.msra.mxu0 %v6497_v41  ;;  %v5885_v2 = vpop.f32.mrb[5].mxu1  ;;  %vm1791_vm15 = vcmp.ge.f32.partialorder %v1771_v1, 1.0  ;;  %v3193_v41 = vmul.f32 %v7403_v20, %v7911_v23  ;;  %v3171_v1 = vld [vmem:[#allocation4 + $0x58] sm:$0xf] }
 0x2c6   :  { %2660 = vmatprep.subr.bf16.mxu0 %v6502_v0  ;;  %v3199_v2 = vmul.f32 %v7911_v23, %v3171_v1 }
 0x2c8   :  { %v1776_v25 = vpop.f32.mrb[6].mxu1  ;;  %3102 = vrot.lane.b32.xlu0 %v3081_v42, %s6585_s22 }
 0x2c9   :  { %2661 = vmatpush1.bf16.msra.mxu0 %v6500_v3  ;;  %vm1798_vm2 = vcmp.ge.f32.partialorder %v1776_v25, 1.0  ;;  %v5888_v60 = vpop.f32.mrb[7].mxu1  ;;  %v3211_v3 = vrot.slane %v3193_v41, 4 }
 0x2ca   :  { %2662 = vmatprep.subr.bf16.mxu0 %v6505_v19  ;;  %vm7801_vm3 = vmpackc.low %vm1798_vm2, %vm1791_vm15  ;;  %v3222_v19 = vrot.slane %v3199_v2, 4  ;;  %vm2875_vm2 = vcmask 932864  }
 0x2cc   :  { %v7805_v15 = vpop.f32.mrb[8].mxu1 }
 0x2cd   :  { %2663 = vmatpush1.bf16.msra.mxu0 %v6503_v32  ;;  %v5891_v28 = vpop.f32.mrb[9].mxu1  ;;  %vm1805_vm11 = vcmp.ge.f32.partialorder %v7805_v15, 1.0  ;;  %v3283_v32 = vpop.permute.xlu1 %3282 }
 0x2ce   :  { %2664 = vmatprep.subr.bf16.mxu0 %v6508_v8  ;;  %vm5392_vm13 = vmpackc.low %vm1805_vm11, %vm1805_vm11  ;;  %v3290_v60 = vmul.f32 %v7403_v20, %v3283_v32  ;;  %v3268_v8 = vld [vmem:[#allocation4 + $0x58] sm:$0xf]  ;;  %vm3016_vm11 = vcmask 105472  }
 0x2cf   :  { %v3296_v24 = vmul.f32 %v3283_v32, %v3268_v8 }
 0x2d1   :  { %2665 = vmatpush1.bf16.msra.mxu0 %v6506_v26  ;;  %v3365_v15 = vpop.permute.xlu1 %3364 }
 0x2d2   :  { %2666 = vmatprep.subr.bf16.mxu0 %v6511_v9  ;;  %v3372_v26 = vmul.f32 %v7403_v20, %v3365_v15  ;;  %v3350_v9 = vld [vmem:[#allocation4 + $0x58] sm:$0xf] }
 0x2d4   :  { %v7929_v28 = vrot.slane %v3372_v26, 4 }
 0x2d5   :  { %2667 = vmatpush1.bf16.msra.mxu0 %v6509_v16  ;;  %v3378_v16 = vmul.f32 %v3365_v15, %v3350_v9 }
 0x2d6   :  { %2687 = vmatprep.subr.bf16.mxu0 %v6514_v44 }
 0x2d7   :  { %v3401_v44 = vrot.slane %v3378_v16, 4 }
 0x2d8   :  { %5385 = vmatmul.mubr.msk.bf16.vlgmr.msra.gmra.mrb[16].mxu0 %vm7772_vm12, %v9602_v4  ;;  %vm2898_vm12 = vcmask 1043456  }
 0x2d9   :  { %2688 = vmatpush1.bf16.msra.mxu0 %v6512_v53  ;;  %5387 = vmatprep.mubr.msk.bf16.mxu0 %vm5386_vm6, %v9602_v4  ;;  %v2909_v46 = vsel %vm2898_vm12, %v2899_v51, %v2908_v55  ;;  %v3091_v0 = vsel %vm2898_vm12, %v3081_v42, %v3090_v22  ;;  %v3223_v25 = vsel %vm2898_vm12, %v3211_v3, %v3222_v19  ;;  %vm2975_vm6 = vcmask 941056  }
 0x2da   :  { %2689 = vmatprep.subr.bf16.mxu0 %v6517_v29  ;;  %2926 = vrot.lane.b32.xlu1 %v2909_v46, %s6601_s25  ;;  %v7936_v53 = vsel %vm2898_vm12, %v7929_v28, %v3401_v44  ;;  %v7938_v29 = vpop.permute.xlu0 %3183  ;;  %v7996_v27 = vsel %vm2975_vm6, %v7889_v47, %v7891_v18 }
 0x2db   :  { %v8022_v47 = vsel %vm642_vm1, %v7938_v29, %v7911_v23 }
 0x2dd   :  { %2690 = vmatpush1.bf16.msra.mxu0 %v6515_v37  ;;  %v5403_v37 = vld [vmem:[%s9596_s6 + $0x4] ss:$8 sm:$0x3] }
 0x2de   :  { %2691 = vmatprep.subr.bf16.mxu0 %v6520_v30  ;;  %3004 = vrot.lane.b32.xlu1 %v2980_v61, %s6600_s16  ;;  %v7943_v30 = vpop.permute.xlu0 %3280 }
 0x2df   :  { %v8026_v46 = vsel %vm3016_vm11, %v7943_v30, %v3283_v32 }
 0x2e0   :  { %5389 = vmatmul.mubr.msk.bf16.gmra.mrb[20].mxu0 %vm5388_vm9, %v9602_v4 }
 0x2e1   :  { %2692 = vmatpush1.bf16.msra.mxu0 %v6518_v11  ;;  %2719 = vmatprep.mubr.bf16.mxu0 %v6603_v45  ;;  %v7946_v11 = vrot.slane %v5403_v37, %v6681_v13 }
 0x2e2   :  { %2693 = vmatprep.subr.bf16.mxu0 %v6523_v10  ;;  %3096 = vrot.lane.b32.xlu1 %v3081_v42, %s6585_s22 }
 0x2e5   :  { %2694 = vmatpush1.bf16.msra.mxu0 %v6521_v40  ;;  %v7949_v40 = vrot.slane %v5403_v37, %v6684_v14 }
 0x2e6   :  { %2695 = vmatprep.subr.bf16.mxu0 %v6526_v63  ;;  %3108 = vrot.lane.b32.xlu1 %v3091_v0, %s6585_s22 }
 0x2e9   :  { %2696 = vmatpush1.bf16.msra.mxu0 %v6524_v34 }
 0x2ea   :  { %2697 = vmatprep.subr.bf16.mxu0 %v6529_v52  ;;  %3228 = vrot.lane.b32.xlu1 %v3211_v3, %s6590_s28 }
 0x2ed   :  { %2698 = vmatpush1.bf16.msra.mxu0 %v6527_v36  ;;  %v7964_v36 = vsel %vm2791_vm14, %v7869_v43, %v7871_v38 }
 0x2ee   :  { %2699 = vmatprep.subr.bf16.mxu0 %v6532_v56  ;;  %3234 = vrot.lane.b32.xlu1 %v3211_v3, %s6590_s28 }
 0x2f1   :  { %2700 = vmatpush1.bf16.msra.mxu0 %v6530_v58 }
 0x2f2   :  { %2701 = vmatprep.subr.bf16.mxu0 %v6535_v54  ;;  %3240 = vrot.lane.b32.xlu1 %v3223_v25, %s6590_s28  ;;  %v7973_v54 = vpop.permute.xlu0 %3362 }
 0x2f3   :  { %v7986_v62 = vsel %vm2932_vm5, %v7973_v54, %v3365_v15 }
 0x2f5   :  { %2702 = vmatpush1.bf16.msra.mxu0 %v6533_v50 }
 0x2f6   :  { %3310 = vrot.lane.b32.xlu1 %v3290_v60, %s6599_s0 }
 0x2f8   :  { %5391 = vmatmul.mubr.msk.bf16.vlgmr.msra.gmra.mrb[16].mxu0 %vm7801_vm3, %v9602_v4 }
 0x2f9   :  { %2729 = vmatprep.mubr.bf16.mxu0 %v6603_v45 }
 0x2fa   :  { %3316 = vrot.lane.b32.xlu1 %v3290_v60, %s6599_s0 }
 0x2fe   :  { %3322 = vrot.lane.b32.xlu1 %v3296_v24, %s6599_s0 }
 0x300   :  { %5393 = vmatmul.mubr.msk.bf16.gmra.mrb[20].mxu0 %vm5392_vm13, %v9602_v4 }
 0x302   :  { %3407 = vrot.lane.b32.xlu1 %v7929_v28, %s6598_s24 }
 0x3cb   :  { %v2721_v10 = vpop.f32.mrb[16].mxu0 }
 0x3cc   :  { %vm2738_vm15 = vcmp.ge.f32.partialorder %v2721_v10, 0.5  ;;  %v2723_v45 = vpop.f32.mrb[17].mxu0 }
 0x3cd   :  { %v7952_v63 = vsel %vm2738_vm15, 1.0, %v7403_v20  ;;  %vm2739_vm3 = vcmp.ge.f32.partialorder %v2723_v45, 0.5  ;;  %v2725_v34 = vpop.f32.mrb[18].mxu0 }
 0x3ce   :  { %v7956_v52 = vmul.f32 %v7952_v63, %v7946_v11  ;;  %v7959_v13 = vsel %vm2739_vm3, 1.0, %v7403_v20  ;;  %vm2740_vm7 = vcmp.ge.f32.partialorder %v2725_v34, 0.5  ;;  %v2727_v14 = vpop.f32.mrb[19].mxu0  ;;  %v2981_v51 = vmul.f32 %v7952_v63, %v7996_v27 }
 0x3cf   :  { %v7968_v56 = vmul.f32 %v7959_v13, %v7949_v40  ;;  %v7971_v58 = vsel %vm2740_vm7, 1.0, %v7403_v20  ;;  %vm2741_vm9 = vcmp.ge.f32.partialorder %v2727_v14, 0.5  ;;  %v7991_v20 = vsel %vm2875_vm2, %v7880_v59, %v7882_v7 }
 0x3d0   :  { %v7977_v50 = vmul.f32 %v7971_v58, %v7946_v11  ;;  %v7982_v43 = vsel %vm2741_vm9, 1.0, %v7979_v35  ;;  %v8013_v59 = vmul.f32 %v7952_v63, %v7973_v54  ;;  %v2797_v55 = vmul.f32 %v7952_v63, %v7964_v36  ;;  %3000 = vrot.lane.b32.xlu1 %v2981_v51, %s6600_s16 }
 0x3d1   :  { %v8000_v31 = vmul.f32 %v7982_v43, %v7949_v40  ;;  %v8004_v33 = vmul.f32 %v7982_v43, %v7986_v62  ;;  %v8030_v17 = vmul.f32 %v7971_v58, %v7973_v54  ;;  %v2984_v5 = vmul.f32 %v7971_v58, %v7996_v27 }
 0x3d2   :  { %2816 = vrot.lane.b32.xlu0 %v2797_v55, %s6602_s10  ;;  %v2800_v57 = vmul.f32 %v7971_v58, %v7964_v36  ;;  %v8040_v48 = vmul.f32 %v7952_v63, %v8009_v39  ;;  %v8044_v6 = vmul.f32 %v7952_v63, %v7991_v20  ;;  %v3288_v42 = vmul.f32 %v7952_v63, %v7943_v30 }
 0x3d3   :  { %v2731_v21 = vpop.f32.mrb[20].mxu0  ;;  %v8051_v41 = vmul.f32 %v7952_v63, %v7938_v29  ;;  %v3388_v0 = vrot.slane %v8013_v59, 4  ;;  %v2982_v2 = vmul.f32 %v7959_v13, %v7891_v18  ;;  %v8059_v19 = vmul.f32 %v7959_v13, %v7882_v7 }
 0x3d4   :  { %vm2742_vm13 = vcmp.ge.f32.partialorder %v2731_v21, 0.5  ;;  %v2733_v61 = vpop.f32.mrb[21].mxu0  ;;  %v2798_v25 = vmul.f32 %v7959_v13, %v7871_v38  ;;  %v3289_v32 = vmul.f32 %v7959_v13, %v8026_v46  ;;  %v8067_v60 = vmul.f32 %v7971_v58, %v7938_v29  ;;  %3306 = vrot.lane.b32.xlu1 %v3288_v42, %s6599_s0 }
 0x3d5   :  { %v5398_v22 = vsel %vm2742_vm13, 1.0, %v7979_v35  ;;  %vm2743_vm15 = vcmp.ge.f32.partialorder %v2733_v61, 0.5  ;;  %v2735_v23 = vpop.f32.mrb[22].mxu0  ;;  %v8071_v8 = vmul.f32 %v7959_v13, %v7899_v12  ;;  %v3391_v24 = vrot.slane %v8030_v17, 4  ;;  %v3447_v17 = vld [vmem:[#allocation4 + $0x58] sm:$0xf] }
 0x3d6   :  { %2766 = vst [vmem:[#allocation4 + $0x48] sm:$0xf] %v5398_v22  ;;  %v5399_v1 = vsel %vm2743_vm15, 1.0, %v7979_v35  ;;  %v2736_v3 = vpop.f32.mrb[23].mxu0  ;;  %3002 = vrot.lane.b32.xlu0 %v2982_v2, %s6600_s16  ;;  %v8078_v15 = vmul.f32 %v7982_v43, %v7882_v7  ;;  %v8082_v26 = vmul.f32 %v7959_v13, %v8022_v47  ;;  %v8086_v9 = vmul.f32 %v7982_v43, %v7899_v12 }
 0x3d7   :  { %2767 = vst [vmem:[#allocation4 + $0x50] sm:$0xf] %v5399_v1  ;;  %v3209_v16 = vrot.slane %v8051_v41, 4  ;;  %v2901_v44 = vrot.slane %v8059_v19, 4  ;;  %v3212_v37 = vrot.slane %v8067_v60, 4  ;;  %v8093_v10 = vmul.f32 %v7959_v13, %v7986_v62 }
 0x3d8   :  { %v3083_v45 = vrot.slane %v8071_v8, 4  ;;  %v9604_v34 = vrot.slane %v8078_v15, 4  ;;  %v3088_v14 = vrot.slane %v8086_v9, 4  ;;  %v2884_v51 = vmul.f32 %v7971_v58, %v7991_v20  ;;  %2818 = vrot.lane.b32.xlu1 %v2798_v25, %s6602_s10 }
 0x3d9   :  { %v2900_v55 = vrot.slane %v8044_v6, 4  ;;  %v3213_v21 = vsel %vm2898_vm12, %v3209_v16, %v3212_v37  ;;  %v3067_v61 = vmul.f32 %v7971_v58, %v8009_v39  ;;  %v3195_v42 = vmul.f32 %v7982_v43, %v8022_v47 }
 0x3da   :  { %3308 = vrot.lane.b32.xlu0 %v3289_v32, %s6599_s0  ;;  %v2907_v22 = vsel %vm2898_vm12, %v2901_v44, %v9604_v34  ;;  %v3089_v6 = vsel %vm2898_vm12, %v3083_v45, %v3088_v14  ;;  %v2904_v23 = vrot.slane %v2884_v51, 4  ;;  %v3393_v41 = vrot.slane %v8004_v33, 4 }
 0x3db   :  { %v8122_v3 = vsel %vm2898_vm12, %v3388_v0, %v3391_v24  ;;  %v3389_v32 = vrot.slane %v8093_v10, 4  ;;  %v3082_v49 = vrot.slane %v8040_v48, 4  ;;  %v3086_v34 = vrot.slane %v3067_v61, 4 }
 0x3dc   :  { %v2905_v8 = vsel %vm2898_vm12, %v2900_v55, %v2904_v23  ;;  %3006 = vrot.lane.b32.xlu1 %v2984_v5, %s6600_s16  ;;  %vm2832_vm3 = vcmask 121856   ;;  %vm3577_vm7 = vcmask 424960  }
 0x3dd   :  { %v3136_v1 = vld [vmem:[#allocation4 + $0x48] sm:$0xf]  ;;  %v8136_v10 = vsel %vm2898_vm12, %v3389_v32, %v3393_v41 }
 0x3de   :  { %v3155_v19 = vmul.f32 %v7946_v11, %v3136_v1  ;;  %v3137_v25 = vld [vmem:[#allocation4 + $0x50] sm:$0xf]  ;;  %v2858_v51 = vld [vmem:[#allocation4 + $0x48] sm:$0xf]  ;;  %2822 = vrot.lane.b32.xlu0 %v2800_v57, %s6602_s10  ;;  %v3210_v11 = vrot.slane %v8082_v26, 4  ;;  %v3214_v1 = vrot.slane %v3195_v42, 4  ;;  %v5958_v57 = vpack.c.bf16 %v7977_v50, %v7956_v52 }
 0x3df   :  { %v3156_v33 = vmul.f32 %v7949_v40, %v3137_v25  ;;  %v2887_v4 = vmul.f32 %v7991_v20, %v2858_v51  ;;  %v3087_v40 = vsel %vm2898_vm12, %v3082_v49, %v3086_v34  ;;  %v3042_v25 = vld [vmem:[#allocation4 + $0x48] sm:$0xf]  ;;  %v3349_v5 = vld [vmem:[#allocation4 + $0x50] sm:$0xf]  ;;  %v2801_v51 = vmul.f32 %v7982_v43, %v7871_v38 }
 0x3e0   :  { %3161 = vst [vmem:[#allocation5 + $0xc0] sm:$0xf] %v3155_v19  ;;  %v3215_v48 = vsel %vm2898_vm12, %v3210_v11, %v3214_v1  ;;  %v3070_v20 = vmul.f32 %v8009_v39, %v3042_v25  ;;  %v3170_v19 = vld [vmem:[#allocation4 + $0x50] sm:$0xf]  ;;  %3098 = vrot.lane.b32.xlu1 %v3082_v49, %s6585_s22 }
 0x3e1   :  { %3162 = vst [vmem:[#allocation5 + $0xc8] sm:$0xf] %v3156_v33  ;;  %v2910_v2 = vrot.slane %v2887_v4, 4  ;;  %v3377_v4 = vmul.f32 %v7986_v62, %v3349_v5  ;;  %v3198_v42 = vmul.f32 %v8022_v47, %v3170_v19  ;;  %v2985_v62 = vmul.f32 %v7982_v43, %v7891_v18  ;;  %v8167_v47 = vpop.permute.xlu1 %3461  ;;  %v3266_v33 = vld [vmem:[#allocation4 + $0x48] sm:$0xf]  ;;  %v3460_v5 = vpop.permute.xlu0 %3459 }
 0x3e2   :  { %2916 = vrot.lane.b32.xlu0 %v2900_v55, %s6601_s25  ;;  %v3092_v26 = vrot.slane %v3070_v20, 4  ;;  %v2959_v20 = vld [vmem:[#allocation4 + $0x50] sm:$0xf]  ;;  %v3467_v60 = vmul.f32 %v7952_v63, %v3460_v5 }
 0x3e3   :  { %v2911_v61 = vsel %vm2898_vm12, %v2904_v23, %v2910_v2  ;;  %v3399_v23 = vrot.slane %v3377_v4, 4  ;;  %v3220_v2 = vrot.slane %v3198_v42, 4 }
 0x3e4   :  { %v8151_v39 = vsel %vm2898_vm12, %v3086_v34, %v3092_v26  ;;  %2824 = vrot.lane.b32.xlu1 %v2801_v51, %s6602_s10  ;;  %v2958_v34 = vld [vmem:[#allocation4 + $0x48] sm:$0xf] }
 0x3e5   :  { %v8156_v49 = vsel %vm2898_vm12, %v3393_v41, %v3399_v23  ;;  %v8159_v55 = vsel %vm2898_vm12, %v3214_v1, %v3220_v2  ;;  %v2776_v41 = vld [vmem:[#allocation4 + $0x50] sm:$0xf]  ;;  %v2815_v23 = vpop.permute.xlu0 %2814  ;;  %v3445_v2 = vld [vmem:[#allocation4 + $0x48] sm:$0xf] }
 0x3e6   :  { %3224 = vrot.lane.b32.xlu0 %v3209_v16, %s6590_s28  ;;  %v3292_v16 = vmul.f32 %v7982_v43, %v8026_v46 }
 0x3e8   :  { %2918 = vrot.lane.b32.xlu1 %v2901_v44, %s6601_s25  ;;  %v8175_v44 = vpop.permute.xlu1 %2820 }
 0x3e9   :  { %v8251_v63 = vpop.permute.xlu0 %2826 }
 0x3ea   :  { %3008 = vrot.lane.b32.xlu0 %v2985_v62, %s6600_s16  ;;  %v3348_v62 = vld [vmem:[#allocation4 + $0x48] sm:$0xf] }
 0x3ec   :  { %3230 = vrot.lane.b32.xlu1 %v3213_v21, %s6590_s28  ;;  %v2987_v21 = vmul.f32 %v7996_v27, %v2958_v34  ;;  %v3376_v34 = vmul.f32 %v7973_v54, %v3348_v62  ;;  %v3469_v54 = vmul.f32 %v7979_v35, %v8167_v47  ;;  %v3475_v35 = vmul.f32 %v8167_v47, %v3447_v17 }
 0x3ed   :  { %v8256_v59 = vpop.permute.xlu0 %2920 }
 0x3ee   :  { %3100 = vrot.lane.b32.xlu0 %v3083_v45, %s6585_s22  ;;  %v2804_v45 = vmul.f32 %v7871_v38, %v2776_v41  ;;  %v2775_v38 = vld [vmem:[#allocation4 + $0x48] sm:$0xf] }
 0x3f0   :  { %2924 = vrot.lane.b32.xlu1 %v2907_v22, %s6601_s25  ;;  %v8181_v22 = vpop.permute.xlu1 %2914 }
 0x3f1   :  { %v2999_v41 = vpop.permute.xlu0 %2998 }
 0x3f2   :  { %3226 = vrot.lane.b32.xlu0 %v3210_v11, %s6590_s28 }
 0x3f4   :  { %3106 = vrot.lane.b32.xlu1 %v3089_v6, %s6585_s22  ;;  %v3043_v6 = vld [vmem:[#allocation4 + $0x50] sm:$0xf]  ;;  %v8188_v27 = vpop.permute.xlu1 %2926 }
 0x3f5   :  { %v3071_v11 = vmul.f32 %v7899_v12, %v3043_v6  ;;  %v3470_v6 = vmul.f32 %v7971_v58, %v3460_v5 }
 0x3f6   :  { %3314 = vrot.lane.b32.xlu0 %v3292_v16, %s6599_s0 }
 0x3f7   :  { %v3094_v1 = vrot.slane %v3071_v11, 4 }
 0x3f8   :  { %3012 = vrot.lane.b32.xlu1 %v2987_v21, %s6600_s16  ;;  %v8194_v25 = vpop.permute.xlu1 %3004 }
 0x3f9   :  { %v3095_v12 = vsel %vm2898_vm12, %v3088_v14, %v3094_v1  ;;  %v3463_v14 = vsel %vm2832_vm3, %v3460_v5, %v8167_v47 }
 0x3fa   :  { %3405 = vrot.lane.b32.xlu0 %v3389_v32, %s6598_s24  ;;  %v3294_v32 = vmul.f32 %v7943_v30, %v3266_v33  ;;  %v3468_v26 = vmul.f32 %v7959_v13, %v3463_v14 }
 0x3fc   :  { %2830 = vrot.lane.b32.xlu1 %v2804_v45, %s6602_s10 }
 0x3fe   :  { %2922 = vrot.lane.b32.xlu0 %v2905_v8, %s6601_s25  ;;  %v2803_v8 = vmul.f32 %v7964_v36, %v2775_v38  ;;  %v3169_v36 = vld [vmem:[#allocation4 + $0x48] sm:$0xf] }
 0x3ff   :  { %v3197_v19 = vmul.f32 %v7938_v29, %v3169_v36  ;;  %v3471_v29 = vmul.f32 %v7982_v43, %v3463_v14  ;;  %v3291_v43 = vmul.f32 %v7971_v58, %v7943_v30  ;;  %v3473_v30 = vmul.f32 %v3460_v5, %v3445_v2 }
 0x400   :  { %2928 = vrot.lane.b32.xlu1 %v2911_v61, %s6601_s25  ;;  %v3267_v61 = vld [vmem:[#allocation4 + $0x50] sm:$0xf] }
 0x401   :  { %v3295_v9 = vmul.f32 %v8026_v46, %v3267_v61 }
 0x402   :  { %3104 = vrot.lane.b32.xlu0 %v3087_v40, %s6585_s22  ;;  %v2988_v40 = vmul.f32 %v7891_v18, %v2959_v20  ;;  %v2859_v18 = vld [vmem:[#allocation4 + $0x50] sm:$0xf] }
 0x403   :  { %v2888_v42 = vmul.f32 %v7882_v7, %v2859_v18  ;;  %v9611_v7 = vrot.slane %v8078_v15, 4 }
 0x404   :  { %3318 = vrot.lane.b32.xlu1 %v3294_v32, %s6599_s0 }
 0x406   :  { %3232 = vrot.lane.b32.xlu0 %v3215_v48, %s6590_s28  ;;  %v8205_v48 = vpop.permute.xlu1 %3096 }
 0x408   :  { %3112 = vrot.lane.b32.xlu1 %v3095_v12, %s6585_s22 }
 0x40a   :  { %2828 = vrot.lane.b32.xlu0 %v2803_v8, %s6602_s10  ;;  %v8215_v4 = vpop.permute.xlu1 %3108 }
 0x40c   :  { %3411 = vrot.lane.b32.xlu1 %v8136_v10, %s6598_s24  ;;  %v3218_v10 = vrot.slane %v3197_v19, 4 }
 0x40e   :  { %3014 = vrot.lane.b32.xlu0 %v2988_v40, %s6600_s16  ;;  %v3219_v46 = vsel %vm2898_vm12, %v3212_v37, %v3218_v10  ;;  %v8227_v13 = vpop.permute.xlu1 %3228 }
 0x410   :  { %3409 = vrot.lane.b32.xlu1 %v8122_v3, %s6598_s24  ;;  %v2912_v3 = vrot.slane %v2888_v42, 4 }
 0x412   :  { %3320 = vrot.lane.b32.xlu0 %v3295_v9, %s6599_s0  ;;  %v2913_v51 = vsel %vm2898_vm12, %v9611_v7, %v2912_v3  ;;  %v8238_v37 = vpop.permute.xlu1 %3234 }
 0x414   :  { %3487 = vrot.lane.b32.xlu1 %v3468_v26, %s6597_s20 }
 0x416   :  { %3110 = vrot.lane.b32.xlu0 %v8151_v39, %s6585_s22  ;;  %v3446_v39 = vld [vmem:[#allocation4 + $0x50] sm:$0xf] }
 0x417   :  { %v3474_v15 = vmul.f32 %v3463_v14, %v3446_v39 }
 0x418   :  { %3493 = vrot.lane.b32.xlu1 %v3471_v29, %s6597_s20 }
 0x41a   :  { %3236 = vrot.lane.b32.xlu0 %v3219_v46, %s6590_s28 }
 0x41c   :  { %3417 = vrot.lane.b32.xlu1 %v8156_v49, %s6598_s24  ;;  %v8246_v49 = vpop.permute.xlu1 %3240 }
 0x41e   :  { %2930 = vrot.lane.b32.xlu0 %v2913_v51, %s6601_s25 }
 0x420   :  { %3485 = vrot.lane.b32.xlu1 %v3467_v60, %s6597_s20  ;;  %v3311_v16 = vpop.permute.xlu1 %3310 }
 0x422   :  { %3312 = vrot.lane.b32.xlu0 %v3291_v43, %s6599_s0 }
 0x424   :  { %3499 = vrot.lane.b32.xlu1 %v3474_v15, %s6597_s20  ;;  %v8260_v21 = vpop.permute.xlu1 %3316 }
 0x426   :  { %3403 = vrot.lane.b32.xlu0 %v3388_v0, %s6598_s24  ;;  %v3397_v0 = vrot.slane %v3376_v34, 4 }
 0x428   :  { %3497 = vrot.lane.b32.xlu1 %v3473_v30, %s6597_s20  ;;  %v8268_v45 = vpop.permute.xlu1 %3322 }
 0x42a   :  { %3413 = vrot.lane.b32.xlu0 %v7929_v28, %s6598_s24  ;;  %v3398_v28 = vsel %vm2898_vm12, %v3391_v24, %v3397_v0  ;;  %v3522_v24 = vld [vmem:[%s9592_s2 + $0x8] sm:$0xff] }
 0x42b   :  { %5410 = vmatprep.mubr.msk.f32.mxu1 %vm3577_vm7, %v3522_v24 }
 0x42e   :  { %3419 = vrot.lane.b32.xlu0 %v7936_v53, %s6598_s24  ;;  %v3011_v53 = vpop.permute.xlu0 %3010 }
 0x432   :  { %3238 = vrot.lane.b32.xlu0 %v8159_v55, %s6590_s28  ;;  %v3408_v55 = vpop.permute.xlu1 %3407  ;;  %v8273_v33 = vpop.permute.xlu0 %3102 }
 0x436   :  { %3415 = vrot.lane.b32.xlu0 %v3398_v28, %s6598_s24 }
 0x43a   :  { %3489 = vrot.lane.b32.xlu0 %v3469_v54, %s6597_s20 }
 0x43e   :  { %3495 = vrot.lane.b32.xlu0 %v3469_v54, %s6597_s20 }
 0x442   :  { %3491 = vrot.lane.b32.xlu0 %v3470_v6, %s6597_s20  ;;  %v3001_v11 = vpop.permute.xlu1 %3000 }
 0x443   :  { %v8282_v1 = vsel %vm3016_vm11, %v2999_v41, %v3001_v11 }
 0x444   :  { %v2817_v32 = vpop.permute.xlu0 %2816 }
 0x445   :  { %v2833_v58 = vsel %vm2832_vm3, %v2815_v23, %v2817_v32 }
 0x446   :  { %3501 = vrot.lane.b32.xlu0 %v3475_v35, %s6597_s20  ;;  %v3307_v38 = vpop.permute.xlu1 %3306 }
 0x448   :  { %v3003_v8 = vpop.permute.xlu0 %3002 }
 0x449   :  { %v8287_v12 = vsel %vm3016_vm11, %v3001_v11, %v3003_v8 }
 0x44a   :  { %v2819_v20 = vpop.permute.xlu1 %2818 }
 0x44b   :  { %v2834_v47 = vsel %vm2832_vm3, %v2817_v32, %v2819_v20 }
 0x44c   :  { %v3309_v40 = vpop.permute.xlu0 %3308 }
 0x44d   :  { %v8291_v61 = vsel %vm2975_vm6, %v3307_v38, %v3309_v40  ;;  %v8294_v5 = vsel %vm2975_vm6, %v3309_v40, %v3311_v16 }
 0x44e   :  { %v3007_v36 = vpop.permute.xlu1 %3006 }
 0x44f   :  { %v8298_v14 = vsel %vm3016_vm11, %v8194_v25, %v3007_v36 }
 0x450   :  { %v2823_v9 = vpop.permute.xlu0 %2822 }
 0x451   :  { %v2835_v19 = vsel %vm2832_vm3, %v8175_v44, %v2823_v9 }
 0x452   :  { %v3099_v18 = vpop.permute.xlu1 %3098  ;;  %v5938_v25 = vpack.c.bf16 %v2835_v19, %v2833_v58 }
 0x453   :  { %v3114_v10 = vsel %vm642_vm1, %v8205_v48, %v3099_v18 }
 0x454   :  { %v2917_v26 = vpop.permute.xlu0 %2916  ;;  %3126 = vst [vmem:[#allocation5 + $0x70] sm:$0xf0] %v3114_v10 }
 0x455   :  { %v2933_v42 = vsel %vm2932_vm5, %v8181_v22, %v2917_v26 }
 0x456   :  { %2945 = vst [vmem:[#allocation5 + $0x20] sm:$0xf0] %v2933_v42  ;;  %v2825_v29 = vpop.permute.xlu1 %2824 }
 0x457   :  { %v2836_v3 = vsel %vm2832_vm3, %v2823_v9, %v2825_v29 }
 0x458   :  { %v3225_v46 = vpop.permute.xlu0 %3224  ;;  %v5936_v7 = vpack.c.bf16 %v2836_v3, %v2834_v47 }
 0x45a   :  { %v2919_v51 = vpop.permute.xlu1 %2918  ;;  %5937 = vmatprep.subr.bf16.mxu1 %v5936_v7 }
 0x45b   :  { %v2934_v44 = vsel %vm2932_vm5, %v2917_v26, %v2919_v51  ;;  %5939 = vmatpush1.bf16.msra.mxu1 %v5938_v25 }
 0x45c   :  { %v3009_v43 = vpop.permute.xlu0 %3008  ;;  %2946 = vst [vmem:[#allocation5 + $0x28] sm:$0xf0] %v2934_v44 }
 0x45d   :  { %v8309_v60 = vsel %vm3016_vm11, %v3007_v36, %v3009_v43 }
 0x45e   :  { %v3231_v48 = vpop.permute.xlu1 %3230 }
 0x460   :  { %v3101_v22 = vpop.permute.xlu0 %3100 }
 0x461   :  { %v3115_v39 = vsel %vm642_vm1, %v3099_v18, %v3101_v22 }
 0x462   :  { %3127 = vst [vmem:[#allocation5 + $0x78] sm:$0xf0] %v3115_v39  ;;  %v2925_v15 = vpop.permute.xlu1 %2924 }
 0x464   :  { %v3227_v23 = vpop.permute.xlu0 %3226 }
 0x465   :  { %v3242_v2 = vsel %vm582_vm4, %v3225_v46, %v3227_v23  ;;  %v3243_v30 = vsel %vm582_vm4, %v3227_v23, %v8227_v13 }
 0x466   :  { %3254 = vst [vmem:[#allocation5 + $0xc0] sm:$0xf0] %v3242_v2  ;;  %3255 = vst [vmem:[#allocation5 + $0xc8] sm:$0xf0] %v3243_v30  ;;  %v3107_v62 = vpop.permute.xlu1 %3106 }
 0x468   :  { %v8315_v16 = vpop.permute.xlu0 %3314 }
 0x469   :  { %v8320_v34 = vsel %vm2975_vm6, %v8315_v16, %v8260_v21 }
 0x46a   :  { %v3013_v0 = vpop.permute.xlu1 %3012 }
 0x46b   :  { %v3021_v41 = vsel %vm3016_vm11, %v3011_v53, %v3013_v0 }
 0x46c   :  { %v8322_v28 = vpop.permute.xlu0 %3405  ;;  %3033 = vst [vmem:[#allocation5 + $0x70] sm:$0xf] %v3021_v41 }
 0x46d   :  { %v3422_v54 = vsel %vm2875_vm2, %v8322_v28, %v3408_v55 }
 0x46e   :  { %3434 = vst [vmem:[#allocation5 + $0x118] sm:$0xf0] %v3422_v54  ;;  %v2831_v13 = vpop.permute.xlu1 %2830 }
 0x470   :  { %v2923_v6 = vpop.permute.xlu0 %2922 }
 0x471   :  { %v2935_v17 = vsel %vm2932_vm5, %v8256_v59, %v2923_v6  ;;  %v2936_v24 = vsel %vm2932_vm5, %v2923_v6, %v2925_v15 }
 0x472   :  { %v2929_v35 = vpop.permute.xlu1 %2928 }
 0x473   :  { %v2937_v11 = vsel %vm2932_vm5, %v8188_v27, %v2929_v35  ;;  %v3545_v30 = vld [vmem:[#allocation5 + $0x70] sm:$0xff] }
 0x474   :  { %v3105_v21 = vpop.permute.xlu0 %3104  ;;  %v5946_v15 = vpack.c.bf16 %v8282_v1, %v2937_v11  ;;  %v5950_v41 = vpack.c.bf16 %v3545_v30, %v8298_v14  ;;  %v9612_v14 = vpack.c.bf16 %v8000_v31, %v7968_v56  ;;  %v6546_v30 = vld [vmem:[%s9598_s8 + $0x68] sm:$0xff]  }
 0x475   :  { %v8334_v53 = vsel %vm642_vm1, %v8273_v33, %v3105_v21  ;;  %v3117_v55 = vsel %vm642_vm1, %v3105_v21, %v3107_v62 }
 0x476   :  { %v3319_v32 = vpop.permute.xlu1 %3318 }
 0x478   :  { %v3233_v58 = vpop.permute.xlu0 %3232 }
 0x479   :  { %v8338_v38 = vsel %vm582_vm4, %v3231_v48, %v3233_v58  ;;  %v8342_v59 = vsel %vm582_vm4, %v3233_v58, %v8238_v37 }
 0x47a   :  { %v3113_v8 = vpop.permute.xlu1 %3112 }
 0x47c   :  { %v2829_v20 = vpop.permute.xlu0 %2828 }
 0x47d   :  { %v2837_v27 = vsel %vm2832_vm3, %v8251_v63, %v2829_v20  ;;  %v2838_v40 = vsel %vm2832_vm3, %v2829_v20, %v2831_v13 }
 0x47e   :  { %2849 = vst [vmem:[#allocation5 + $0x20] sm:$0xf] %v2837_v27  ;;  %2850 = vst [vmem:[#allocation5 + $0x28] sm:$0xf] %v2838_v40  ;;  %v3412_v33 = vpop.permute.xlu1 %3411 }
 0x480   :  { %v3015_v47 = vpop.permute.xlu0 %3014 }
 0x481   :  { %v3022_v36 = vsel %vm3016_vm11, %v3013_v0, %v3015_v47 }
 0x482   :  { %3034 = vst [vmem:[#allocation5 + $0x78] sm:$0xf] %v3022_v36  ;;  %v3410_v9 = vpop.permute.xlu1 %3409 }
 0x483   :  { %v8349_v18 = vsel %vm2875_vm2, %v3410_v9, %v3412_v33 }
 0x484   :  { %v3321_v19 = vpop.permute.xlu0 %3320 }
 0x485   :  { %v3328_v37 = vsel %vm2975_vm6, %v3319_v32, %v3321_v19  ;;  %v3329_v26 = vsel %vm2975_vm6, %v3321_v19, %v8268_v45  ;;  %v3536_v63 = vld [vmem:[#allocation5 + $0x28] sm:$0xff]  ;;  %v3535_v10 = vld [vmem:[#allocation5 + $0x20] sm:$0xff] }
 0x486   :  { %3340 = vst [vmem:[#allocation5 + $0x110] sm:$0xf] %v3328_v37  ;;  %3341 = vst [vmem:[#allocation5 + $0x118] sm:$0xf] %v3329_v26  ;;  %v5940_v42 = vpack.c.bf16 %v2936_v24, %v3536_v63  ;;  %v5942_v29 = vpack.c.bf16 %v2935_v17, %v3535_v10  ;;  %v8354_v46 = vpop.permute.xlu1 %3487  ;;  %v3521_v63 = vld [vmem:[%s9592_s2] sm:$0xff] }
 0x487   :  { %v6537_v10 = vld [vmem:[%s9598_s8] sm:$0xff]  }
 0x488   :  { %5941 = vmatprep.subr.bf16.mxu1 %v5940_v42  ;;  %v3111_v3 = vpop.permute.xlu0 %3110 }
 0x489   :  { %v3118_v7 = vsel %vm642_vm1, %v8215_v4, %v3111_v3  ;;  %v3119_v25 = vsel %vm642_vm1, %v3111_v3, %v3113_v8  ;;  %5943 = vmatpush1.bf16.msra.mxu1 %v5942_v29  ;;  %v3546_v22 = vld [vmem:[#allocation5 + $0x78] sm:$0xff] }
 0x48a   :  { %v8359_v51 = vpop.permute.xlu1 %3493  ;;  %v5948_v4 = vpack.c.bf16 %v3546_v22, %v8309_v60  ;;  %v5952_v13 = vpack.c.bf16 %v3119_v25, %v3117_v55  ;;  %v5954_v60 = vpack.c.bf16 %v3118_v7, %v8334_v53  ;;  %v3555_v53 = vld [vmem:[#allocation5 + $0xc0] sm:$0xff]  ;;  %v3523_v3 = vld [vmem:[%s9592_s2 + $0x10] sm:$0xff]  ;;  %v6539_v7 = vld [vmem:[%s9598_s8 + $0x8] sm:$0xff]  }
 0x48b   :  { %v5962_v55 = vpack.c.bf16 %v8338_v38, %v3555_v53  ;;  %v3524_v29 = vld [vmem:[%s9592_s2 + $0x18] sm:$0xff]  ;;  %v3526_v25 = vld [vmem:[%s9592_s2 + $0x28] sm:$0xff]  ;;  %v3527_v22 = vld [vmem:[%s9592_s2 + $0x30] sm:$0xff] }
 0x48c   :  { %v3237_v43 = vpop.permute.xlu0 %3236 }
 0x48d   :  { %v3566_v31 = vld [vmem:[#allocation5 + $0x118] sm:$0xff] }
 0x48e   :  { %v3418_v45 = vpop.permute.xlu1 %3417  ;;  %v5968_v52 = vpack.c.bf16 %v3566_v31, %v8320_v34  ;;  %v3984_v31 = vld [vmem:[%s9593_s3 + $0xa0] sm:$0xff] }
 0x490   :  { %v2931_v44 = vpop.permute.xlu0 %2930 }
 0x491   :  { %v2938_v48 = vsel %vm2932_vm5, %v2929_v35, %v2931_v44  ;;  %v3556_v35 = vld [vmem:[#allocation5 + $0xc8] sm:$0xff]  ;;  %v3528_v44 = vld [vmem:[%s9592_s2 + $0x38] sm:$0xff] }
 0x492   :  { %v5944_v39 = vpack.c.bf16 %v8287_v12, %v2938_v48  ;;  %v3486_v23 = vpop.permute.xlu1 %3485  ;;  %v6542_v48 = vld [vmem:[%s9598_s8 + $0x58] sm:$0xff]  }
 0x493   :  { %v3503_v62 = vsel %vm2791_vm14, %v3486_v23, %v8354_v46  ;;  %v6544_v23 = vld [vmem:[%s9598_s8 + $0x60] sm:$0xff]  }
 0x494   :  { %v3313_v2 = vpop.permute.xlu0 %3312  ;;  %5945 = vmatprep.subr.bf16.mxu1 %v5944_v39  ;;  %v6543_v39 = vld [vmem:[%s9598_s8 + $0x18] sm:$0xff]  }
 0x495   :  { %v3326_v0 = vsel %vm2975_vm6, %v3313_v2, %v8315_v16  ;;  %5947 = vmatpush1.bf16.msra.mxu1 %v5946_v15  ;;  %v3530_v15 = vld [vmem:[%s9592_s2 + $0x48] sm:$0xff]  ;;  %v3529_v2 = vld [vmem:[%s9592_s2 + $0x40] sm:$0xff] }
 0x496   :  { %5949 = vmatprep.subr.bf16.mxu1 %v5948_v4  ;;  %v3500_v54 = vpop.permute.xlu1 %3499  ;;  %v6545_v4 = vld [vmem:[%s9598_s8 + $0x20] sm:$0xff]  }
 0x498   :  { %v3404_v12 = vpop.permute.xlu0 %3403 }
 0x499   :  { %v3421_v1 = vsel %vm2875_vm2, %v3404_v12, %v8322_v28  ;;  %5951 = vmatpush1.bf16.msra.mxu1 %v5950_v41  ;;  %v5960_v28 = vpack.c.bf16 %v8342_v59, %v3556_v35  ;;  %v6549_v41 = vld [vmem:[%s9598_s8 + $0x30] sm:$0xff]   ;;  %v6551_v12 = vld [vmem:[%s9598_s8 + $0x38] sm:$0xff]  }
 0x49a   :  { %3433 = vst [vmem:[#allocation5 + $0x110] sm:$0xf0] %v3421_v1  ;;  %5953 = vmatprep.subr.bf16.mxu1 %v5952_v13  ;;  %v3498_v6 = vpop.permute.xlu1 %3497  ;;  %v3980_v13 = vld [vmem:[%s9593_s3 + $0x80] sm:$0xff]  ;;  %v3981_v1 = vld [vmem:[%s9593_s3 + $0x88] sm:$0xff]  ;;  %v3982_v35 = vld [vmem:[%s9593_s3 + $0x90] sm:$0xff] }
 0x49b   :  { %v3507_v24 = vsel %vm2791_vm14, %v3498_v6, %v3500_v54 }
 0x49c   :  { %v3414_v17 = vpop.permute.xlu0 %3413  ;;  %3519 = vst [vmem:[#allocation5 + $0x160] sm:$0xf] %v3507_v24  ;;  %v3964_v24 = vld [vmem:[%s9593_s3] sm:$0xff] }
 0x49d   :  { %v3424_v16 = vsel %vm2875_vm2, %v3412_v33, %v3414_v17  ;;  %5955 = vmatpush1.bf16.msra.mxu1 %v5954_v60  ;;  %v5980_v60 = vpack.c.bf16 %v3981_v1, %v3980_v13  ;;  %v4124_v13 = vld [vmem:[%s9593_s3 + $0x500] sm:$0xff] }
 0x49e   :  { %5957 = vmatprep.subr.bf16.mxu1 %v9612_v14 }
 0x4a0   :  { %v3420_v21 = vpop.permute.xlu0 %3419 }
 0x4a1   :  { %v3426_v11 = vsel %vm2875_vm2, %v3418_v45, %v3420_v21  ;;  %5959 = vmatpush1.bf16.msra.mxu1 %v5958_v57  ;;  %v3565_v50 = vld [vmem:[#allocation5 + $0x110] sm:$0xff]  ;;  %v3983_v21 = vld [vmem:[%s9593_s3 + $0x98] sm:$0xff] }
 0x4a2   :  { %5961 = vmatprep.subr.bf16.mxu1 %v5960_v28  ;;  %v5970_v38 = vpack.c.bf16 %v3565_v50, %v3326_v0  ;;  %v5972_v40 = vpack.c.bf16 %v3426_v11, %v3424_v16  ;;  %v6548_v0 = vld [vmem:[%s9598_s8 + $0x70] sm:$0xff]   ;;  %v3965_v16 = vld [vmem:[%s9593_s3 + $0x8] sm:$0xff]  ;;  %v5984_v53 = vpack.c.bf16 %v3983_v21, %v3982_v35  ;;  %v3968_v50 = vld [vmem:[%s9593_s3 + $0x20] sm:$0xff] }
 0x4a3   :  { %v3575_v42 = vld [vmem:[#allocation5 + $0x160] sm:$0xf]  ;;  %v5982_v11 = vpack.c.bf16 %v3965_v16, %v3964_v24 }
 0x4a4   :  { %v3239_v32 = vpop.permute.xlu0 %3238  ;;  %v4143_v24 = vld [vmem:[%s9593_s3 + $0x598] sm:$0xff] }
 0x4a5   :  { %v3246_v58 = vsel %vm582_vm4, %v3237_v43, %v3239_v32  ;;  %v3247_v56 = vsel %vm582_vm4, %v3239_v32, %v8246_v49  ;;  %5963 = vmatpush1.bf16.msra.mxu1 %v5962_v55  ;;  %v3525_v43 = vld [vmem:[%s9592_s2 + $0x20] sm:$0xff]  ;;  %v3966_v55 = vld [vmem:[%s9593_s3 + $0x10] sm:$0xff]  ;;  %v3967_v32 = vld [vmem:[%s9593_s3 + $0x18] sm:$0xff] }
 0x4a6   :  { %v5964_v59 = vpack.c.bf16 %v8294_v5, %v3247_v56  ;;  %v5966_v8 = vpack.c.bf16 %v8291_v61, %v3246_v58  ;;  %v9613_v58 = vmov 1.0|1.0   ;;  %v4127_v35 = vld [vmem:[%s9593_s3 + $0x518] sm:$0xff] }
 0x4a8   :  { %v3416_v20 = vpop.permute.xlu0 %3415  ;;  %5965 = vmatprep.subr.bf16.mxu1 %v5964_v59  ;;  %v3985_v59 = vld [vmem:[%s9593_s3 + $0xa8] sm:$0xff] }
 0x4a9   :  { %v3425_v57 = vsel %vm2875_vm2, %v3416_v20, %v3418_v45  ;;  %5967 = vmatpush1.bf16.msra.mxu1 %v5966_v8  ;;  %v6541_v45 = vld [vmem:[%s9598_s8 + $0x10] sm:$0xff]   ;;  %v5986_v20 = vpack.c.bf16 %v3967_v32, %v3966_v55  ;;  %v4129_v32 = vld [vmem:[%s9593_s3 + $0x528] sm:$0xff] }
 0x4aa   :  { %5969 = vmatprep.subr.bf16.mxu1 %v5968_v52  ;;  %v5974_v5 = vpack.c.bf16 %v3425_v57, %v8349_v18  ;;  %v6536_v18 = vld [vmem:[%s9598_s8 + $0x40] sm:$0xff]   ;;  %v5988_v52 = vpack.c.bf16 %v3985_v59, %v3984_v31  ;;  %v3969_v57 = vld [vmem:[%s9593_s3 + $0x28] sm:$0xff]  ;;  %v4147_v31 = vld [vmem:[%s9593_s3 + $0x5b8] sm:$0xff] }
 0x4ab   :  { %v4130_v59 = vld [vmem:[%s9593_s3 + $0x530] sm:$0xff] }
 0x4ac   :  { %v3490_v27 = vpop.permute.xlu0 %3489 }
 0x4ad   :  { %v3504_v49 = vsel %vm2791_vm14, %v8354_v46, %v3490_v27  ;;  %5971 = vmatpush1.bf16.msra.mxu1 %v5970_v38  ;;  %v6538_v46 = vld [vmem:[%s9598_s8 + $0x48] sm:$0xff]   ;;  %v3986_v27 = vld [vmem:[%s9593_s3 + $0xb0] sm:$0xff] }
 0x4ae   :  { %5973 = vmatprep.subr.bf16.mxu1 %v5972_v40  ;;  %v3987_v40 = vld [vmem:[%s9593_s3 + $0xb8] sm:$0xff] }
 0x4b0   :  { %v3496_v61 = vpop.permute.xlu0 %3495 }
 0x4b1   :  { %v3506_v33 = vsel %vm2791_vm14, %v8359_v51, %v3496_v61  ;;  %5975 = vmatpush1.bf16.msra.mxu1 %v5974_v5  ;;  %v5990_v5 = vpack.c.bf16 %v3969_v57, %v3968_v50  ;;  %v5992_v61 = vpack.c.bf16 %v3987_v40, %v3986_v27  ;;  %v4148_v50 = vld [vmem:[%s9593_s3 + $0x5c0] sm:$0xff]  ;;  %v4149_v57 = vld [vmem:[%s9593_s3 + $0x5c8] sm:$0xff] }
 0x4b2   :  { %v5976_v34 = vpack.c.bf16 %v3506_v33, %v3504_v49  ;;  %v3970_v33 = vld [vmem:[%s9593_s3 + $0x30] sm:$0xff]  ;;  %v6156_v27 = vpack.c.bf16 %v4149_v57, %v4148_v50  ;;  %v4133_v40 = vld [vmem:[%s9593_s3 + $0x548] sm:$0xff] }
 0x4b4   :  { %v3492_v47 = vpop.permute.xlu0 %3491  ;;  %5977 = vmatprep.subr.bf16.mxu1 %v5976_v34  ;;  %v3971_v34 = vld [vmem:[%s9593_s3 + $0x38] sm:$0xff] }
 0x4b5   :  { %v3505_v36 = vsel %vm2791_vm14, %v3492_v47, %v8359_v51  ;;  %v6540_v51 = vld [vmem:[%s9598_s8 + $0x50] sm:$0xff]  }
 0x4b6   :  { %v5978_v9 = vpack.c.bf16 %v3505_v36, %v3503_v62  ;;  %v6547_v62 = vld [vmem:[%s9598_s8 + $0x28] sm:$0xff]   ;;  %v3988_v36 = vld [vmem:[%s9593_s3 + $0xc0] sm:$0xff] }
 0x4b8   :  { %v3502_v19 = vpop.permute.xlu0 %3501  ;;  %5979 = vmatpush1.bf16.msra.mxu1 %v5978_v9  ;;  %v3989_v9 = vld [vmem:[%s9593_s3 + $0xc8] sm:$0xff] }
 0x4b9   :  { %v3508_v37 = vsel %vm2791_vm14, %v3500_v54, %v3502_v19  ;;  %v6550_v54 = vld [vmem:[%s9598_s8 + $0x78] sm:$0xff]  }
 0x4ba   :  { %3520 = vst [vmem:[#allocation5 + $0x168] sm:$0xf] %v3508_v37  ;;  %v5994_v37 = vpack.c.bf16 %v3971_v34, %v3970_v33  ;;  %v4134_v33 = vld [vmem:[%s9593_s3 + $0x550] sm:$0xff] }
 0x4c1   :  { %v3576_v26 = vld [vmem:[#allocation5 + $0x168] sm:$0xf] }
 0x4c2   :  { %5408 = vmatprep.subr.msk.mxu1 %vm2898_vm12, %v3576_v26  ;;  %v3972_v26 = vld [vmem:[%s9593_s3 + $0x40] sm:$0xff] }
 0x4c3   :  { %5409 = vmatpush1.msk.msra.mxu1 %vm2898_vm12, %v3575_v42  ;;  %v3991_v42 = vld [vmem:[%s9593_s3 + $0xd8] sm:$0xff] }
 0x4c4   :  { %3664 = vmatmul.mubr.f32.vlgmr.msra.gmra.mrb[10].mxu1 %v3521_v63  ;;  %5479 = vmatprep.subr.bf16.mxu1 %v6536_v18  ;;  %v5996_v18 = vpack.c.bf16 %v3989_v9, %v3988_v36  ;;  %v3973_v63 = vld [vmem:[%s9593_s3 + $0x48] sm:$0xff]  ;;  %v4152_v9 = vld [vmem:[%s9593_s3 + $0x5e0] sm:$0xff] }
 0x4c5   :  { %5411 = vmatprep.mubr.msk.f32.mxu1 %vm3577_vm7, %v3524_v29  ;;  %5480 = vmatpush3.bf16.msra.mxu1 %v6537_v10  ;;  %v3990_v10 = vld [vmem:[%s9593_s3 + $0xd0] sm:$0xff]  ;;  %v5998_v29 = vpack.c.bf16 %v3973_v63, %v3972_v26  ;;  %v4137_v26 = vld [vmem:[%s9593_s3 + $0x568] sm:$0xff] }
 0x4c6   :  { %5481 = vmatprep.subr.bf16.mxu1 %v6538_v46  ;;  %v6000_v46 = vpack.c.bf16 %v3991_v42, %v3990_v10  ;;  %v4154_v10 = vld [vmem:[%s9593_s3 + $0x5f0] sm:$0xff]  ;;  %v4155_v42 = vld [vmem:[%s9593_s3 + $0x5f8] sm:$0xff] }
 0x4c8   :  { %3670 = vmatmul.mubr.f32.gmra.mrb[12].mxu1 %v3523_v3  ;;  %v3974_v3 = vld [vmem:[%s9593_s3 + $0x50] sm:$0xff] }
 0x4c9   :  { %5412 = vmatprep.mubr.msk.f32.mxu1 %vm3577_vm7, %v3526_v25  ;;  %5482 = vmatpush3.bf16.msra.mxu1 %v6539_v7  ;;  %v3975_v7 = vld [vmem:[%s9593_s3 + $0x58] sm:$0xff] }
 0x4ca   :  { %5483 = vmatprep.subr.bf16.mxu1 %v6540_v51  ;;  %v6002_v25 = vpack.c.bf16 %v3975_v7, %v3974_v3  ;;  %v3992_v51 = vld [vmem:[%s9593_s3 + $0xe0] sm:$0xff]  ;;  %v4139_v3 = vld [vmem:[%s9593_s3 + $0x578] sm:$0xff] }
 0x4cc   :  { %3676 = vmatmul.mubr.f32.gmra.mrb[14].mxu1 %v3525_v43  ;;  %v3993_v43 = vld [vmem:[%s9593_s3 + $0xe8] sm:$0xff] }
 0x4cd   :  { %5413 = vmatprep.mubr.msk.f32.mxu1 %vm3577_vm7, %v3528_v44  ;;  %5484 = vmatpush3.bf16.msra.mxu1 %v6541_v45  ;;  %v6004_v45 = vpack.c.bf16 %v3993_v43, %v3992_v51  ;;  %v3976_v44 = vld [vmem:[%s9593_s3 + $0x60] sm:$0xff]  ;;  %v4205_v51 = vld [vmem:[%s9593_s3 + $0x788] sm:$0xff] }
 0x4ce   :  { %5485 = vmatprep.subr.bf16.mxu1 %v6542_v48  ;;  %v3977_v48 = vld [vmem:[%s9593_s3 + $0x68] sm:$0xff] }
 0x4d0   :  { %3682 = vmatmul.mubr.f32.gmra.mrb[16].mxu1 %v3527_v22  ;;  %v6006_v22 = vpack.c.bf16 %v3977_v48, %v3976_v44 }
 0x4d1   :  { %5414 = vmatprep.mubr.msk.f32.mxu1 %vm3577_vm7, %v3530_v15  ;;  %5486 = vmatpush3.bf16.msra.mxu1 %v6543_v39  ;;  %v3994_v39 = vld [vmem:[%s9593_s3 + $0xf0] sm:$0xff]  ;;  %v3995_v15 = vld [vmem:[%s9593_s3 + $0xf8] sm:$0xff] }
 0x4d2   :  { %5487 = vmatprep.subr.bf16.mxu1 %v6544_v23  ;;  %v3978_v23 = vld [vmem:[%s9593_s3 + $0x70] sm:$0xff] }
 0x4d4   :  { %3688 = vmatmul.mubr.f32.gmra.mrb[18].mxu1 %v3529_v2  ;;  %v6008_v2 = vpack.c.bf16 %v3995_v15, %v3994_v39  ;;  %v3996_v15 = vld [vmem:[%s9593_s3 + $0x100] sm:$0xff] }
 0x4d5   :  { %5488 = vmatpush3.bf16.msra.mxu1 %v6545_v4  ;;  %v3979_v4 = vld [vmem:[%s9593_s3 + $0x78] sm:$0xff] }
 0x4d6   :  { %5489 = vmatprep.subr.bf16.mxu1 %v6546_v30  ;;  %v4012_v30 = vld [vmem:[%s9593_s3 + $0x180] sm:$0xff] }
 0x4d9   :  { %5490 = vmatpush3.bf16.msra.mxu1 %v6547_v62  ;;  %v4013_v62 = vld [vmem:[%s9593_s3 + $0x188] sm:$0xff] }
 0x4da   :  { %5491 = vmatprep.subr.bf16.mxu1 %v6548_v0  ;;  %v6010_v0 = vpack.c.bf16 %v3979_v4, %v3978_v23  ;;  %v3997_v23 = vld [vmem:[%s9593_s3 + $0x108] sm:$0xff]  ;;  %v4014_v4 = vld [vmem:[%s9593_s3 + $0x190] sm:$0xff] }
 0x4dd   :  { %5492 = vmatpush3.bf16.msra.mxu1 %v6549_v41  ;;  %v6012_v41 = vpack.c.bf16 %v4013_v62, %v4012_v30  ;;  %v4015_v30 = vld [vmem:[%s9593_s3 + $0x198] sm:$0xff] }
 0x4de   :  { %5493 = vmatprep.subr.bf16.mxu1 %v6550_v54  ;;  %v4140_v54 = vld [vmem:[%s9593_s3 + $0x580] sm:$0xff] }
 0x4df   :  { %v8704_v62 = vld [vmem:[#allocation4] sm:$0xff] }
 0x4e1   :  { %5494 = vmatpush3.bf16.msra.mxu1 %v6551_v12  ;;  %v4141_v12 = vld [vmem:[%s9593_s3 + $0x588] sm:$0xff] }
 0x4e2   :  { %5981 = vmatprep.subr.bf16.mxu1 %v5980_v60  ;;  %v6140_v1 = vpack.c.bf16 %v4141_v12, %v4140_v54  ;;  %v4125_v60 = vld [vmem:[%s9593_s3 + $0x508] sm:$0xff]  ;;  %v6014_v54 = vpack.c.bf16 %v3997_v23, %v3996_v15  ;;  %v6016_v12 = vpack.c.bf16 %v4015_v30, %v4014_v4  ;;  %v4024_v4 = vld [vmem:[%s9593_s3 + $0x1e0] sm:$0xff] }
 0x4e4   :  { %6141 = vmatprep.subr.bf16.mxu0 %v6140_v1  ;;  %v3999_v1 = vld [vmem:[%s9593_s3 + $0x118] sm:$0xff] }
 0x597   :  { %v3665_v6 = vpop.f32.mrb[10].mxu1 }
 0x598   :  { %v3667_v17 = vpop.f32.mrb[11].mxu1  ;;  %vm3694_vm1 = vcmp.ge.f32.partialorder %v3665_v6, 1.0  ;;  %v6142_v6 = vpack.c.bf16 %v4125_v60, %v4124_v13  ;;  %v3998_v13 = vld [vmem:[%s9593_s3 + $0x110] sm:$0xff] }
 0x599   :  { %vm3695_vm14 = vcmp.ge.f32.partialorder %v3667_v17, 1.0  ;;  %v4142_v17 = vld [vmem:[%s9593_s3 + $0x590] sm:$0xff] }
 0x59a   :  { %6143 = vmatpush3.bf16.msra.mxu0 %v6142_v6  ;;  %v6144_v16 = vpack.c.bf16 %v4143_v24, %v4142_v17  ;;  %v4016_v6 = vld [vmem:[%s9593_s3 + $0x1a0] sm:$0xff]  ;;  %v4017_v17 = vld [vmem:[%s9593_s3 + $0x1a8] sm:$0xff] }
 0x59b   :  { %v3671_v14 = vpop.f32.mrb[12].mxu1 }
 0x59c   :  { %vm3696_vm4 = vcmp.ge.f32.partialorder %v3671_v14, 1.0  ;;  %v3673_v28 = vpop.f32.mrb[13].mxu1  ;;  %v4126_v14 = vld [vmem:[%s9593_s3 + $0x510] sm:$0xff]  ;;  %6145 = vmatprep.subr.bf16.mxu0 %v6144_v16  ;;  %v6604_v16 = vmov 1.0  }
 0x59d   :  { %vm5443_vm2 = vmpackc.low %vm3696_vm4, %vm3694_vm1  ;;  %vm3697_vm5 = vcmp.ge.f32.partialorder %v3673_v28, 1.0  ;;  %v6146_v21 = vpack.c.bf16 %v4127_v35, %v4126_v14  ;;  %v4144_v28 = vld [vmem:[%s9593_s3 + $0x5a0] sm:$0xff]  ;;  %v6018_v35 = vpack.c.bf16 %v3999_v1, %v3998_v13  ;;  %v4213_v1 = vld [vmem:[%s9593_s3 + $0x7c8] sm:$0xff] }
 0x59e   :  { %vm5441_vm6 = vmpackc.low %vm3697_vm5, %vm3695_vm14  ;;  %v4212_v13 = vld [vmem:[%s9593_s3 + $0x7c0] sm:$0xff] }
 0x59f   :  { %5442 = vmatprep.mubr.msk.bf16.mxu1 %vm5441_vm6, %v9613_v58  ;;  %v3677_v56 = vpop.f32.mrb[14].mxu1  ;;  %6147 = vmatpush3.bf16.msra.mxu0 %v6146_v21  ;;  %v4000_v21 = vld [vmem:[%s9593_s3 + $0x120] sm:$0xff] }
 0x5a0   :  { %5444 = vmatmul.mubr.msk.bf16.vlgmr.msra.gmra.mrb[20].mxu1 %vm5443_vm2, %v9613_v58  ;;  %v3679_v8 = vpop.f32.mrb[15].mxu1  ;;  %vm3698_vm9 = vcmp.ge.f32.partialorder %v3677_v56, 1.0  ;;  %v4146_v56 = vld [vmem:[%s9593_s3 + $0x5b0] sm:$0xff] }
 0x5a1   :  { %5983 = vmatpush3.bf16.msra.mxu1 %v5982_v11  ;;  %vm3699_vm11 = vcmp.ge.f32.partialorder %v3679_v8, 1.0  ;;  %v4145_v11 = vld [vmem:[%s9593_s3 + $0x5a8] sm:$0xff]  ;;  %v6152_v8 = vpack.c.bf16 %v4147_v31, %v4146_v56 }
 0x5a2   :  { %5985 = vmatprep.subr.bf16.mxu1 %v5984_v53  ;;  %v4128_v53 = vld [vmem:[%s9593_s3 + $0x520] sm:$0xff]  ;;  %v6148_v55 = vpack.c.bf16 %v4145_v11, %v4144_v28  ;;  %v4001_v28 = vld [vmem:[%s9593_s3 + $0x128] sm:$0xff] }
 0x5a3   :  { %v3683_v38 = vpop.f32.mrb[16].mxu1  ;;  %v4189_v56 = vld [vmem:[%s9593_s3 + $0x708] sm:$0xff]  ;;  %v6022_v50 = vpack.c.bf16 %v4001_v28, %v4000_v21  ;;  %v6220_v21 = vpack.c.bf16 %v4213_v1, %v4212_v13  ;;  %v4196_v28 = vld [vmem:[%s9593_s3 + $0x740] sm:$0xff]  ;;  %v4050_v13 = vld [vmem:[%s9593_s3 + $0x2b0] sm:$0xff] }
 0x5a4   :  { %vm3700_vm13 = vcmp.ge.f32.partialorder %v3683_v38, 1.0  ;;  %v3685_v49 = vpop.f32.mrb[17].mxu1  ;;  %6149 = vmatprep.subr.bf16.mxu0 %v6148_v55  ;;  %v4132_v38 = vld [vmem:[%s9593_s3 + $0x540] sm:$0xff]  ;;  %v6020_v55 = vpack.c.bf16 %v4017_v17, %v4016_v6  ;;  %v4009_v17 = vld [vmem:[%s9593_s3 + $0x168] sm:$0xff] }
 0x5a5   :  { %vm5447_vm15 = vmpackc.low %vm3700_vm13, %vm3698_vm9  ;;  %vm3701_vm3 = vcmp.ge.f32.partialorder %v3685_v49, 1.0  ;;  %5987 = vmatpush3.bf16.msra.mxu1 %v5986_v20  ;;  %v4131_v20 = vld [vmem:[%s9593_s3 + $0x538] sm:$0xff]  ;;  %v6158_v49 = vpack.c.bf16 %v4133_v40, %v4132_v38  ;;  %v4002_v38 = vld [vmem:[%s9593_s3 + $0x130] sm:$0xff] }
 0x5a6   :  { %vm5445_vm7 = vmpackc.low %vm3701_vm3, %vm3699_vm11  ;;  %5989 = vmatprep.subr.bf16.mxu1 %v5988_v52  ;;  %v6154_v52 = vpack.c.bf16 %v4131_v20, %v4130_v59  ;;  %v4019_v59 = vld [vmem:[%s9593_s3 + $0x1b8] sm:$0xff]  ;;  %v4008_v6 = vld [vmem:[%s9593_s3 + $0x160] sm:$0xff] }
 0x5a7   :  { %5446 = vmatprep.mubr.msk.bf16.mxu1 %vm5445_vm7, %v9613_v58  ;;  %v3689_v47 = vpop.f32.mrb[18].mxu1  ;;  %v4207_v20 = vld [vmem:[%s9593_s3 + $0x798] sm:$0xff] }
 0x5a8   :  { %5448 = vmatmul.mubr.msk.bf16.gmra.mrb[24].mxu1 %vm5447_vm15, %v9613_v58  ;;  %v3691_v19 = vpop.f32.mrb[19].mxu1  ;;  %vm3702_vm4 = vcmp.ge.f32.partialorder %v3689_v47, 1.0  ;;  %v4135_v47 = vld [vmem:[%s9593_s3 + $0x558] sm:$0xff] }
 0x5a9   :  { %vm3703_vm1 = vcmp.ge.f32.partialorder %v3691_v19, 1.0  ;;  %5991 = vmatpush3.bf16.msra.mxu1 %v5990_v5  ;;  %vm5451_vm2 = vmpackc.low %vm3702_vm4, %vm3702_vm4  ;;  %v4150_v5 = vld [vmem:[%s9593_s3 + $0x5d0] sm:$0xff]  ;;  %v6162_v36 = vpack.c.bf16 %v4135_v47, %v4134_v33  ;;  %v4153_v19 = vld [vmem:[%s9593_s3 + $0x5e8] sm:$0xff] }
 0x5aa   :  { %vm5449_vm14 = vmpackc.low %vm3703_vm1, %vm3703_vm1  ;;  %5993 = vmatprep.subr.bf16.mxu1 %v5992_v61  ;;  %v4151_v61 = vld [vmem:[%s9593_s3 + $0x5d8] sm:$0xff]  ;;  %v4020_v33 = vld [vmem:[%s9593_s3 + $0x1c0] sm:$0xff] }
 0x5ab   :  { %5450 = vmatprep.mubr.msk.bf16.mxu1 %vm5449_vm14, %v9613_v58  ;;  %v6160_v34 = vpack.c.bf16 %v4151_v61, %v4150_v5  ;;  %v4190_v47 = vld [vmem:[%s9593_s3 + $0x710] sm:$0xff] }
 0x5ad   :  { %5995 = vmatpush3.bf16.msra.mxu1 %v5994_v37  ;;  %v4136_v37 = vld [vmem:[%s9593_s3 + $0x560] sm:$0xff] }
 0x5ae   :  { %5997 = vmatprep.subr.bf16.mxu1 %v5996_v18  ;;  %v6164_v18 = vpack.c.bf16 %v4153_v19, %v4152_v9  ;;  %v6166_v63 = vpack.c.bf16 %v4137_v26, %v4136_v37  ;;  %v4021_v19 = vld [vmem:[%s9593_s3 + $0x1c8] sm:$0xff]  ;;  %v4208_v37 = vld [vmem:[%s9593_s3 + $0x7a0] sm:$0xff] }
 0x5b0   :  { %5452 = vmatmul.mubr.msk.bf16.gmra.mrb[28].mxu1 %vm5451_vm2, %v9613_v58  ;;  %v6150_v58 = vpack.c.bf16 %v4129_v32, %v4128_v53  ;;  %v4018_v32 = vld [vmem:[%s9593_s3 + $0x1b0] sm:$0xff]  ;;  %vm5024_vm2 = vcmask 1045504  }
 0x5b1   :  { %5999 = vmatpush3.bf16.msra.mxu1 %v5998_v29  ;;  %v4138_v29 = vld [vmem:[%s9593_s3 + $0x570] sm:$0xff]  ;;  %v6024_v61 = vpack.c.bf16 %v4019_v59, %v4018_v32  ;;  %v4011_v59 = vld [vmem:[%s9593_s3 + $0x178] sm:$0xff] }
 0x5b2   :  { %6001 = vmatprep.subr.bf16.mxu1 %v6000_v46  ;;  %6151 = vmatpush3.bf16.msra.mxu0 %v6150_v58  ;;  %v6168_v46 = vpack.c.bf16 %v4155_v42, %v4154_v10  ;;  %v6170_v7 = vpack.c.bf16 %v4139_v3, %v4138_v29  ;;  %v4188_v58 = vld [vmem:[%s9593_s3 + $0x700] sm:$0xff]  ;;  %v4005_v42 = vld [vmem:[%s9593_s3 + $0x148] sm:$0xff]  ;;  %v4022_v3 = vld [vmem:[%s9593_s3 + $0x1d0] sm:$0xff] }
 0x5b3   :  { %6153 = vmatprep.subr.bf16.mxu0 %v6152_v8  ;;  %v4206_v8 = vld [vmem:[%s9593_s3 + $0x790] sm:$0xff]  ;;  %v6206_v5 = vpack.c.bf16 %v4189_v56, %v4188_v58  ;;  %v4004_v10 = vld [vmem:[%s9593_s3 + $0x140] sm:$0xff]  ;;  %v4215_v58 = vld [vmem:[%s9593_s3 + $0x7d8] sm:$0xff]  ;;  %v6038_v56 = vpack.c.bf16 %v4009_v17, %v4008_v6 }
 0x5b4   :  { %v4214_v32 = vld [vmem:[%s9593_s3 + $0x7d0] sm:$0xff]  ;;  %v4252_v17 = vld [vmem:[%s9593_s3 + $0x900] sm:$0xff] }
 0x5b5   :  { %6003 = vmatpush3.bf16.msra.mxu1 %v6002_v25  ;;  %v4204_v25 = vld [vmem:[%s9593_s3 + $0x780] sm:$0xff] }
 0x5b6   :  { %6005 = vmatprep.subr.bf16.mxu1 %v6004_v45  ;;  %6155 = vmatpush3.bf16.msra.mxu0 %v6154_v52  ;;  %v6204_v43 = vpack.c.bf16 %v4205_v51, %v4204_v25  ;;  %v4192_v25 = vld [vmem:[%s9593_s3 + $0x720] sm:$0xff]  ;;  %v4193_v51 = vld [vmem:[%s9593_s3 + $0x728] sm:$0xff] }
 0x5b7   :  { %6157 = vmatprep.subr.bf16.mxu0 %v6156_v27  ;;  %v4003_v27 = vld [vmem:[%s9593_s3 + $0x138] sm:$0xff]  ;;  %v6214_v15 = vpack.c.bf16 %v4193_v51, %v4192_v25  ;;  %v4030_v51 = vld [vmem:[%s9593_s3 + $0x210] sm:$0xff] }
 0x5b9   :  { %6007 = vmatpush3.bf16.msra.mxu1 %v6006_v22 }
 0x5ba   :  { %6009 = vmatprep.subr.bf16.mxu1 %v6008_v2  ;;  %6159 = vmatpush3.bf16.msra.mxu0 %v6158_v49 }
 0x5bb   :  { %6161 = vmatprep.subr.bf16.mxu0 %v6160_v34  ;;  %v6208_v34 = vpack.c.bf16 %v4207_v20, %v4206_v8 }
 0x5bd   :  { %6011 = vmatpush3.bf16.msra.mxu1 %v6010_v0 }
 0x5be   :  { %6013 = vmatprep.subr.bf16.mxu1 %v6012_v41  ;;  %6163 = vmatpush3.bf16.msra.mxu0 %v6162_v36  ;;  %v4191_v36 = vld [vmem:[%s9593_s3 + $0x718] sm:$0xff] }
 0x5bf   :  { %6165 = vmatprep.subr.bf16.mxu0 %v6164_v18  ;;  %v4209_v18 = vld [vmem:[%s9593_s3 + $0x7a8] sm:$0xff]  ;;  %v6210_v29 = vpack.c.bf16 %v4191_v36, %v4190_v47  ;;  %v4028_v36 = vld [vmem:[%s9593_s3 + $0x200] sm:$0xff] }
 0x5c2   :  { %6167 = vmatpush3.bf16.msra.mxu0 %v6166_v63  ;;  %v6026_v63 = vpack.c.bf16 %v4003_v27, %v4002_v38  ;;  %v6224_v38 = vpack.c.bf16 %v4215_v58, %v4214_v32  ;;  %v4198_v27 = vld [vmem:[%s9593_s3 + $0x750] sm:$0xff]  ;;  %v4035_v32 = vld [vmem:[%s9593_s3 + $0x238] sm:$0xff]  ;;  %v4052_v58 = vld [vmem:[%s9593_s3 + $0x2c0] sm:$0xff] }
 0x5c3   :  { %6169 = vmatprep.subr.bf16.mxu0 %v6168_v46  ;;  %v6028_v46 = vpack.c.bf16 %v4021_v19, %v4020_v33  ;;  %v4029_v19 = vld [vmem:[%s9593_s3 + $0x208] sm:$0xff] }
 0x5c6   :  { %6171 = vmatpush3.bf16.msra.mxu0 %v6170_v7  ;;  %v6212_v7 = vpack.c.bf16 %v4209_v18, %v4208_v37  ;;  %v4046_v37 = vld [vmem:[%s9593_s3 + $0x290] sm:$0xff] }
 0x5c7   :  { %6205 = vmatprep.subr.bf16.mxu0 %v6204_v43  ;;  %v4023_v43 = vld [vmem:[%s9593_s3 + $0x1d8] sm:$0xff] }
 0x5c8   :  { %v6032_v23 = vpack.c.bf16 %v4023_v43, %v4022_v3  ;;  %v6046_v3 = vpack.c.bf16 %v4029_v19, %v4028_v36  ;;  %v4031_v43 = vld [vmem:[%s9593_s3 + $0x218] sm:$0xff]  ;;  %v4256_v36 = vld [vmem:[%s9593_s3 + $0x920] sm:$0xff]  ;;  %v4257_v19 = vld [vmem:[%s9593_s3 + $0x928] sm:$0xff] }
 0x673   :  { %v5495_v45 = vpop.f32.mrb[20].mxu1 }
 0x674   :  { %v5496_v44 = vpop.f32.mrb[21].mxu1 }
 0x675   :  { %v5497_v48 = vadd.f32 %v5496_v44, %v5495_v45  ;;  %v5498_v22 = vpop.f32.mrb[22].mxu1  ;;  %v4210_v45 = vld [vmem:[%s9593_s3 + $0x7b0] sm:$0xff]  ;;  %v4211_v44 = vld [vmem:[%s9593_s3 + $0x7b8] sm:$0xff] }
 0x676   :  { %v5499_v39 = vpop.f32.mrb[23].mxu1  ;;  %v6216_v30 = vpack.c.bf16 %v4211_v44, %v4210_v45  ;;  %v4048_v45 = vld [vmem:[%s9593_s3 + $0x2a0] sm:$0xff] }
 0x677   :  { %vm3914_vm5 = vcmp.ge.f32.partialorder %v5497_v48, 0.5  ;;  %v8696_v2 = vadd.f32 %v5499_v39, %v5498_v22  ;;  %v6030_v48 = vpack.c.bf16 %v4005_v42, %v4004_v10  ;;  %v4006_v22 = vld [vmem:[%s9593_s3 + $0x150] sm:$0xff]  ;;  %v4007_v39 = vld [vmem:[%s9593_s3 + $0x158] sm:$0xff]  ;;  %v4201_v10 = vld [vmem:[%s9593_s3 + $0x768] sm:$0xff] }
 0x678   :  { %v8708_v0 = vsel %vm3914_vm5, 1.0, %v8704_v62 }
 0x679   :  { %v3930_v41 = vrot.slane %v8708_v0, 2  ;;  %v3934_v60 = vrot.slane %v8708_v0, 6  ;;  %vm3915_vm11 = vcmp.ge.f32.partialorder %v8696_v2, 0.5  ;;  %v4082_v2 = vld [vmem:[%s9593_s3 + $0x3b0] sm:$0xff] }
 0x67a   :  { %v8911_v42 = vsel %vm3915_vm11, 1.0, %v8704_v62 }
 0x67b   :  { %4348 = vmatprep.mubr.f32.mxu1 %v3930_v41  ;;  %v5501_v24 = vpop.f32.mrb[24].mxu1  ;;  %v4194_v41 = vld [vmem:[%s9593_s3 + $0x730] sm:$0xff] }
 0x67c   :  { %5458 = vmatmul.mubr.msk.f32.vlgmr.msra.gmra.mrb[32].mxu1 %vm3914_vm5, %v6604_v16  ;;  %v5502_v14 = vpop.f32.mrb[25].mxu1 }
 0x67d   :  { %6015 = vmatpush3.bf16.msra.mxu1 %v6014_v54  ;;  %4418 = vmatprep.mubr.f32.mxu1 %v3934_v60  ;;  %v8732_v11 = vadd.f32 %v5502_v14, %v5501_v24  ;;  %v5504_v53 = vpop.f32.mrb[26].mxu1  ;;  %v4195_v54 = vld [vmem:[%s9593_s3 + $0x738] sm:$0xff]  ;;  %v6034_v60 = vpack.c.bf16 %v4007_v39, %v4006_v22  ;;  %v4202_v39 = vld [vmem:[%s9593_s3 + $0x770] sm:$0xff] }
 0x67e   :  { %6017 = vmatprep.subr.bf16.mxu1 %v6016_v12  ;;  %v5505_v31 = vpop.f32.mrb[27].mxu1  ;;  %v4025_v12 = vld [vmem:[%s9593_s3 + $0x1e8] sm:$0xff]  ;;  %v6218_v24 = vpack.c.bf16 %v4195_v54, %v4194_v41  ;;  %v4032_v54 = vld [vmem:[%s9593_s3 + $0x220] sm:$0xff] }
 0x67f   :  { %vm3916_vm6 = vcmp.ge.f32.partialorder %v8732_v11, 0.5  ;;  %v8753_v52 = vadd.f32 %v5505_v31, %v5504_v53  ;;  %v6036_v14 = vpack.c.bf16 %v4025_v12, %v4024_v4  ;;  %v4197_v53 = vld [vmem:[%s9593_s3 + $0x748] sm:$0xff]  ;;  %v4010_v31 = vld [vmem:[%s9593_s3 + $0x170] sm:$0xff]  ;;  %v6050_v4 = vpack.c.bf16 %v4031_v43, %v4030_v51  ;;  %v4259_v43 = vld [vmem:[%s9593_s3 + $0x938] sm:$0xff] }
 0x680   :  { %v8758_v57 = vsel %vm3916_vm6, 1.0, %v8704_v62  ;;  %v6222_v8 = vpack.c.bf16 %v4197_v53, %v4196_v28  ;;  %v6042_v33 = vpack.c.bf16 %v4011_v59, %v4010_v31  ;;  %v4033_v12 = vld [vmem:[%s9593_s3 + $0x228] sm:$0xff]  ;;  %v4258_v51 = vld [vmem:[%s9593_s3 + $0x930] sm:$0xff]  ;;  %v4179_v11 = vld [vmem:[%s9593_s3 + $0x6b8] sm:$0xff] }
 0x681   :  { %6019 = vmatpush3.bf16.msra.mxu1 %v6018_v35  ;;  %v3946_v40 = vrot.slane %v8758_v57, 4  ;;  %v3948_v49 = vrot.slane %v8758_v57, 6  ;;  %vm3917_vm9 = vcmp.ge.f32.partialorder %v8753_v52, 0.5  ;;  %v4026_v35 = vld [vmem:[%s9593_s3 + $0x1f0] sm:$0xff]  ;;  %v4053_v31 = vld [vmem:[%s9593_s3 + $0x2c8] sm:$0xff]  ;;  %v4243_v52 = vld [vmem:[%s9593_s3 + $0x8b8] sm:$0xff] }
 0x682   :  { %6021 = vmatprep.subr.bf16.mxu1 %v6020_v55  ;;  %v8781_v9 = vsel %vm3917_vm9, 1.0, %v8704_v62  ;;  %v4027_v55 = vld [vmem:[%s9593_s3 + $0x1f8] sm:$0xff] }
 0x683   :  { %4698 = vmatprep.mubr.f32.mxu0 %v3948_v49  ;;  %v3955_v26 = vrot.slane %v8781_v9, 6  ;;  %v6040_v20 = vpack.c.bf16 %v4027_v55, %v4026_v35  ;;  %v4045_v49 = vld [vmem:[%s9593_s3 + $0x288] sm:$0xff]  ;;  %v4271_v35 = vld [vmem:[%s9593_s3 + $0x998] sm:$0xff]  ;;  %v3953_v28 = vrot.slane %v8781_v9, 4  ;;  %v4034_v55 = vld [vmem:[%s9593_s3 + $0x230] sm:$0xff] }
 0x684   :  { %4699 = vmatmul.mubr.f32.vlgmr.msra.gmra.mrb[14].mxu0 %v3946_v40  ;;  %v4199_v40 = vld [vmem:[%s9593_s3 + $0x758] sm:$0xff] }
 0x685   :  { %6023 = vmatpush3.bf16.msra.mxu1 %v6022_v50  ;;  %6207 = vmatpush3.bf16.msra.mxu0 %v6206_v5  ;;  %v4044_v50 = vld [vmem:[%s9593_s3 + $0x280] sm:$0xff] }
 0x686   :  { %6025 = vmatprep.subr.bf16.mxu1 %v6024_v61  ;;  %6209 = vmatprep.subr.bf16.mxu0 %v6208_v34  ;;  %v4216_v5 = vld [vmem:[%s9593_s3 + $0x7e0] sm:$0xff]  ;;  %v4217_v61 = vld [vmem:[%s9593_s3 + $0x7e8] sm:$0xff]  ;;  %v6226_v34 = vpack.c.bf16 %v4199_v40, %v4198_v27  ;;  %v6044_v47 = vpack.c.bf16 %v4045_v49, %v4044_v50  ;;  %v6058_v27 = vpack.c.bf16 %v4035_v32, %v4034_v55  ;;  %v4262_v55 = vld [vmem:[%s9593_s3 + $0x950] sm:$0xff] }
 0x687   :  { %4838 = vmatprep.mubr.f32.mxu0 %v3955_v26  ;;  %v6228_v18 = vpack.c.bf16 %v4217_v61, %v4216_v5  ;;  %v4047_v26 = vld [vmem:[%s9593_s3 + $0x298] sm:$0xff]  ;;  %v4272_v50 = vld [vmem:[%s9593_s3 + $0x9a0] sm:$0xff]  ;;  %v6060_v40 = vpack.c.bf16 %v4053_v31, %v4052_v58  ;;  %v4037_v5 = vld [vmem:[%s9593_s3 + $0x248] sm:$0xff] }
 0x688   :  { %v6048_v25 = vpack.c.bf16 %v4047_v26, %v4046_v37  ;;  %v4036_v49 = vld [vmem:[%s9593_s3 + $0x240] sm:$0xff]  ;;  %v4054_v61 = vld [vmem:[%s9593_s3 + $0x2d0] sm:$0xff]  ;;  %v4263_v32 = vld [vmem:[%s9593_s3 + $0x958] sm:$0xff] }
 0x689   :  { %6027 = vmatpush3.bf16.msra.mxu1 %v6026_v63  ;;  %6211 = vmatpush3.bf16.msra.mxu0 %v6210_v29  ;;  %v4200_v63 = vld [vmem:[%s9593_s3 + $0x760] sm:$0xff]  ;;  %v4218_v29 = vld [vmem:[%s9593_s3 + $0x7f0] sm:$0xff]  ;;  %v6062_v26 = vpack.c.bf16 %v4037_v5, %v4036_v49  ;;  %v6290_v49 = vpack.c.bf16 %v4263_v32, %v4262_v55 }
 0x68a   :  { %6029 = vmatprep.subr.bf16.mxu1 %v6028_v46  ;;  %6213 = vmatprep.subr.bf16.mxu0 %v6212_v7  ;;  %v4219_v46 = vld [vmem:[%s9593_s3 + $0x7f8] sm:$0xff]  ;;  %v3932_v7 = vrot.slane %v8708_v0, 4  ;;  %v6230_v44 = vpack.c.bf16 %v4201_v10, %v4200_v63  ;;  %v4049_v0 = vld [vmem:[%s9593_s3 + $0x2a8] sm:$0xff]  ;;  %v4274_v37 = vld [vmem:[%s9593_s3 + $0x9b0] sm:$0xff] }
 0x68b   :  { %v6232_v22 = vpack.c.bf16 %v4219_v46, %v4218_v29  ;;  %v6052_v41 = vpack.c.bf16 %v4049_v0, %v4048_v45  ;;  %v4038_v10 = vld [vmem:[%s9593_s3 + $0x250] sm:$0xff]  ;;  %v4039_v29 = vld [vmem:[%s9593_s3 + $0x258] sm:$0xff]  ;;  %v4056_v46 = vld [vmem:[%s9593_s3 + $0x2e0] sm:$0xff] }
 0x68c   :  { %v4276_v45 = vld [vmem:[%s9593_s3 + $0x9c0] sm:$0xff] }
 0x68d   :  { %6031 = vmatpush3.bf16.msra.mxu1 %v6030_v48  ;;  %6215 = vmatpush3.bf16.msra.mxu0 %v6214_v15  ;;  %v3937_v48 = vrot.slane %v8911_v42, 2  ;;  %v4203_v15 = vld [vmem:[%s9593_s3 + $0x778] sm:$0xff]  ;;  %v4280_v31 = vld [vmem:[%s9593_s3 + $0x9e0] sm:$0xff] }
 0x68e   :  { %6033 = vmatprep.subr.bf16.mxu1 %v6032_v23  ;;  %6217 = vmatprep.subr.bf16.mxu0 %v6216_v30  ;;  %v4268_v23 = vld [vmem:[%s9593_s3 + $0x980] sm:$0xff]  ;;  %v4269_v30 = vld [vmem:[%s9593_s3 + $0x988] sm:$0xff]  ;;  %v6234_v1 = vpack.c.bf16 %v4203_v15, %v4202_v39  ;;  %v4058_v15 = vld [vmem:[%s9593_s3 + $0x2f0] sm:$0xff] }
 0x68f   :  { %v6268_v6 = vpack.c.bf16 %v4269_v30, %v4268_v23  ;;  %v4041_v39 = vld [vmem:[%s9593_s3 + $0x268] sm:$0xff]  ;;  %v6282_v23 = vpack.c.bf16 %v4259_v43, %v4258_v51  ;;  %v4267_v51 = vld [vmem:[%s9593_s3 + $0x978] sm:$0xff] }
 0x691   :  { %6035 = vmatpush3.bf16.msra.mxu1 %v6034_v60  ;;  %6219 = vmatpush3.bf16.msra.mxu0 %v6218_v24  ;;  %v4051_v60 = vld [vmem:[%s9593_s3 + $0x2b8] sm:$0xff]  ;;  %v4253_v24 = vld [vmem:[%s9593_s3 + $0x908] sm:$0xff] }
 0x692   :  { %6037 = vmatprep.subr.bf16.mxu1 %v6036_v14  ;;  %6221 = vmatprep.subr.bf16.mxu0 %v6220_v21  ;;  %v4270_v14 = vld [vmem:[%s9593_s3 + $0x990] sm:$0xff]  ;;  %v6054_v21 = vpack.c.bf16 %v4033_v12, %v4032_v54  ;;  %v6056_v53 = vpack.c.bf16 %v4051_v60, %v4050_v13  ;;  %v4261_v54 = vld [vmem:[%s9593_s3 + $0x948] sm:$0xff]  ;;  %v4279_v13 = vld [vmem:[%s9593_s3 + $0x9d8] sm:$0xff]  ;;  %v5507_v60 = vpop.f32.mrb[28].mxu1 }
 0x693   :  { %v6272_v59 = vpack.c.bf16 %v4271_v35, %v4270_v14  ;;  %v4278_v12 = vld [vmem:[%s9593_s3 + $0x9d0] sm:$0xff]  ;;  %v4076_v14 = vld [vmem:[%s9593_s3 + $0x380] sm:$0xff] }
 0x695   :  { %6039 = vmatpush3.bf16.msra.mxu1 %v6038_v56  ;;  %6223 = vmatpush3.bf16.msra.mxu0 %v6222_v8  ;;  %v6270_v56 = vpack.c.bf16 %v4253_v24, %v4252_v17  ;;  %v4254_v8 = vld [vmem:[%s9593_s3 + $0x910] sm:$0xff]  ;;  %v4043_v24 = vld [vmem:[%s9593_s3 + $0x278] sm:$0xff] }
 0x696   :  { %6041 = vmatprep.subr.bf16.mxu1 %v6040_v20  ;;  %6225 = vmatprep.subr.bf16.mxu0 %v6224_v38  ;;  %v4255_v20 = vld [vmem:[%s9593_s3 + $0x918] sm:$0xff]  ;;  %v4273_v38 = vld [vmem:[%s9593_s3 + $0x9a8] sm:$0xff]  ;;  %v4042_v17 = vld [vmem:[%s9593_s3 + $0x270] sm:$0xff] }
 0x699   :  { %6043 = vmatpush3.bf16.msra.mxu1 %v6042_v33  ;;  %6227 = vmatpush3.bf16.msra.mxu0 %v6226_v34  ;;  %v6274_v33 = vpack.c.bf16 %v4255_v20, %v4254_v8  ;;  %v4055_v34 = vld [vmem:[%s9593_s3 + $0x2d8] sm:$0xff]  ;;  %v6074_v20 = vpack.c.bf16 %v4043_v24, %v4042_v17 }
 0x69a   :  { %6045 = vmatprep.subr.bf16.mxu1 %v6044_v47  ;;  %6229 = vmatprep.subr.bf16.mxu0 %v6228_v18  ;;  %v6276_v47 = vpack.c.bf16 %v4273_v38, %v4272_v50  ;;  %v4275_v18 = vld [vmem:[%s9593_s3 + $0x9b8] sm:$0xff]  ;;  %v6064_v63 = vpack.c.bf16 %v4055_v34, %v4054_v61  ;;  %v4060_v38 = vld [vmem:[%s9593_s3 + $0x300] sm:$0xff] }
 0x69b   :  { %v4079_v61 = vld [vmem:[%s9593_s3 + $0x398] sm:$0xff]  ;;  %v4264_v34 = vld [vmem:[%s9593_s3 + $0x960] sm:$0xff] }
 0x69c   :  { %4419 = vmatmul.mubr.f32.vlgmr.msra.gmra.mrb[34].mxu1 %v3932_v7  ;;  %v4057_v7 = vld [vmem:[%s9593_s3 + $0x2e8] sm:$0xff]  ;;  %v4087_v17 = vld [vmem:[%s9593_s3 + $0x3d8] sm:$0xff] }
 0x69d   :  { %6047 = vmatpush3.bf16.msra.mxu1 %v6046_v3  ;;  %4488 = vmatprep.mubr.f32.mxu1 %v3937_v48  ;;  %v6278_v3 = vpack.c.bf16 %v4257_v19, %v4256_v36  ;;  %v6066_v48 = vpack.c.bf16 %v4039_v29, %v4038_v10  ;;  %v6068_v0 = vpack.c.bf16 %v4057_v7, %v4056_v46  ;;  %v4282_v36 = vld [vmem:[%s9593_s3 + $0x9f0] sm:$0xff]  ;;  %v4080_v10 = vld [vmem:[%s9593_s3 + $0x3a0] sm:$0xff]  ;;  %v3941_v46 = vrot.slane %v8911_v42, 6 }
 0x69e   :  { %6049 = vmatprep.subr.bf16.mxu1 %v6048_v25  ;;  %6231 = vmatpush3.bf16.msra.mxu0 %v6230_v44  ;;  %v6280_v25 = vpack.c.bf16 %v4275_v18, %v4274_v37  ;;  %v4277_v44 = vld [vmem:[%s9593_s3 + $0x9c8] sm:$0xff] }
 0x69f   :  { %6233 = vmatprep.subr.bf16.mxu0 %v6232_v22  ;;  %v4040_v22 = vld [vmem:[%s9593_s3 + $0x260] sm:$0xff]  ;;  %v6284_v30 = vpack.c.bf16 %v4277_v44, %v4276_v45 }
 0x6a0   :  { %v4064_v44 = vld [vmem:[%s9593_s3 + $0x320] sm:$0xff] }
 0x6a1   :  { %6051 = vmatpush3.bf16.msra.mxu1 %v6050_v4  ;;  %v4059_v4 = vld [vmem:[%s9593_s3 + $0x2f8] sm:$0xff] }
 0x6a2   :  { %6053 = vmatprep.subr.bf16.mxu1 %v6052_v41  ;;  %6235 = vmatpush3.bf16.msra.mxu0 %v6234_v1  ;;  %v4260_v41 = vld [vmem:[%s9593_s3 + $0x940] sm:$0xff]  ;;  %v6070_v1 = vpack.c.bf16 %v4041_v39, %v4040_v22  ;;  %v4083_v22 = vld [vmem:[%s9593_s3 + $0x3b8] sm:$0xff] }
 0x6a3   :  { %6269 = vmatprep.subr.bf16.mxu0 %v6268_v6  ;;  %v6072_v6 = vpack.c.bf16 %v4059_v4, %v4058_v15  ;;  %v6286_v35 = vpack.c.bf16 %v4261_v54, %v4260_v41  ;;  %v4066_v4 = vld [vmem:[%s9593_s3 + $0x330] sm:$0xff]  ;;  %v4084_v41 = vld [vmem:[%s9593_s3 + $0x3c0] sm:$0xff]  ;;  %v4085_v54 = vld [vmem:[%s9593_s3 + $0x3c8] sm:$0xff] }
 0x6a5   :  { %6055 = vmatpush3.bf16.msra.mxu1 %v6054_v21  ;;  %4839 = vmatmul.mubr.f32.vlgmr.msra.gmra.mrb[24].mxu0 %v3953_v28  ;;  %v5508_v21 = vpop.f32.mrb[29].mxu1  ;;  %v4077_v28 = vld [vmem:[%s9593_s3 + $0x388] sm:$0xff] }
 0x6a6   :  { %6057 = vmatprep.subr.bf16.mxu1 %v6056_v53  ;;  %6271 = vmatpush3.bf16.msra.mxu0 %v6270_v56  ;;  %v6288_v53 = vpack.c.bf16 %v4279_v13, %v4278_v12  ;;  %v9084_v58 = vadd.f32 %v5508_v21, %v5507_v60  ;;  %v5510_v56 = vpop.f32.mrb[30].mxu1  ;;  %v6076_v50 = vpack.c.bf16 %v4077_v28, %v4076_v14  ;;  %v4069_v60 = vld [vmem:[%s9593_s3 + $0x348] sm:$0xff]  ;;  %v4071_v21 = vld [vmem:[%s9593_s3 + $0x358] sm:$0xff]  ;;  %v4088_v28 = vld [vmem:[%s9593_s3 + $0x3e0] sm:$0xff] }
 0x6a7   :  { %6273 = vmatprep.subr.bf16.mxu0 %v6272_v59  ;;  %v4281_v59 = vld [vmem:[%s9593_s3 + $0x9e8] sm:$0xff]  ;;  %v5511_v8 = vpop.f32.mrb[31].mxu1  ;;  %v6092_v13 = vpack.c.bf16 %v4085_v54, %v4084_v41  ;;  %v4072_v56 = vld [vmem:[%s9593_s3 + $0x360] sm:$0xff] }
 0x6a8   :  { %vm3918_vm13 = vcmp.ge.f32.partialorder %v9084_v58, 0.5  ;;  %v4091_v8 = vld [vmem:[%s9593_s3 + $0x3f8] sm:$0xff] }
 0x6a9   :  { %6059 = vmatpush3.bf16.msra.mxu1 %v6058_v27  ;;  %v4061_v27 = vld [vmem:[%s9593_s3 + $0x308] sm:$0xff]  ;;  %v9105_v5 = vsel %vm3918_vm13, 1.0, %v8704_v62  ;;  %v4283_v62 = vld [vmem:[%s9593_s3 + $0x9f8] sm:$0xff] }
 0x6aa   :  { %6061 = vmatprep.subr.bf16.mxu1 %v6060_v40  ;;  %6275 = vmatpush3.bf16.msra.mxu0 %v6274_v33  ;;  %v4078_v40 = vld [vmem:[%s9593_s3 + $0x390] sm:$0xff]  ;;  %v6292_v33 = vpack.c.bf16 %v4281_v59, %v4280_v31  ;;  %v6078_v19 = vpack.c.bf16 %v4061_v27, %v4060_v38  ;;  %v3962_v37 = vrot.slane %v9105_v5, 6  ;;  %v6296_v7 = vpack.c.bf16 %v4283_v62, %v4282_v36  ;;  %v4073_v31 = vld [vmem:[%s9593_s3 + $0x368] sm:$0xff]  ;;  %v4075_v27 = vld [vmem:[%s9593_s3 + $0x378] sm:$0xff] }
 0x6ab   :  { %6277 = vmatprep.subr.bf16.mxu0 %v6276_v47  ;;  %v4265_v47 = vld [vmem:[%s9593_s3 + $0x968] sm:$0xff]  ;;  %v6080_v18 = vpack.c.bf16 %v4079_v61, %v4078_v40  ;;  %v3960_v15 = vrot.slane %v9105_v5, 4  ;;  %v4090_v59 = vld [vmem:[%s9593_s3 + $0x3f0] sm:$0xff]  ;;  %v4108_v40 = vld [vmem:[%s9593_s3 + $0x480] sm:$0xff] }
 0x6ac   :  { %v6294_v29 = vpack.c.bf16 %v4265_v47, %v4264_v34  ;;  %4978 = vmatprep.mubr.f32.mxu0 %v3962_v37  ;;  %v4074_v38 = vld [vmem:[%s9593_s3 + $0x370] sm:$0xff]  ;;  %v4092_v34 = vld [vmem:[%s9593_s3 + $0x400] sm:$0xff]  ;;  %v4093_v47 = vld [vmem:[%s9593_s3 + $0x408] sm:$0xff]  ;;  %v3944_v37 = vrot.slane %v8758_v57, 2 }
 0x6ad   :  { %6063 = vmatpush3.bf16.msra.mxu1 %v6062_v26  ;;  %v4062_v26 = vld [vmem:[%s9593_s3 + $0x310] sm:$0xff]  ;;  %v6106_v61 = vpack.c.bf16 %v4075_v27, %v4074_v38  ;;  %v4111_v62 = vld [vmem:[%s9593_s3 + $0x498] sm:$0xff]  ;;  %v4113_v57 = vld [vmem:[%s9593_s3 + $0x4a8] sm:$0xff] }
 0x6ae   :  { %6065 = vmatprep.subr.bf16.mxu1 %v6064_v63  ;;  %6279 = vmatpush3.bf16.msra.mxu0 %v6278_v3  ;;  %v4063_v63 = vld [vmem:[%s9593_s3 + $0x318] sm:$0xff]  ;;  %v4081_v3 = vld [vmem:[%s9593_s3 + $0x3a8] sm:$0xff]  ;;  %v4110_v36 = vld [vmem:[%s9593_s3 + $0x490] sm:$0xff] }
 0x6af   :  { %6281 = vmatprep.subr.bf16.mxu0 %v6280_v25  ;;  %v4266_v25 = vld [vmem:[%s9593_s3 + $0x970] sm:$0xff]  ;;  %v6082_v43 = vpack.c.bf16 %v4063_v63, %v4062_v26  ;;  %v6084_v45 = vpack.c.bf16 %v4081_v3, %v4080_v10  ;;  %v6112_v26 = vpack.c.bf16 %v4111_v62, %v4110_v36  ;;  %v4095_v10 = vld [vmem:[%s9593_s3 + $0x418] sm:$0xff]  ;;  %v4096_v3 = vld [vmem:[%s9593_s3 + $0x420] sm:$0xff] }
 0x6b0   :  { %v4094_v63 = vld [vmem:[%s9593_s3 + $0x410] sm:$0xff]  ;;  %v4175_v27 = vld [vmem:[%s9593_s3 + $0x698] sm:$0xff]  ;;  %v4177_v36 = vld [vmem:[%s9593_s3 + $0x6a8] sm:$0xff] }
 0x6b1   :  { %6067 = vmatpush3.bf16.msra.mxu1 %v6066_v48  ;;  %v4065_v48 = vld [vmem:[%s9593_s3 + $0x328] sm:$0xff]  ;;  %v4174_v38 = vld [vmem:[%s9593_s3 + $0x690] sm:$0xff] }
 0x6b2   :  { %6069 = vmatprep.subr.bf16.mxu1 %v6068_v0  ;;  %6283 = vmatpush3.bf16.msra.mxu0 %v6282_v23  ;;  %v6298_v0 = vpack.c.bf16 %v4267_v51, %v4266_v25  ;;  %v6086_v39 = vpack.c.bf16 %v4065_v48, %v4064_v44  ;;  %v6088_v23 = vpack.c.bf16 %v4083_v22, %v4082_v2  ;;  %v4114_v25 = vld [vmem:[%s9593_s3 + $0x4b0] sm:$0xff]  ;;  %v4115_v51 = vld [vmem:[%s9593_s3 + $0x4b8] sm:$0xff]  ;;  %v4117_v2 = vld [vmem:[%s9593_s3 + $0x4c8] sm:$0xff] }
 0x6b3   :  { %6285 = vmatprep.subr.bf16.mxu0 %v6284_v30  ;;  %v4067_v30 = vld [vmem:[%s9593_s3 + $0x338] sm:$0xff]  ;;  %v4098_v44 = vld [vmem:[%s9593_s3 + $0x430] sm:$0xff] }
 0x6b4   :  { %v6090_v12 = vpack.c.bf16 %v4067_v30, %v4066_v4  ;;  %v4099_v48 = vld [vmem:[%s9593_s3 + $0x438] sm:$0xff]  ;;  %v4118_v4 = vld [vmem:[%s9593_s3 + $0x4d0] sm:$0xff] }
 0x6b5   :  { %6071 = vmatpush3.bf16.msra.mxu1 %v6070_v1  ;;  %v4068_v1 = vld [vmem:[%s9593_s3 + $0x340] sm:$0xff]  ;;  %v6122_v22 = vpack.c.bf16 %v4099_v48, %v4098_v44  ;;  %v4119_v30 = vld [vmem:[%s9593_s3 + $0x4d8] sm:$0xff]  ;;  %v4166_v48 = vld [vmem:[%s9593_s3 + $0x650] sm:$0xff] }
 0x6b6   :  { %6073 = vmatprep.subr.bf16.mxu1 %v6072_v6  ;;  %6287 = vmatpush3.bf16.msra.mxu0 %v6286_v35  ;;  %v4086_v6 = vld [vmem:[%s9593_s3 + $0x3d0] sm:$0xff]  ;;  %v6094_v24 = vpack.c.bf16 %v4069_v60, %v4068_v1  ;;  %v6128_v54 = vpack.c.bf16 %v4119_v30, %v4118_v4  ;;  %v4120_v1 = vld [vmem:[%s9593_s3 + $0x4e0] sm:$0xff]  ;;  %v4121_v60 = vld [vmem:[%s9593_s3 + $0x4e8] sm:$0xff] }
 0x6b7   :  { %6289 = vmatprep.subr.bf16.mxu0 %v6288_v53  ;;  %v6096_v14 = vpack.c.bf16 %v4087_v17, %v4086_v6  ;;  %v4070_v35 = vld [vmem:[%s9593_s3 + $0x350] sm:$0xff]  ;;  %v4089_v53 = vld [vmem:[%s9593_s3 + $0x3e8] sm:$0xff]  ;;  %v6132_v17 = vpack.c.bf16 %v4121_v60, %v4120_v1  ;;  %v4171_v1 = vld [vmem:[%s9593_s3 + $0x678] sm:$0xff] }
 0x6b8   :  { %v6098_v55 = vpack.c.bf16 %v4071_v21, %v4070_v35  ;;  %v6100_v32 = vpack.c.bf16 %v4089_v53, %v4088_v28  ;;  %v4122_v35 = vld [vmem:[%s9593_s3 + $0x4f0] sm:$0xff]  ;;  %v4123_v21 = vld [vmem:[%s9593_s3 + $0x4f8] sm:$0xff]  ;;  %v4169_v4 = vld [vmem:[%s9593_s3 + $0x668] sm:$0xff] }
 0x6b9   :  { %6075 = vmatpush3.bf16.msra.mxu1 %v6074_v20  ;;  %v6102_v20 = vpack.c.bf16 %v4073_v31, %v4072_v56  ;;  %v6136_v53 = vpack.c.bf16 %v4123_v21, %v4122_v35  ;;  %v4172_v56 = vld [vmem:[%s9593_s3 + $0x680] sm:$0xff]  ;;  %v4173_v31 = vld [vmem:[%s9593_s3 + $0x688] sm:$0xff]  ;;  %v4186_v30 = vld [vmem:[%s9593_s3 + $0x6f0] sm:$0xff] }
 0x6ba   :  { %6077 = vmatprep.subr.bf16.mxu1 %v6076_v50  ;;  %6291 = vmatpush3.bf16.msra.mxu0 %v6290_v49  ;;  %v6104_v50 = vpack.c.bf16 %v4091_v8, %v4090_v59  ;;  %v4109_v49 = vld [vmem:[%s9593_s3 + $0x488] sm:$0xff]  ;;  %v6172_v8 = vpack.c.bf16 %v4173_v31, %v4172_v56  ;;  %v4236_v60 = vld [vmem:[%s9593_s3 + $0x880] sm:$0xff]  ;;  %v4238_v21 = vld [vmem:[%s9593_s3 + $0x890] sm:$0xff] }
 0x6bb   :  { %6293 = vmatprep.subr.bf16.mxu0 %v6292_v33  ;;  %v6108_v33 = vpack.c.bf16 %v4109_v49, %v4108_v40  ;;  %v6176_v49 = vpack.c.bf16 %v4175_v27, %v4174_v38  ;;  %v4221_v35 = vld [vmem:[%s9593_s3 + $0x808] sm:$0xff]  ;;  %v4222_v56 = vld [vmem:[%s9593_s3 + $0x810] sm:$0xff]  ;;  %v4223_v31 = vld [vmem:[%s9593_s3 + $0x818] sm:$0xff] }
 0x6bc   :  { %5459 = vmatmul.mubr.msk.f32.vlgmr.msra.gmra.mrb[36].mxu1 %vm3915_vm11, %v6604_v16  ;;  %v4225_v38 = vld [vmem:[%s9593_s3 + $0x828] sm:$0xff]  ;;  %v4242_v27 = vld [vmem:[%s9593_s3 + $0x8b0] sm:$0xff] }
 0x6bd   :  { %6079 = vmatpush3.bf16.msra.mxu1 %v6078_v19  ;;  %4558 = vmatprep.mubr.f32.mxu1 %v3941_v46  ;;  %v6110_v19 = vpack.c.bf16 %v4093_v47, %v4092_v34  ;;  %v3951_v34 = vrot.slane %v8781_v9, 2  ;;  %v4176_v47 = vld [vmem:[%s9593_s3 + $0x6a0] sm:$0xff] }
 0x6be   :  { %6081 = vmatprep.subr.bf16.mxu1 %v6080_v18  ;;  %6295 = vmatpush3.bf16.msra.mxu0 %v6294_v29  ;;  %v3939_v18 = vrot.slane %v8911_v42, 4  ;;  %v4112_v29 = vld [vmem:[%s9593_s3 + $0x4a0] sm:$0xff]  ;;  %v6114_v42 = vpack.c.bf16 %v4095_v10, %v4094_v63  ;;  %v4162_v10 = vld [vmem:[%s9593_s3 + $0x630] sm:$0xff] }
 0x6bf   :  { %6297 = vmatprep.subr.bf16.mxu0 %v6296_v7  ;;  %v6116_v46 = vpack.c.bf16 %v4113_v57, %v4112_v29  ;;  %v4097_v7 = vld [vmem:[%s9593_s3 + $0x428] sm:$0xff]  ;;  %v4160_v9 = vld [vmem:[%s9593_s3 + $0x620] sm:$0xff]  ;;  %v4163_v29 = vld [vmem:[%s9593_s3 + $0x638] sm:$0xff] }
 0x6c0   :  { %v4180_v57 = vld [vmem:[%s9593_s3 + $0x6c0] sm:$0xff] }
 0x6c1   :  { %6083 = vmatpush3.bf16.msra.mxu1 %v6082_v43  ;;  %v6118_v43 = vpack.c.bf16 %v4097_v7, %v4096_v3  ;;  %v4164_v7 = vld [vmem:[%s9593_s3 + $0x640] sm:$0xff] }
 0x6c2   :  { %6085 = vmatprep.subr.bf16.mxu1 %v6084_v45  ;;  %6299 = vmatpush3.bf16.msra.mxu0 %v6298_v0  ;;  %v6120_v45 = vpack.c.bf16 %v4115_v51, %v4114_v25  ;;  %v4116_v0 = vld [vmem:[%s9593_s3 + $0x4c0] sm:$0xff]  ;;  %v4165_v25 = vld [vmem:[%s9593_s3 + $0x648] sm:$0xff]  ;;  %v4182_v51 = vld [vmem:[%s9593_s3 + $0x6d0] sm:$0xff] }
 0x6c5   :  { %6087 = vmatpush3.bf16.msra.mxu1 %v6086_v39  ;;  %4979 = vmatmul.mubr.f32.vlgmr.msra.gmra.mrb[26].mxu0 %v3960_v15  ;;  %v6124_v39 = vpack.c.bf16 %v4117_v2, %v4116_v0  ;;  %v4100_v15 = vld [vmem:[%s9593_s3 + $0x440] sm:$0xff]  ;;  %v4167_v0 = vld [vmem:[%s9593_s3 + $0x658] sm:$0xff] }
 0x6c6   :  { %6089 = vmatprep.subr.bf16.mxu1 %v6088_v23  ;;  %v4101_v23 = vld [vmem:[%s9593_s3 + $0x448] sm:$0xff]  ;;  %v4184_v2 = vld [vmem:[%s9593_s3 + $0x6e0] sm:$0xff] }
 0x6c7   :  { %v6126_v41 = vpack.c.bf16 %v4101_v23, %v4100_v15  ;;  %v4168_v23 = vld [vmem:[%s9593_s3 + $0x660] sm:$0xff] }
 0x6c9   :  { %6091 = vmatpush3.bf16.msra.mxu1 %v6090_v12  ;;  %v4102_v12 = vld [vmem:[%s9593_s3 + $0x450] sm:$0xff] }
 0x6ca   :  { %6093 = vmatprep.subr.bf16.mxu1 %v6092_v13  ;;  %v4103_v13 = vld [vmem:[%s9593_s3 + $0x458] sm:$0xff] }
 0x6cb   :  { %v6130_v6 = vpack.c.bf16 %v4103_v13, %v4102_v12  ;;  %v4170_v13 = vld [vmem:[%s9593_s3 + $0x670] sm:$0xff] }
 0x6cd   :  { %6095 = vmatpush3.bf16.msra.mxu1 %v6094_v24  ;;  %v4104_v24 = vld [vmem:[%s9593_s3 + $0x460] sm:$0xff] }
 0x6ce   :  { %6097 = vmatprep.subr.bf16.mxu1 %v6096_v14  ;;  %v4105_v14 = vld [vmem:[%s9593_s3 + $0x468] sm:$0xff] }
 0x6cf   :  { %v6134_v28 = vpack.c.bf16 %v4105_v14, %v4104_v24  ;;  %v4220_v14 = vld [vmem:[%s9593_s3 + $0x800] sm:$0xff] }
 0x6d1   :  { %6099 = vmatpush3.bf16.msra.mxu1 %v6098_v55  ;;  %v4106_v55 = vld [vmem:[%s9593_s3 + $0x470] sm:$0xff] }
 0x6d2   :  { %6101 = vmatprep.subr.bf16.mxu1 %v6100_v32  ;;  %v4107_v32 = vld [vmem:[%s9593_s3 + $0x478] sm:$0xff] }
 0x6d3   :  { %v6138_v59 = vpack.c.bf16 %v4107_v32, %v4106_v55  ;;  %v3958_v55 = vrot.slane %v9105_v5, 2  ;;  %v6242_v5 = vpack.c.bf16 %v4223_v31, %v4222_v56 }
 0x6d5   :  { %6103 = vmatpush3.bf16.msra.mxu1 %v6102_v20  ;;  %v4156_v20 = vld [vmem:[%s9593_s3 + $0x600] sm:$0xff] }
 0x6d6   :  { %6105 = vmatprep.subr.bf16.mxu1 %v6104_v50  ;;  %v4157_v50 = vld [vmem:[%s9593_s3 + $0x608] sm:$0xff] }
 0x6d7   :  { %v6174_v40 = vpack.c.bf16 %v4157_v50, %v4156_v20  ;;  %v4224_v50 = vld [vmem:[%s9593_s3 + $0x820] sm:$0xff] }
 0x6d9   :  { %6107 = vmatpush3.bf16.msra.mxu1 %v6106_v61  ;;  %v4158_v61 = vld [vmem:[%s9593_s3 + $0x610] sm:$0xff] }
 0x6da   :  { %6109 = vmatprep.subr.bf16.mxu1 %v6108_v33  ;;  %v4159_v33 = vld [vmem:[%s9593_s3 + $0x618] sm:$0xff] }
 0x6db   :  { %v6178_v62 = vpack.c.bf16 %v4159_v33, %v4158_v61  ;;  %v4226_v61 = vld [vmem:[%s9593_s3 + $0x830] sm:$0xff]  ;;  %v4227_v33 = vld [vmem:[%s9593_s3 + $0x838] sm:$0xff] }
 0x6dc   :  { %4559 = vmatmul.mubr.f32.vlgmr.msra.gmra.mrb[38].mxu1 %v3939_v18  ;;  %v4178_v18 = vld [vmem:[%s9593_s3 + $0x6b0] sm:$0xff] }
 0x6dd   :  { %6111 = vmatpush3.bf16.msra.mxu1 %v6110_v19  ;;  %4628 = vmatprep.mubr.f32.mxu1 %v3944_v37  ;;  %v6180_v19 = vpack.c.bf16 %v4177_v36, %v4176_v47  ;;  %v4161_v37 = vld [vmem:[%s9593_s3 + $0x628] sm:$0xff]  ;;  %v6184_v63 = vpack.c.bf16 %v4179_v11, %v4178_v18  ;;  %v6250_v36 = vpack.c.bf16 %v4227_v33, %v4226_v61  ;;  %v4247_v18 = vld [vmem:[%s9593_s3 + $0x8d8] sm:$0xff]  ;;  %v5034_v33 = vld [vmem:[%s9594_s4 + $0x40] sm:$0xff] }
 0x6de   :  { %6113 = vmatprep.subr.bf16.mxu1 %v6112_v26  ;;  %v6182_v26 = vpack.c.bf16 %v4161_v37, %v4160_v9  ;;  %v4245_v47 = vld [vmem:[%s9593_s3 + $0x8c8] sm:$0xff]  ;;  %v4246_v37 = vld [vmem:[%s9593_s3 + $0x8d0] sm:$0xff] }
 0x6df   :  { %v4229_v9 = vld [vmem:[%s9593_s3 + $0x848] sm:$0xff] }
 0x6e1   :  { %6115 = vmatpush3.bf16.msra.mxu1 %v6114_v42  ;;  %v4181_v42 = vld [vmem:[%s9593_s3 + $0x6c8] sm:$0xff] }
 0x6e2   :  { %6117 = vmatprep.subr.bf16.mxu1 %v6116_v46  ;;  %v6186_v46 = vpack.c.bf16 %v4163_v29, %v4162_v10  ;;  %v6188_v3 = vpack.c.bf16 %v4181_v42, %v4180_v57  ;;  %v4231_v10 = vld [vmem:[%s9593_s3 + $0x858] sm:$0xff]  ;;  %v4248_v29 = vld [vmem:[%s9593_s3 + $0x8e0] sm:$0xff]  ;;  %v4249_v57 = vld [vmem:[%s9593_s3 + $0x8e8] sm:$0xff] }
 0x6e5   :  { %6119 = vmatpush3.bf16.msra.mxu1 %v6118_v43  ;;  %v4183_v43 = vld [vmem:[%s9593_s3 + $0x6d8] sm:$0xff] }
 0x6e6   :  { %6121 = vmatprep.subr.bf16.mxu1 %v6120_v45  ;;  %v6190_v45 = vpack.c.bf16 %v4165_v25, %v4164_v7  ;;  %v6192_v44 = vpack.c.bf16 %v4183_v43, %v4182_v51  ;;  %v4233_v7 = vld [vmem:[%s9593_s3 + $0x868] sm:$0xff]  ;;  %v4250_v25 = vld [vmem:[%s9593_s3 + $0x8f0] sm:$0xff]  ;;  %v4251_v51 = vld [vmem:[%s9593_s3 + $0x8f8] sm:$0xff] }
 0x6e9   :  { %6123 = vmatpush3.bf16.msra.mxu1 %v6122_v22  ;;  %v4185_v22 = vld [vmem:[%s9593_s3 + $0x6e8] sm:$0xff] }
 0x6ea   :  { %6125 = vmatprep.subr.bf16.mxu1 %v6124_v39  ;;  %v6194_v39 = vpack.c.bf16 %v4167_v0, %v4166_v48  ;;  %v6196_v15 = vpack.c.bf16 %v4185_v22, %v4184_v2  ;;  %v4235_v48 = vld [vmem:[%s9593_s3 + $0x878] sm:$0xff]  ;;  %v9614_v2 = vmov 0.0|0.0  }
 0x6eb   :  { %v9514_v22 = vld [vmem:[#allocation4] sm:$0xff] }
 0x6ed   :  { %6127 = vmatpush3.bf16.msra.mxu1 %v6126_v41  ;;  %v4187_v41 = vld [vmem:[%s9593_s3 + $0x6f8] sm:$0xff] }
 0x6ee   :  { %6129 = vmatprep.subr.bf16.mxu1 %v6128_v54  ;;  %v6198_v54 = vpack.c.bf16 %v4169_v4, %v4168_v23  ;;  %v6200_v12 = vpack.c.bf16 %v4187_v41, %v4186_v30 }
 0x6f1   :  { %6131 = vmatpush3.bf16.msra.mxu1 %v6130_v6  ;;  %v4237_v6 = vld [vmem:[%s9593_s3 + $0x888] sm:$0xff] }
 0x6f2   :  { %6133 = vmatprep.subr.bf16.mxu1 %v6132_v17  ;;  %v6202_v17 = vpack.c.bf16 %v4171_v1, %v4170_v13  ;;  %v6236_v24 = vpack.c.bf16 %v4237_v6, %v4236_v60 }
 0x6f5   :  { %6135 = vmatpush3.bf16.msra.mxu1 %v6134_v28  ;;  %v4239_v28 = vld [vmem:[%s9593_s3 + $0x898] sm:$0xff] }
 0x6f6   :  { %6137 = vmatprep.subr.bf16.mxu1 %v6136_v53  ;;  %v6238_v53 = vpack.c.bf16 %v4221_v35, %v4220_v14  ;;  %v6240_v32 = vpack.c.bf16 %v4239_v28, %v4238_v21 }
 0x6f9   :  { %6139 = vmatpush3.bf16.msra.mxu1 %v6138_v59  ;;  %v4240_v59 = vld [vmem:[%s9593_s3 + $0x8a0] sm:$0xff] }
 0x6fa   :  { %6173 = vmatprep.subr.bf16.mxu1 %v6172_v8  ;;  %v4241_v8 = vld [vmem:[%s9593_s3 + $0x8a8] sm:$0xff] }
 0x6fb   :  { %v6244_v20 = vpack.c.bf16 %v4241_v8, %v4240_v59  ;;  %v5028_v59 = vld [vmem:[%s9594_s4 + $0x10] sm:$0xff]  ;;  %v5029_v8 = vld [vmem:[%s9594_s4 + $0x18] sm:$0xff] }
 0x6fc   :  { %5460 = vmatmul.mubr.msk.f32.vlgmr.msra.gmra.mrb[40].mxu1 %vm3916_vm6, %v6604_v16 }
 0x6fd   :  { %6175 = vmatpush3.bf16.msra.mxu1 %v6174_v40  ;;  %4768 = vmatprep.mubr.f32.mxu1 %v3951_v34  ;;  %v6246_v40 = vpack.c.bf16 %v4225_v38, %v4224_v50  ;;  %v4244_v34 = vld [vmem:[%s9593_s3 + $0x8c0] sm:$0xff] }
 0x6fe   :  { %6177 = vmatprep.subr.bf16.mxu1 %v6176_v49  ;;  %v6248_v49 = vpack.c.bf16 %v4243_v52, %v4242_v27  ;;  %v5030_v38 = vld [vmem:[%s9594_s4 + $0x20] sm:$0xff]  ;;  %v5031_v27 = vld [vmem:[%s9594_s4 + $0x28] sm:$0xff] }
 0x6ff   :  { %v6307_v52 = vpack.c.bf16 %v5031_v27, %v5030_v38 }
 0x701   :  { %6179 = vmatpush3.bf16.msra.mxu1 %v6178_v62  ;;  %v6252_v62 = vpack.c.bf16 %v4245_v47, %v4244_v34  ;;  %v5035_v34 = vld [vmem:[%s9594_s4 + $0x48] sm:$0xff] }
 0x702   :  { %6181 = vmatprep.subr.bf16.mxu1 %v6180_v19  ;;  %v4228_v19 = vld [vmem:[%s9593_s3 + $0x840] sm:$0xff]  ;;  %v6313_v47 = vpack.c.bf16 %v5035_v34, %v5034_v33 }
 0x703   :  { %v6254_v11 = vpack.c.bf16 %v4229_v9, %v4228_v19  ;;  %v5038_v9 = vld [vmem:[%s9594_s4 + $0x60] sm:$0xf] }
 0x705   :  { %6183 = vmatpush3.bf16.msra.mxu1 %v6182_v26  ;;  %v6256_v26 = vpack.c.bf16 %v4247_v18, %v4246_v37 }
 0x706   :  { %6185 = vmatprep.subr.bf16.mxu1 %v6184_v63  ;;  %v4230_v63 = vld [vmem:[%s9593_s3 + $0x850] sm:$0xff] }
 0x707   :  { %v6258_v42 = vpack.c.bf16 %v4231_v10, %v4230_v63 }
 0x709   :  { %6187 = vmatpush3.bf16.msra.mxu1 %v6186_v46  ;;  %v6260_v46 = vpack.c.bf16 %v4249_v57, %v4248_v29 }
 0x70a   :  { %6189 = vmatprep.subr.bf16.mxu1 %v6188_v3  ;;  %v4232_v3 = vld [vmem:[%s9593_s3 + $0x860] sm:$0xff] }
 0x70b   :  { %v6262_v43 = vpack.c.bf16 %v4233_v7, %v4232_v3 }
 0x70d   :  { %6191 = vmatpush3.bf16.msra.mxu1 %v6190_v45  ;;  %v6264_v45 = vpack.c.bf16 %v4251_v51, %v4250_v25 }
 0x70e   :  { %6193 = vmatprep.subr.bf16.mxu1 %v6192_v44  ;;  %v4234_v44 = vld [vmem:[%s9593_s3 + $0x870] sm:$0xff] }
 0x70f   :  { %v6266_v0 = vpack.c.bf16 %v4235_v48, %v4234_v44 }
 0x711   :  { %6195 = vmatpush3.bf16.msra.mxu1 %v6194_v39 }
 0x712   :  { %6197 = vmatprep.subr.bf16.mxu1 %v6196_v15 }
 0x715   :  { %6199 = vmatpush3.bf16.msra.mxu1 %v6198_v54 }
 0x716   :  { %6201 = vmatprep.subr.bf16.mxu1 %v6200_v12 }
 0x719   :  { %6203 = vmatpush3.bf16.msra.mxu1 %v6202_v17 }
 0x71a   :  { %6237 = vmatprep.subr.bf16.mxu1 %v6236_v24 }
 0x71c   :  { %5461 = vmatmul.mubr.msk.f32.vlgmr.msra.gmra.mrb[42].mxu1 %vm3917_vm9, %v6604_v16 }
 0x71d   :  { %6239 = vmatpush3.bf16.msra.mxu1 %v6238_v53  ;;  %4908 = vmatprep.mubr.f32.mxu1 %v3958_v55  ;;  %v5026_v53 = vld [vmem:[%s9594_s4] sm:$0xff]  ;;  %v5027_v55 = vld [vmem:[%s9594_s4 + $0x8] sm:$0xff] }
 0x71e   :  { %6241 = vmatprep.subr.bf16.mxu1 %v6240_v32  ;;  %v6301_v32 = vpack.c.bf16 %v5027_v55, %v5026_v53 }
 0x721   :  { %6243 = vmatpush3.bf16.msra.mxu1 %v6242_v5 }
 0x722   :  { %6245 = vmatprep.subr.bf16.mxu1 %v6244_v20  ;;  %v6304_v20 = vpack.c.bf16 %v5029_v8, %v5028_v59 }
 0x725   :  { %6247 = vmatpush3.bf16.msra.mxu1 %v6246_v40  ;;  %v5032_v40 = vld [vmem:[%s9594_s4 + $0x30] sm:$0xff] }
 0x726   :  { %6249 = vmatprep.subr.bf16.mxu1 %v6248_v49  ;;  %v5033_v49 = vld [vmem:[%s9594_s4 + $0x38] sm:$0xff] }
 0x727   :  { %v6310_v61 = vpack.c.bf16 %v5033_v49, %v5032_v40 }
 0x729   :  { %6251 = vmatpush3.bf16.msra.mxu1 %v6250_v36  ;;  %v5036_v36 = vld [vmem:[%s9594_s4 + $0x50] sm:$0xff] }
 0x72a   :  { %6253 = vmatprep.subr.bf16.mxu1 %v6252_v62  ;;  %v5037_v62 = vld [vmem:[%s9594_s4 + $0x58] sm:$0xff]  ;;  %s6605_s4 = smov [#allocation6]  }
 0x72b   :  { %v6316_v19 = vpack.c.bf16 %v5037_v62, %v5036_v36  ;;  %s5186_s27 = sshll.u32 %s6605_s4, 4  ;;  %s5187_s27 = int_to_ptr.vmem [resolvable:$true] %s5186_s27 }
 0x72c   :  { %s6560_s2 = scalar_lea.vmem %s5187_s27, 32  ;;  %p6565_p1 = scmp.lt.s32.totalorder %s5187_s27, %s5187_s27 }
 0x72d   :  { %6255 = vmatpush3.bf16.msra.mxu1 %v6254_v11  ;;  %p6561_p0 = scmp.ne.s32.totalorder %s5187_s27, %s6560_s2  ;;  %p6566_p2 = scmp.lt.s32.totalorder %s6560_s2, %s6560_s2 }
 0x72e   :  { %6257 = vmatprep.subr.bf16.mxu1 %v6256_v26 }
 0x72f   :  { %p6567_p3 = por %p6566_p2, %p6565_p1 }
 0x731   :  { %6259 = vmatpush3.bf16.msra.mxu1 %v6258_v42  ;;  %p6568_p4 = pnand %p6567_p3, %p6561_p0 }
 0x732   :  { %6261 = vmatprep.subr.bf16.mxu1 %v6260_v46 }
 0x735   :  { %6263 = vmatpush3.bf16.msra.mxu1 %v6262_v43 }
 0x736   :  { %6265 = vmatprep.subr.bf16.mxu1 %v6264_v45 }
 0x739   :  { %6267 = vmatpush3.bf16.msra.mxu1 %v6266_v0 }
 0x73a   :  { %6300 = vmatprep.subr.bf16.mxu1 %v9614_v2 }
 0x73c   :  { %5462 = vmatmul.mubr.msk.f32.vlgmr.msra.gmra.mrb[44].mxu1 %vm3918_vm13, %v6604_v16  ;;  %vm5166_vm13 = vcmask 74752  }
 0x73d   :  { %5918 = vmatprep.mubr.msk.f32.mxu1 %vm6595_vm10, %v9514_v22  ;;  %6302 = vmatpush3.bf16.msra.mxu1 %v6301_v32 }
 0x73e   :  { %6303 = vmatprep.subr.bf16.mxu1 %v9614_v2 }
 0x741   :  { %6305 = vmatpush3.bf16.msra.mxu1 %v6304_v20 }
 0x742   :  { %6306 = vmatprep.subr.bf16.mxu1 %v9614_v2 }
 0x745   :  { %6308 = vmatpush3.bf16.msra.mxu1 %v6307_v52 }
 0x746   :  { %6309 = vmatprep.subr.bf16.mxu1 %v9614_v2 }
 0x749   :  { %6311 = vmatpush3.bf16.msra.mxu1 %v6310_v61 }
 0x74a   :  { %6312 = vmatprep.subr.bf16.mxu1 %v9614_v2 }
 0x74d   :  { %6314 = vmatpush3.bf16.msra.mxu1 %v6313_v47 }
 0x74e   :  { %6315 = vmatprep.subr.bf16.mxu1 %v9614_v2 }
 0x74f   :  { %v5545_v39 = vpop.f32.mrb[32].mxu1 }
 0x750   :  { %v5546_v15 = vpop.f32.mrb[33].mxu1 }
 0x751   :  { %v5547_v23 = vadd.f32 %v5546_v15, %v5545_v39  ;;  %6317 = vmatpush3.bf16.msra.mxu1 %v6316_v19 }
 0x752   :  { %5916 = vmatprep.subr.mxu1 %v9514_v22 }
 0x755   :  { %5917 = vmatpush3.msk.msra.mxu1 %vm2898_vm12, %v5038_v9 }
 0x757   :  { %v5720_v4 = vpop.f32.mrb[14].mxu0 }
 0x758   :  { %v5721_v30 = vpop.f32.mrb[15].mxu0 }
 0x759   :  { %v5722_v41 = vadd.f32 %v5721_v30, %v5720_v4 }
 0x76f   :  { %v5580_v54 = vpop.f32.mrb[34].mxu1 }
 0x770   :  { %v5581_v12 = vpop.f32.mrb[35].mxu1 }
 0x771   :  { %v5582_v13 = vadd.f32 %v5581_v12, %v5580_v54 }
 0x773   :  { %v4421_v1 = vadd.f32 %v5582_v13, %v5547_v23 }
 0x778   :  { %v5790_v60 = vpop.f32.mrb[24].mxu0 }
 0x779   :  { %v5791_v6 = vpop.f32.mrb[25].mxu0 }
 0x77a   :  { %v5792_v17 = vadd.f32 %v5791_v6, %v5790_v60 }
 0x78f   :  { %v5615_v58 = vpop.f32.mrb[36].mxu1 }
 0x790   :  { %v5616_v16 = vpop.f32.mrb[37].mxu1 }
 0x791   :  { %v5617_v24 = vadd.f32 %v5616_v16, %v5615_v58 }
 0x793   :  { %v4491_v14 = vadd.f32 %v5617_v24, %v4421_v1 }
 0x798   :  { %v5860_v35 = vpop.f32.mrb[26].mxu0 }
 0x799   :  { %v5861_v21 = vpop.f32.mrb[27].mxu0 }
 0x79a   :  { %v5862_v28 = vadd.f32 %v5861_v21, %v5860_v35 }
 0x7af   :  { %v5650_v56 = vpop.f32.mrb[38].mxu1 }
 0x7b0   :  { %v5651_v31 = vpop.f32.mrb[39].mxu1 }
 0x7b1   :  { %v5652_v5 = vadd.f32 %v5651_v31, %v5650_v56 }
 0x7b3   :  { %v4561_v50 = vadd.f32 %v5652_v5, %v4491_v14 }
 0x7cf   :  { %v5685_v37 = vpop.f32.mrb[40].mxu1 }
 0x7d0   :  { %v5686_v18 = vpop.f32.mrb[41].mxu1 }
 0x7d1   :  { %v5687_v11 = vadd.f32 %v5686_v18, %v5685_v37 }
 0x7d3   :  { %v4631_v26 = vadd.f32 %v5687_v11, %v4561_v50 }
 0x7d5   :  { %v4701_v63 = vadd.f32 %v5722_v41, %v4631_v26 }
 0x7ef   :  { %v5755_v10 = vpop.f32.mrb[42].mxu1 }
 0x7f0   :  { %v5756_v29 = vpop.f32.mrb[43].mxu1 }
 0x7f1   :  { %v5757_v57 = vadd.f32 %v5756_v29, %v5755_v10 }
 0x7f3   :  { %v4771_v42 = vadd.f32 %v5757_v57, %v4701_v63 }
 0x7f5   :  { %v4841_v46 = vadd.f32 %v5792_v17, %v4771_v42 }
 0x80f   :  { %v5825_v3 = vpop.f32.mrb[44].mxu1 }
 0x810   :  { %v5826_v7 = vpop.f32.mrb[45].mxu1 }
 0x811   :  { %v5827_v25 = vadd.f32 %v5826_v7, %v5825_v3 }
 0x813   :  { %v4911_v51 = vadd.f32 %v5827_v25, %v4841_v46 }
 0x815   :  { %v4981_v43 = vadd.f32 %v5862_v28, %v4911_v51 }
 0x817   :  { %v4984_v45 = vmul.f32 0.5, %v4981_v43 }
 0x819   :  { %vm4986_vm10 = vcmp.ge.f32.partialorder %v4984_v45, 1.0 }
 0x81a   :  { %v5463_v44 = vsel %vm4986_vm10, 1.0, %v9514_v22 }
 0x81b   :  { %vm4989_vm15 = vcmp.gt.f32.partialorder %v5463_v44, 0.0 }
 0x81c   :  { %v4990_v48 = vsel %vm4989_vm15, 0.0, %v4984_v45 }
 0x81d   :  { %v4991_v0 = vsub.f32 %v4981_v43, %v4990_v48 }
 0x81f   :  { %v4992_v2 = vmul.f32 0.5, %v4991_v0 }
 0x821   :  { %v4993_v39 = vadd.f32 %v4992_v2, %v4990_v48 }
 0x823   :  { %vm4994_vm3 = vcmp.ge.f32.partialorder %v4993_v39, 1.0 }
 0x824   :  { %v5464_v15 = vsel %vm4994_vm3, 1.0, %v9514_v22 }
 0x825   :  { %vm4997_vm7 = vcmp.gt.f32.partialorder %v5464_v15, 0.0  ;;  %v5014_v60 = vrot.slane %v5464_v15, 6 }
 0x826   :  { %v4998_v23 = vsel %vm4997_vm7, 0.0, %v4993_v39 }
 0x827   :  { %v4999_v4 = vsub.f32 %v4981_v43, %v4998_v23  ;;  %v5022_v24 = vsel %vm115_vm8, %v5463_v44, %v5014_v60 }
 0x829   :  { %v5000_v30 = vmul.f32 0.5, %v4999_v4 }
 0x82b   :  { %v5001_v41 = vadd.f32 %v5000_v30, %v4998_v23 }
 0x82d   :  { %vm5002_vm1 = vcmp.ge.f32.partialorder %v5001_v41, 1.0 }
 0x82e   :  { %v5465_v54 = vsel %vm5002_vm1, 1.0, %v9514_v22 }
 0x82f   :  { %vm5005_vm4 = vcmp.gt.f32.partialorder %v5465_v54, 0.0  ;;  %v5017_v17 = vrot.slane %v5465_v54, 4 }
 0x830   :  { %v5006_v12 = vsel %vm5005_vm4, 0.0, %v5001_v41 }
 0x831   :  { %v5007_v13 = vsub.f32 %v4981_v43, %v5006_v12  ;;  %v5023_v14 = vsel %vm2898_vm12, %v5022_v24, %v5017_v17 }
 0x833   :  { %v5008_v1 = vmul.f32 0.5, %v5007_v13 }
 0x835   :  { %v5009_v6 = vadd.f32 %v5008_v1, %v5006_v12 }
 0x837   :  { %vm5010_vm14 = vcmp.ge.f32.partialorder %v5009_v6, 1.0 }
 0x838   :  { %v5466_v58 = vsel %vm5010_vm14, 1.0, %v9514_v22 }
 0x839   :  { %v5020_v16 = vrot.slane %v5466_v58, 2 }
 0x83b   :  { %v5025_v35 = vsel %vm5024_vm2, %v5023_v14, %v5020_v16 }
 0x83c   :  { %5919 = vmatmul.mubr.msk.f32.vlgmr.msra.gmra.mrb[46].mxu1 %vm270_vm0, %v5025_v35 }
 0x90f   :  { %v5111_v21 = vpop.f32.mrb[46].mxu1 }
 0x910   :  { %v5115_v28 = vmul.f32 0.5, %v5111_v21  ;;  %v5920_v53 = vpop.f32.mrb[47].mxu1 }
 0x912   :  { %vm5117_vm5 = vcmp.ge.f32.partialorder %v5115_v28, 1.0 }
 0x913   :  { %v5469_v55 = vsel %vm5117_vm5, 1.0, %v9514_v22 }
 0x914   :  { %vm5120_vm6 = vcmp.gt.f32.partialorder %v5469_v55, 0.0 }
 0x915   :  { %v5121_v32 = vsel %vm5120_vm6, 0.0, %v5115_v28 }
 0x916   :  { %v5124_v56 = vrot.slane %v5121_v32, 6 }
 0x918   :  { %v5126_v31 = vsub.f32 %v5111_v21, %v5124_v56 }
 0x91a   :  { %v5127_v59 = vmul.f32 0.5, %v5126_v31 }
 0x91c   :  { %v5129_v8 = vrot.slane %v5127_v59, 2 }
 0x91e   :  { %v5131_v5 = vadd.f32 %v5129_v8, %v5121_v32 }
 0x920   :  { %vm5132_vm9 = vcmp.ge.f32.partialorder %v5131_v5, 1.0 }
 0x921   :  { %v5470_v20 = vsel %vm5132_vm9, 1.0, %v9514_v22 }
 0x922   :  { %vm5135_vm8 = vcmp.gt.f32.partialorder %v5470_v20, 0.0  ;;  %v5137_v19 = vadd.f32 %v5470_v20, %v5469_v55 }
 0x923   :  { %v5136_v50 = vsel %vm5135_vm8, 0.0, %v5131_v5 }
 0x924   :  { %v5139_v38 = vrot.slane %v5136_v50, 4 }
 0x926   :  { %v5141_v27 = vsub.f32 %v5111_v21, %v5139_v38 }
 0x928   :  { %v5142_v52 = vmul.f32 0.5, %v5141_v27 }
 0x92a   :  { %v5144_v40 = vrot.slane %v5142_v52, 4 }
 0x92c   :  { %v5146_v49 = vadd.f32 %v5144_v40, %v5136_v50 }
 0x92e   :  { %vm5147_vm0 = vcmp.ge.f32.partialorder %v5146_v49, 1.0 }
 0x92f   :  { %v5471_v61 = vsel %vm5147_vm0, 1.0, %v9514_v22 }
 0x930   :  { %vm5150_vm12 = vcmp.gt.f32.partialorder %v5471_v61, 0.0  ;;  %v5152_v37 = vadd.f32 %v5471_v61, %v5137_v19 }
 0x931   :  { %v5151_v33 = vsel %vm5150_vm12, 0.0, %v5146_v49 }
 0x932   :  { %v5154_v34 = vrot.slane %v5151_v33, 2 }
 0x934   :  { %v5156_v47 = vsub.f32 %v5111_v21, %v5154_v34 }
 0x936   :  { %v5157_v36 = vmul.f32 0.5, %v5156_v47 }
 0x938   :  { %v5159_v62 = vrot.slane %v5157_v36, 6 }
 0x93a   :  { %v5161_v9 = vadd.f32 %v5159_v62, %v5151_v33 }
 0x93c   :  { %vm5162_vm11 = vcmp.ge.f32.partialorder %v5161_v9, 1.0 }
 0x93d   :  { %v5472_v18 = vsel %vm5162_vm11, 1.0, %v9514_v22 }
 0x93e   :  { %v5165_v11 = vadd.f32 %v5472_v18, %v5152_v37 }
 0x940   :  { %v5167_v26 = vsel %vm5166_vm13, %v5165_v11, -inf }
 0x941   :  { %5168 = vmax.xlane.f32.xlu0 %v5167_v26 }
 0x9ce   :  { %v5169_v63 = vpop.xlane.xlu0 %5168 }
 0x9cf   :  { %v5170_v10 = vsub.f32 %v5165_v11, %v5169_v63 }
 0x9d1   :  { %v5171_v29 = vmul.f32 0.25, %v5170_v10 }
 0x9d3   :  { %v5172_v57 = vmul.f32 1.442695, %v5171_v29 }
 0x9d5   :  { %6552 = vpow2.f32 %v5172_v57 }
 0x9df   :  { %v6553_v42 = vpop.eup %6552 }
 0x9e0   :  { %v5174_v46 = vsel %vm5166_vm13, %v6553_v42, 0.0 }
 0x9e1   :  { %5175 = vadd.xlane.f32.xlu1 %v5174_v46 }
 0xa6e   :  { %v5176_v3 = vpop.xlane.xlu1 %5175 }
 0xa6f   :  { %6554 = vrcp.f32 %v5176_v3 }
 0xa79   :  { %v6555_v7 = vpop.eup %6554 }
 0xa7a   :  { %v5178_v22 = vmul.f32 %v6555_v7, %v6553_v42 }
 0xa7c   :  { %5179 = vst.msk [vmem:[#allocation6] sm:$0x3] %vm5166_vm13, %v5178_v22 }
 0xa7d   :  { %6571 = shalt.err (!%p6568_p4)
}
 0xa7e   :  { %s6572_s30 = scalar_lea.hbm %s9599_s9, 32 }
 0xa7f   :  { %p6573_p5 = scmp.ne.s32.totalorder %s9599_s9, %s6572_s30  ;;  %p6576_p6 = scmp.lt.u32.totalorder %s6572_s30, %s9599_s9 }
 0xa81   :  { %p6578_p7 = pnand %p6576_p6, %p6573_p5 }
 0xa83   :  { %6581 = shalt.err (!%p6578_p7)
}
 0xa84   :  { %5189 = dma.vmem_to_hbm [thread:$0]  %s5187_s27, 32, %s9599_s9, [#allocation7]  }
 0xa85   :  { %6582 = dma.done.wait [#allocation7], 32  }
 0xa86   :  { %6583 = vsyncadd [#allocation7], 4294967264 }
 0xa87   :  { %5193 = vsyncpa [#allocation7], 1 }

</bundles_post_ra>
